<compile_context>
chip_gen: v5e
topology: v5e:2x2
jax: 0.10.0
libtpu: 0.0.40
codegen_flags: <defaults>
</compile_context>

<pallas_src>
import functools

import jax
import jax.numpy as jnp
from jax.experimental import pallas as pl
from jax.experimental.pallas import tpu as pltpu

LRELU_SLOPE = 0.2
BN_EPS = 1e-5
NHIDDEN = 128                    # hard-coded in the PyTorch module
MXU_DTYPE = jnp.bfloat16         # MXU operand dtype (accumulation stays f32)
STORE_DTYPE = jnp.bfloat16       # dtype of large generated intermediates in HBM
VMEM_LIMIT = 64 * 1024 * 1024


# --------------------------------------------------------------------------
# small helpers
# --------------------------------------------------------------------------

def _pick_row_tile(m):
    """Largest row tile (multiple of 8) that divides m and leaves >= 2 grid steps."""
    for t in (1024, 512, 256, 128, 64, 32, 16, 8):
        if m % t == 0 and m // t >= 2:
            return t
    return m


def _pick_cout_tile(cout):
    for t in (512, 256, 128):
        if cout % t == 0:
            return t
    return cout


# --------------------------------------------------------------------------
# Kernel 1: 3x3 conv (pad=1) via im2col, Cout-tiled, fused bias + activation
# --------------------------------------------------------------------------

def _conv3x3_kernel(x_ref, w_ref, b_ref, o_ref, pad_ref, pat_ref, *, H, W, C_in, act):
    # Build the zero-padded image and the (H*W, 9*Cin) im2col patch once per image
    # (first Cout tile) and reuse it for every output-channel tile.
    @pl.when(pl.program_id(1) == 0)
    def _():
        pad_ref[...] = jnp.zeros((H + 2, W + 2, C_in), jnp.float32)
        pad_ref[1:H + 1, 1:W + 1, :] = x_ref[0].astype(jnp.float32)
        for k in range(9):
            dy, dx = k // 3, k % 3
            pat_ref[:, k * C_in:(k + 1) * C_in] = (
                pad_ref[dy:dy + H, dx:dx + W, :]
                .reshape(H * W, C_in).astype(MXU_DTYPE))

    acc = jnp.dot(pat_ref[...], w_ref[...], preferred_element_type=jnp.float32)
    acc = acc + b_ref[...]
    if act == "relu":
        acc = jnp.maximum(acc, 0.0)
    elif act == "sigmoid":
        acc = jax.nn.sigmoid(acc)
    o_ref[...] = acc.reshape(1, H, W, acc.shape[-1]).astype(o_ref.dtype)


def conv3x3(x, w, b, *, act="none", cin_block=0, cin_size=None,
            out_dtype=jnp.float32, tap_major_groups=None):
    """3x3 conv, padding 1.

    x: (N, H, W, Ctot) NHWC; only the channel block `cin_block` of width `cin_size`
       is read (via the BlockSpec), so several branches can share one hidden tensor.
    w: (Cout, Cin, 3, 3) PyTorch OIHW;  b: (Cout,).
    tap_major_groups=C permutes output channels from (c, tap) to (tap, c) ordering so
    that the DepthConv consumer can take contiguous per-tap lane slices.
    """
    N, H, W, Ctot = x.shape
    Cout, Cin = w.shape[0], w.shape[1]
    if cin_size is None:
        cin_size = Ctot
    assert Cin == cin_size

    if tap_major_groups is not None:
        C = tap_major_groups
        w = w.reshape(C, 9, Cin, 3, 3).transpose(1, 0, 2, 3, 4).reshape(Cout, Cin, 3, 3)
        b = b.reshape(C, 9).T.reshape(Cout)

    # weight matrix rows ordered (tap*Cin + c), matching the im2col patch columns.
    wmat = jnp.transpose(w, (2, 3, 1, 0)).reshape(9 * Cin, Cout).astype(MXU_DTYPE)
    bmat = b.reshape(1, Cout).astype(jnp.float32)

    tco = _pick_cout_tile(Cout)
    kern = functools.partial(_conv3x3_kernel, H=H, W=W, C_in=Cin, act=act)
    return pl.pallas_call(
        kern,
        out_shape=jax.ShapeDtypeStruct((N, H, W, Cout), out_dtype),
        grid=(N, Cout // tco),
        in_specs=[
            pl.BlockSpec((1, H, W, cin_size), lambda n, co: (n, 0, 0, cin_block)),
            pl.BlockSpec((9 * Cin, tco), lambda n, co: (0, co)),
            pl.BlockSpec((1, tco), lambda n, co: (0, co)),
        ],
        out_specs=pl.BlockSpec((1, H, W, tco), lambda n, co: (n, 0, 0, co)),
        scratch_shapes=[
            pltpu.VMEM((H + 2, W + 2, Cin), jnp.float32),   # padded image
            pltpu.VMEM((H * W, 9 * Cin), MXU_DTYPE),        # im2col patch
        ],
        compiler_params=pltpu.CompilerParams(
            dimension_semantics=("parallel", "arbitrary"),
            vmem_limit_bytes=VMEM_LIMIT),
    )(x, wmat, bmat)


# --------------------------------------------------------------------------
# Kernel 2: fused  BN(scale,shift) -> DepthConv -> 1x1 conv -> *SE -> lrelu (-> +res)
# --------------------------------------------------------------------------

def _fused_stage_kernel(*refs, H, W, C_in, C_out, has_residual, compute_stats):
    x_ref, scale_ref, shift_ref, cw_ref, w_ref, b_ref, se_ref = refs[:7]
    rest = list(refs[7:])
    res_ref = rest.pop(0) if has_residual else None
    out_ref = rest.pop(0)
    stats_ref = rest.pop(0) if compute_stats else None
    pad_ref = rest.pop(0)

    # BatchNorm folded to a per-channel scale/shift, written into a zero-padded
    # VMEM halo buffer for the depth-wise 3x3.
    xbn = x_ref[0].astype(jnp.float32) * scale_ref[...] + shift_ref[...]
    pad_ref[...] = jnp.zeros((H + 2, W + 2, C_in), jnp.float32)
    pad_ref[1:H + 1, 1:W + 1, :] = xbn

    # DepthConv: per-pixel, per-channel 3x3 with spatially-varying (tap-major) weights.
    cw = cw_ref[0]                                   # (H, W, 9*C_in)
    acc = jnp.zeros((H, W, C_in), jnp.float32)
    for k in range(9):
        dy, dx = k // 3, k % 3
        acc = acc + (cw[:, :, k * C_in:(k + 1) * C_in].astype(jnp.float32)
                     * pad_ref[dy:dy + H, dx:dx + W, :])

    # 1x1 conv on the MXU, fused bias + SE gate + leaky-relu (+ residual).
    y = jnp.dot(acc.reshape(H * W, C_in).astype(MXU_DTYPE), w_ref[...],
                preferred_element_type=jnp.float32)
    y = y + b_ref[...]
    y = y * se_ref[0].reshape(H * W, C_out).astype(jnp.float32)
    y = jnp.where(y > 0, y, LRELU_SLOPE * y)

    if compute_stats:
        stats_ref[0, 0:1, :] = jnp.sum(y, axis=0, keepdims=True)
        stats_ref[0, 1:2, :] = jnp.sum(y * y, axis=0, keepdims=True)
    if has_residual:
        y = y + res_ref[0].reshape(H * W, C_out).astype(jnp.float32)
    out_ref[...] = y.reshape(1, H, W, C_out).astype(out_ref.dtype)


def fused_main_stage(x, scale, shift, cw, w1x1, b1x1, se, residual=None,
                     compute_stats=False):
    N, H, W, C_in = x.shape
    C_out = w1x1.shape[1]
    assert cw.shape[-1] == 9 * C_in
    has_residual = residual is not None

    kern = functools.partial(_fused_stage_kernel, H=H, W=W, C_in=C_in, C_out=C_out,
                             has_residual=has_residual, compute_stats=compute_stats)

    in_specs = [
        pl.BlockSpec((1, H, W, C_in), lambda n: (n, 0, 0, 0)),       # x
        pl.BlockSpec((1, C_in), lambda n: (0, 0)),                   # BN scale
        pl.BlockSpec((1, C_in), lambda n: (0, 0)),                   # BN shift
        pl.BlockSpec((1, H, W, 9 * C_in), lambda n: (n, 0, 0, 0)),   # depthconv weights
        pl.BlockSpec((C_in, C_out), lambda n: (0, 0)),               # 1x1 weight
        pl.BlockSpec((1, C_out), lambda n: (0, 0)),                  # 1x1 bias
        pl.BlockSpec((1, H, W, C_out), lambda n: (n, 0, 0, 0)),      # SE gate
    ]
    args = [x,
            scale.reshape(1, C_in).astype(jnp.float32),
            shift.reshape(1, C_in).astype(jnp.float32),
            cw,
            w1x1.astype(MXU_DTYPE),
            b1x1.reshape(1, C_out).astype(jnp.float32),
            se]
    if has_residual:
        in_specs.append(pl.BlockSpec((1, H, W, C_out), lambda n: (n, 0, 0, 0)))
        args.append(residual)

    if compute_stats:
        out_shape = (jax.ShapeDtypeStruct((N, H, W, C_out), jnp.float32),
                     jax.ShapeDtypeStruct((N, 2, C_out), jnp.float32))
        out_specs = (pl.BlockSpec((1, H, W, C_out), lambda n: (n, 0, 0, 0)),
                     pl.BlockSpec((1, 2, C_out), lambda n: (n, 0, 0)))
    else:
        out_shape = jax.ShapeDtypeStruct((N, H, W, C_out), jnp.float32)
        out_specs = pl.BlockSpec((1, H, W, C_out), lambda n: (n, 0, 0, 0))

    res = pl.pallas_call(
        kern,
        out_shape=out_shape,
        grid=(N,),
        in_specs=in_specs,
        out_specs=out_specs,
        scratch_shapes=[pltpu.VMEM((H + 2, W + 2, C_in), jnp.float32)],
        compiler_params=pltpu.CompilerParams(
            dimension_semantics=("parallel",),
            vmem_limit_bytes=VMEM_LIMIT),
    )(*args)

    if compute_stats:
        y, stats = res
        return y, jnp.sum(stats, axis=0)            # (2, C_out) global sum / sumsq
    return res


# --------------------------------------------------------------------------
# Kernel 3: per-channel (sum, sum of squares) reduction, row-tiled accumulator
# --------------------------------------------------------------------------

def _channel_stats_kernel(x_ref, o_ref):
    x = x_ref[...].astype(jnp.float32)
    s1 = jnp.sum(x, axis=0, keepdims=True)
    s2 = jnp.sum(x * x, axis=0, keepdims=True)

    @pl.when(pl.program_id(0) == 0)
    def _():
        o_ref[0:1, :] = s1
        o_ref[1:2, :] = s2

    @pl.when(pl.program_id(0) > 0)
    def _():
        o_ref[0:1, :] = o_ref[0:1, :] + s1
        o_ref[1:2, :] = o_ref[1:2, :] + s2


def channel_stats(x2d):
    M, C = x2d.shape
    tm = _pick_row_tile(M)
    return pl.pallas_call(
        _channel_stats_kernel,
        out_shape=jax.ShapeDtypeStruct((2, C), jnp.float32),
        grid=(M // tm,),
        in_specs=[pl.BlockSpec((tm, C), lambda i: (i, 0))],
        out_specs=pl.BlockSpec((2, C), lambda i: (0, 0)),
        compiler_params=pltpu.CompilerParams(
            dimension_semantics=("arbitrary",),
            vmem_limit_bytes=VMEM_LIMIT),
    )(x2d)


# --------------------------------------------------------------------------
# Kernel 4: fused SPADE normalisation + spectral-normed 1x1 shortcut conv (row-tiled)
# --------------------------------------------------------------------------

def _spade_shortcut_kernel(x_ref, gb_ref, scale_ref, shift_ref, w_ref, o_ref, *, C):
    x = x_ref[...].astype(jnp.float32)
    gb = gb_ref[...].astype(jnp.float32)
    gamma = gb[:, :C]
    beta = gb[:, C:2 * C]
    xn = x * scale_ref[...] + shift_ref[...]                 # param-free BatchNorm
    v = xn * (1.0 + gamma) + beta
    o_ref[...] = jnp.dot(v.astype(MXU_DTYPE), w_ref[...],
                         preferred_element_type=jnp.float32)


def spade_shortcut(x, gamma_beta, scale, shift, w_s):
    N, H, W, C = x.shape
    fout = w_s.shape[1]
    M = N * H * W
    tm = _pick_row_tile(M)
    kern = functools.partial(_spade_shortcut_kernel, C=C)
    out = pl.pallas_call(
        kern,
        out_shape=jax.ShapeDtypeStruct((M, fout), jnp.float32),
        grid=(M // tm,),
        in_specs=[
            pl.BlockSpec((tm, C), lambda m: (m, 0)),
            pl.BlockSpec((tm, 2 * C), lambda m: (m, 0)),
            pl.BlockSpec((1, C), lambda m: (0, 0)),
            pl.BlockSpec((1, C), lambda m: (0, 0)),
            pl.BlockSpec((C, fout), lambda m: (0, 0)),
        ],
        out_specs=pl.BlockSpec((tm, fout), lambda m: (m, 0)),
        compiler_params=pltpu.CompilerParams(
            dimension_semantics=("parallel",),
            vmem_limit_bytes=VMEM_LIMIT),
    )(x.reshape(M, C), gamma_beta.reshape(M, 2 * C),
      scale.reshape(1, C).astype(jnp.float32), shift.reshape(1, C).astype(jnp.float32),
      w_s.astype(MXU_DTYPE))
    return out.reshape(N, H, W, fout)


# --------------------------------------------------------------------------
# Parameter initialization (deterministic, synthetic)
# --------------------------------------------------------------------------

def _conv_init(key, cin, cout, k, scale=0.05):
    kw, kb = jax.random.split(key)
    w = scale * jax.random.normal(kw, (cout, cin, k, k), jnp.float32)
    b = scale * jax.random.normal(kb, (cout,), jnp.float32)
    return w, b


def init_params(key, fin, fout, semantic_nc):
    assert fout <= fin, "DepthsepCCBlock (like the PyTorch original) requires fout <= fin"
    fmiddle = min(fin, fout)
    keys = iter(jax.random.split(key, 32))
    p = {"fin": fin, "fout": fout, "fmiddle": fmiddle,
         "learned_shortcut": fin != fout}

    # generated-weight branches (first layer: semantic_nc -> 128, second layer below)
    p["gw1_0_w"], p["gw1_0_b"] = _conv_init(next(keys), semantic_nc, NHIDDEN, 3)
    p["gw1_1_w"], p["gw1_1_b"] = _conv_init(next(keys), NHIDDEN, fin * 9, 3)
    p["gw2_0_w"], p["gw2_0_b"] = _conv_init(next(keys), semantic_nc, NHIDDEN, 3)
    p["gw2_1_w"], p["gw2_1_b"] = _conv_init(next(keys), NHIDDEN, fout * 9, 3)
    p["se1_0_w"], p["se1_0_b"] = _conv_init(next(keys), semantic_nc, NHIDDEN, 3)
    p["se1_1_w"], p["se1_1_b"] = _conv_init(next(keys), NHIDDEN, fmiddle, 3)
    p["se2_0_w"], p["se2_0_b"] = _conv_init(next(keys), semantic_nc, NHIDDEN, 3)
    p["se2_1_w"], p["se2_1_b"] = _conv_init(next(keys), NHIDDEN, fout, 3)

    # main path 1x1 convs (stored directly as (Cin, Cout) matmul matrices)
    conv1_w, p["conv1_b"] = _conv_init(next(keys), fin, fmiddle, 1)
    conv3_w, p["conv3_b"] = _conv_init(next(keys), fmiddle, fout, 1)
    p["conv1_w_mat"] = conv1_w.reshape(fmiddle, fin).T       # (fin, fmiddle)
    p["conv3_w_mat"] = conv3_w.reshape(fout, fmiddle).T      # (fmiddle, fout)

    p["norm1_g"] = 1.0 + 0.1 * jax.random.normal(next(keys), (fin,), jnp.float32)
    p["norm1_b"] = 0.1 * jax.random.normal(next(keys), (fin,), jnp.float32)
    p["norm2_g"] = 1.0 + 0.1 * jax.random.normal(next(keys), (fmiddle,), jnp.float32)
    p["norm2_b"] = 0.1 * jax.random.normal(next(keys), (fmiddle,), jnp.float32)

    # shortcut: SPADE(fin, semantic_nc) + spectral-norm 1x1 conv (fin -> fout, no bias)
    p["sp_shared_w"], p["sp_shared_b"] = _conv_init(next(keys), semantic_nc, NHIDDEN, 3)
    p["sp_gamma_w"], p["sp_gamma_b"] = _conv_init(next(keys), NHIDDEN, fin, 3)
    p["sp_beta_w"], p["sp_beta_b"] = _conv_init(next(keys), NHIDDEN, fin, 3)

    ws_raw = 0.05 * jax.random.normal(next(keys), (fout, fin, 1, 1), jnp.float32)
    wmat = ws_raw.reshape(fout, fin)
    # spectral_norm: one deterministic power iteration (PyTorch default)
    u = jax.random.normal(next(keys), (fout,), jnp.float32)
    u = u / (jnp.linalg.norm(u) + 1e-12)
    v = wmat.T @ u
    v = v / (jnp.linalg.norm(v) + 1e-12)
    u = wmat @ v
    u = u / (jnp.linalg.norm(u) + 1e-12)
    sigma = jnp.dot(u, wmat @ v)
    p["conv_s_w_mat"] = (wmat / sigma).T                     # (fin, fout)
    return p


# --------------------------------------------------------------------------
# Forward pass (mirrors DepthsepCCBlock.forward)
# --------------------------------------------------------------------------

def nearest_resize(seg_nhwc, H, W):
    # F.interpolate(..., mode='nearest'): index = floor(i * in / out)
    N, Hs, Ws, C = seg_nhwc.shape
    ih = (jnp.arange(H) * Hs) // H
    iw = (jnp.arange(W) * Ws) // W
    return seg_nhwc[:, ih][:, :, iw]


def depthsep_cc_block_forward(params, x_nchw, seg_nchw):
    x = jnp.transpose(x_nchw, (0, 2, 3, 1)).astype(jnp.float32)      # NHWC
    seg = jnp.transpose(seg_nchw, (0, 2, 3, 1)).astype(jnp.float32)  # NHWC
    N, H, W, fin = x.shape
    fout, fmiddle = params["fout"], params["fmiddle"]
    learned_shortcut = params["learned_shortcut"]
    M = N * H * W

    segmap = nearest_resize(seg, H, W)

    # ---- merged first-layer segmap convs: one 3x3 conv producing all hidden branches
    branches = ["gw1_0", "gw2_0", "se1_0", "se2_0"]
    if learned_shortcut:
        branches.append("sp_shared")
    w_cat = jnp.concatenate([params[b + "_w"] for b in branches], axis=0)
    b_cat = jnp.concatenate([params[b + "_b"] for b in branches], axis=0)
    hidden = conv3x3(segmap, w_cat, b_cat, act="relu", out_dtype=STORE_DTYPE)

    # ---- second layer of each branch, reading its 128-channel slice of `hidden`
    conv_weights1 = conv3x3(hidden, params["gw1_1_w"], params["gw1_1_b"],
                            cin_block=0, cin_size=NHIDDEN,
                            tap_major_groups=fin, out_dtype=STORE_DTYPE)
    conv_weights2 = conv3x3(hidden, params["gw2_1_w"], params["gw2_1_b"],
                            cin_block=1, cin_size=NHIDDEN,
                            tap_major_groups=fout, out_dtype=STORE_DTYPE)
    se_weights1 = conv3x3(hidden, params["se1_1_w"], params["se1_1_b"], act="sigmoid",
                          cin_block=2, cin_size=NHIDDEN, out_dtype=STORE_DTYPE)
    se_weights2 = conv3x3(hidden, params["se2_1_w"], params["se2_1_b"], act="sigmoid",
                          cin_block=3, cin_size=NHIDDEN, out_dtype=STORE_DTYPE)

    # ---- batch statistics of x (shared by norm_1 and SPADE's param-free norm)
    stats_x = channel_stats(x.reshape(M, fin))
    mean_x = stats_x[0] / M
    var_x = stats_x[1] / M - mean_x * mean_x
    inv_x = jax.lax.rsqrt(var_x + BN_EPS)
    scale1 = params["norm1_g"] * inv_x
    shift1 = params["norm1_b"] - mean_x * scale1

    # ---- shortcut
    if learned_shortcut:
        w_gb = jnp.concatenate([params["sp_gamma_w"], params["sp_beta_w"]], axis=0)
        b_gb = jnp.concatenate([params["sp_gamma_b"], params["sp_beta_b"]], axis=0)
        gamma_beta = conv3x3(hidden, w_gb, b_gb, cin_block=4, cin_size=NHIDDEN,
                             out_dtype=STORE_DTYPE)
        x_s = spade_shortcut(x, gamma_beta, inv_x, -mean_x * inv_x,
                             params["conv_s_w_mat"])
    else:
        x_s = x

    # ---- main path stage 1: norm_1 -> conv_0 -> conv_1 -> *se1 -> lrelu (+ BN2 stats)
    dx1, stats_dx1 = fused_main_stage(
        x, scale1, shift1, conv_weights1,
        params["conv1_w_mat"], params["conv1_b"], se_weights1,
        residual=None, compute_stats=True)

    mean2 = stats_dx1[0] / M
    var2 = stats_dx1[1] / M - mean2 * mean2
    inv2 = jax.lax.rsqrt(var2 + BN_EPS)
    scale2 = params["norm2_g"] * inv2
    shift2 = params["norm2_b"] - mean2 * scale2

    # ---- main path stage 2: norm_2 -> conv_2 -> conv_3 -> *se2 -> lrelu -> + x_s
    out = fused_main_stage(
        dx1, scale2, shift2, conv_weights2,
        params["conv3_w_mat"], params["conv3_b"], se_weights2,
        residual=x_s, compute_stats=False)

    return jnp.transpose(out, (0, 3, 1, 2))  # back to NCHW


# --------------------------------------------------------------------------

if __name__ == "__main__":
    # small shapes: fin=8, fout=4 (so learned_shortcut=True), fmiddle=4, semantic_nc=3
    N, fin, fout, semantic_nc = 2, 8, 4, 3
    H = W = 16
    Hs = Ws = 8

    key = jax.random.PRNGKey(0)
    kx, ks, kp = jax.random.split(key, 3)
    x = jax.random.normal(kx, (N, fin, H, W), jnp.float32)        # NCHW like PyTorch
    seg = jax.random.normal(ks, (N, semantic_nc, Hs, Ws), jnp.float32)

    params = init_params(kp, fin, fout, semantic_nc)

    out = depthsep_cc_block_forward(params, x, seg)
    out = jax.block_until_ready(out)
    assert out.shape == (N, fout, H, W), out.shape
    assert bool(jnp.all(jnp.isfinite(out)))
    print("KERNEL_OK")
</pallas_src>

<mosaic_0001>
module attributes {stable_mosaic.version = 11 : i64} {
  func.func @_conv3x3_kernel(%arg0: i32, %arg1: i32, %arg2: memref<1x16x16x3xf32, #tpu.memory_space<vmem>>, %arg3: memref<27x128xbf16, #tpu.memory_space<vmem>>, %arg4: memref<1x128xf32, #tpu.memory_space<vmem>>, %arg5: memref<1x16x16x128xbf16, #tpu.memory_space<vmem>>, %arg6: memref<18x18x3xf32, #tpu.memory_space<vmem>>, %arg7: memref<256x27xbf16, #tpu.memory_space<vmem>>) attributes {dimension_semantics = [#tpu.dimension_semantics<parallel>, #tpu.dimension_semantics<arbitrary>], iteration_bounds = array<i64: 2, 5>, scalar_prefetch = 0 : i64, scratch_operands = 2 : i64, tpu.core_type = #tpu.core_type<tc>, window_params = [{transform_indices = @transform_0, window_bounds = array<i64: 1, 16, 16, 3>}, {transform_indices = @transform_1, window_bounds = array<i64: 27, 128>}, {transform_indices = @transform_2, window_bounds = array<i64: 1, 128>}, {transform_indices = @transform_3, window_bounds = array<i64: 1, 16, 16, 128>}]} {
    %c0_i32 = arith.constant 0 : i32
    %0 = arith.cmpi eq, %arg1, %c0_i32 : i32
    %1 = arith.extui %0 : i1 to i32
    %c0_i32_0 = arith.constant 0 : i32
    %2 = arith.cmpi ne, %1, %c0_i32_0 : i32
    scf.if %2 {
      %cst_11 = arith.constant 0.000000e+00 : f32
      %14 = vector.broadcast %cst_11 : f32 to vector<18x18x3xf32>
      %c0_12 = arith.constant 0 : index
      %c0_13 = arith.constant 0 : index
      %c0_14 = arith.constant 0 : index
      %15 = vector.load %arg6[%c0_12, %c0_13, %c0_14] : memref<18x18x3xf32, #tpu.memory_space<vmem>>, vector<18x18x3xf32>
      tpu.vector_store %arg6[%c0_12, %c0_13, %c0_14], %14 {strides = array<i32>} : memref<18x18x3xf32, #tpu.memory_space<vmem>>, vector<18x18x3xf32>,
      %c0_15 = arith.constant 0 : index
      %c0_16 = arith.constant 0 : index
      %c0_17 = arith.constant 0 : index
      %c0_18 = arith.constant 0 : index
      %16 = vector.load %arg2[%c0_15, %c0_16, %c0_17, %c0_18] : memref<1x16x16x3xf32, #tpu.memory_space<vmem>>, vector<1x16x16x3xf32>
      %17 = vector.shape_cast %16 : vector<1x16x16x3xf32> to vector<16x16x3xf32>
      %c1 = arith.constant 1 : index
      %c1_19 = arith.constant 1 : index
      %c0_20 = arith.constant 0 : index
      %18 = vector.load %arg6[%c1, %c1_19, %c0_20] : memref<18x18x3xf32, #tpu.memory_space<vmem>>, vector<16x16x3xf32>
      tpu.vector_store %arg6[%c1, %c1_19, %c0_20], %17 {strides = array<i32>} : memref<18x18x3xf32, #tpu.memory_space<vmem>>, vector<16x16x3xf32>,
      %c0_21 = arith.constant 0 : index
      %c0_22 = arith.constant 0 : index
      %c0_23 = arith.constant 0 : index
      %19 = vector.load %arg6[%c0_21, %c0_22, %c0_23] : memref<18x18x3xf32, #tpu.memory_space<vmem>>, vector<16x16x3xf32>
      %20 = vector.shape_cast %19 : vector<16x16x3xf32> to vector<256x3xf32>
      %21 = arith.truncf %20 : vector<256x3xf32> to vector<256x3xbf16>
      %c0_24 = arith.constant 0 : index
      %c0_25 = arith.constant 0 : index
      %22 = vector.load %arg7[%c0_24, %c0_25] : memref<256x27xbf16, #tpu.memory_space<vmem>>, vector<256x3xbf16>
      tpu.vector_store %arg7[%c0_24, %c0_25], %21 {strides = array<i32>} : memref<256x27xbf16, #tpu.memory_space<vmem>>, vector<256x3xbf16>,
      %c0_26 = arith.constant 0 : index
      %c1_27 = arith.constant 1 : index
      %c0_28 = arith.constant 0 : index
      %23 = vector.load %arg6[%c0_26, %c1_27, %c0_28] : memref<18x18x3xf32, #tpu.memory_space<vmem>>, vector<16x16x3xf32>
      %24 = vector.shape_cast %23 : vector<16x16x3xf32> to vector<256x3xf32>
      %25 = arith.truncf %24 : vector<256x3xf32> to vector<256x3xbf16>
      %c0_29 = arith.constant 0 : index
      %c3 = arith.constant 3 : index
      %26 = vector.load %arg7[%c0_29, %c3] : memref<256x27xbf16, #tpu.memory_space<vmem>>, vector<256x3xbf16>
      tpu.vector_store %arg7[%c0_29, %c3], %25 {strides = array<i32>} : memref<256x27xbf16, #tpu.memory_space<vmem>>, vector<256x3xbf16>,
      %c0_30 = arith.constant 0 : index
      %c2 = arith.constant 2 : index
      %c0_31 = arith.constant 0 : index
      %27 = vector.load %arg6[%c0_30, %c2, %c0_31] : memref<18x18x3xf32, #tpu.memory_space<vmem>>, vector<16x16x3xf32>
      %28 = vector.shape_cast %27 : vector<16x16x3xf32> to vector<256x3xf32>
      %29 = arith.truncf %28 : vector<256x3xf32> to vector<256x3xbf16>
      %c0_32 = arith.constant 0 : index
      %c6 = arith.constant 6 : index
      %30 = vector.load %arg7[%c0_32, %c6] : memref<256x27xbf16, #tpu.memory_space<vmem>>, vector<256x3xbf16>
      tpu.vector_store %arg7[%c0_32, %c6], %29 {strides = array<i32>} : memref<256x27xbf16, #tpu.memory_space<vmem>>, vector<256x3xbf16>,
      %c1_33 = arith.constant 1 : index
      %c0_34 = arith.constant 0 : index
      %c0_35 = arith.constant 0 : index
      %31 = vector.load %arg6[%c1_33, %c0_34, %c0_35] : memref<18x18x3xf32, #tpu.memory_space<vmem>>, vector<16x16x3xf32>
      %32 = vector.shape_cast %31 : vector<16x16x3xf32> to vector<256x3xf32>
      %33 = arith.truncf %32 : vector<256x3xf32> to vector<256x3xbf16>
      %c0_36 = arith.constant 0 : index
      %c9 = arith.constant 9 : index
      %34 = vector.load %arg7[%c0_36, %c9] : memref<256x27xbf16, #tpu.memory_space<vmem>>, vector<256x3xbf16>
      tpu.vector_store %arg7[%c0_36, %c9], %33 {strides = array<i32>} : memref<256x27xbf16, #tpu.memory_space<vmem>>, vector<256x3xbf16>,
      %c1_37 = arith.constant 1 : index
      %c1_38 = arith.constant 1 : index
      %c0_39 = arith.constant 0 : index
      %35 = vector.load %arg6[%c1_37, %c1_38, %c0_39] : memref<18x18x3xf32, #tpu.memory_space<vmem>>, vector<16x16x3xf32>
      %36 = vector.shape_cast %35 : vector<16x16x3xf32> to vector<256x3xf32>
      %37 = arith.truncf %36 : vector<256x3xf32> to vector<256x3xbf16>
      %c0_40 = arith.constant 0 : index
      %c12 = arith.constant 12 : index
      %38 = vector.load %arg7[%c0_40, %c12] : memref<256x27xbf16, #tpu.memory_space<vmem>>, vector<256x3xbf16>
      tpu.vector_store %arg7[%c0_40, %c12], %37 {strides = array<i32>} : memref<256x27xbf16, #tpu.memory_space<vmem>>, vector<256x3xbf16>,
      %c1_41 = arith.constant 1 : index
      %c2_42 = arith.constant 2 : index
      %c0_43 = arith.constant 0 : index
      %39 = vector.load %arg6[%c1_41, %c2_42, %c0_43] : memref<18x18x3xf32, #tpu.memory_space<vmem>>, vector<16x16x3xf32>
      %40 = vector.shape_cast %39 : vector<16x16x3xf32> to vector<256x3xf32>
      %41 = arith.truncf %40 : vector<256x3xf32> to vector<256x3xbf16>
      %c0_44 = arith.constant 0 : index
      %c15 = arith.constant 15 : index
      %42 = vector.load %arg7[%c0_44, %c15] : memref<256x27xbf16, #tpu.memory_space<vmem>>, vector<256x3xbf16>
      tpu.vector_store %arg7[%c0_44, %c15], %41 {strides = array<i32>} : memref<256x27xbf16, #tpu.memory_space<vmem>>, vector<256x3xbf16>,
      %c2_45 = arith.constant 2 : index
      %c0_46 = arith.constant 0 : index
      %c0_47 = arith.constant 0 : index
      %43 = vector.load %arg6[%c2_45, %c0_46, %c0_47] : memref<18x18x3xf32, #tpu.memory_space<vmem>>, vector<16x16x3xf32>
      %44 = vector.shape_cast %43 : vector<16x16x3xf32> to vector<256x3xf32>
      %45 = arith.truncf %44 : vector<256x3xf32> to vector<256x3xbf16>
      %c0_48 = arith.constant 0 : index
      %c18 = arith.constant 18 : index
      %46 = vector.load %arg7[%c0_48, %c18] : memref<256x27xbf16, #tpu.memory_space<vmem>>, vector<256x3xbf16>
      tpu.vector_store %arg7[%c0_48, %c18], %45 {strides = array<i32>} : memref<256x27xbf16, #tpu.memory_space<vmem>>, vector<256x3xbf16>,
      %c2_49 = arith.constant 2 : index
      %c1_50 = arith.constant 1 : index
      %c0_51 = arith.constant 0 : index
      %47 = vector.load %arg6[%c2_49, %c1_50, %c0_51] : memref<18x18x3xf32, #tpu.memory_space<vmem>>, vector<16x16x3xf32>
      %48 = vector.shape_cast %47 : vector<16x16x3xf32> to vector<256x3xf32>
      %49 = arith.truncf %48 : vector<256x3xf32> to vector<256x3xbf16>
      %c0_52 = arith.constant 0 : index
      %c21 = arith.constant 21 : index
      %50 = vector.load %arg7[%c0_52, %c21] : memref<256x27xbf16, #tpu.memory_space<vmem>>, vector<256x3xbf16>
      tpu.vector_store %arg7[%c0_52, %c21], %49 {strides = array<i32>} : memref<256x27xbf16, #tpu.memory_space<vmem>>, vector<256x3xbf16>,
      %c2_53 = arith.constant 2 : index
      %c2_54 = arith.constant 2 : index
      %c0_55 = arith.constant 0 : index
      %51 = vector.load %arg6[%c2_53, %c2_54, %c0_55] : memref<18x18x3xf32, #tpu.memory_space<vmem>>, vector<16x16x3xf32>
      %52 = vector.shape_cast %51 : vector<16x16x3xf32> to vector<256x3xf32>
      %53 = arith.truncf %52 : vector<256x3xf32> to vector<256x3xbf16>
      %c0_56 = arith.constant 0 : index
      %c24 = arith.constant 24 : index
      %54 = vector.load %arg7[%c0_56, %c24] : memref<256x27xbf16, #tpu.memory_space<vmem>>, vector<256x3xbf16>
      tpu.vector_store %arg7[%c0_56, %c24], %53 {strides = array<i32>} : memref<256x27xbf16, #tpu.memory_space<vmem>>, vector<256x3xbf16>,
    } else {
    }
    %c0 = arith.constant 0 : index
    %c0_1 = arith.constant 0 : index
    %3 = vector.load %arg7[%c0, %c0_1] : memref<256x27xbf16, #tpu.memory_space<vmem>>, vector<256x27xbf16>
    %c0_2 = arith.constant 0 : index
    %c0_3 = arith.constant 0 : index
    %4 = vector.load %arg3[%c0_2, %c0_3] : memref<27x128xbf16, #tpu.memory_space<vmem>>, vector<27x128xbf16>
    %cst = arith.constant dense<0.000000e+00> : vector<256x128xf32>
    %5 = tpu.matmul %3, %4, %cst {dimension_numbers = #tpu.dot_dimension_numbers<[1], [0], [0], [1], [0, 0, 1, 1], [], []>} : vector<256x27xbf16>, vector<27x128xbf16>, vector<256x128xf32> -> vector<256x128xf32>
    %c0_4 = arith.constant 0 : index
    %c0_5 = arith.constant 0 : index
    %6 = vector.load %arg4[%c0_4, %c0_5] : memref<1x128xf32, #tpu.memory_space<vmem>>, vector<1x128xf32>
    %7 = vector.broadcast %6 : vector<1x128xf32> to vector<256x128xf32>
    %8 = arith.addf %5, %7 : vector<256x128xf32>
    %cst_6 = arith.constant 0.000000e+00 : f32
    %9 = vector.broadcast %cst_6 : f32 to vector<256x128xf32>
    %10 = arith.maximumf %8, %9 : vector<256x128xf32>
    %11 = vector.shape_cast %10 : vector<256x128xf32> to vector<1x16x16x128xf32>
    %12 = arith.truncf %11 : vector<1x16x16x128xf32> to vector<1x16x16x128xbf16>
    %c0_7 = arith.constant 0 : index
    %c0_8 = arith.constant 0 : index
    %c0_9 = arith.constant 0 : index
    %c0_10 = arith.constant 0 : index
    %13 = vector.load %arg5[%c0_7, %c0_8, %c0_9, %c0_10] : memref<1x16x16x128xbf16, #tpu.memory_space<vmem>>, vector<1x16x16x128xbf16>
    tpu.vector_store %arg5[%c0_7, %c0_8, %c0_9, %c0_10], %12 {strides = array<i32>} : memref<1x16x16x128xbf16, #tpu.memory_space<vmem>>, vector<1x16x16x128xbf16>,
    return
  }
  func.func @transform_0(%arg0: i32, %arg1: i32) -> (i32, i32, i32, i32) {
    %c0_i32 = arith.constant 0 : i32
    %c0_i32_0 = arith.constant 0 : i32
    %c0_i32_1 = arith.constant 0 : i32
    %c0_i32_2 = arith.constant 0 : i32
    return %arg0, %c0_i32, %c0_i32_0, %c0_i32_1 : i32, i32, i32, i32
  }
  func.func @transform_1(%arg0: i32, %arg1: i32) -> (i32, i32) {
    %c0_i32 = arith.constant 0 : i32
    %c0_i32_0 = arith.constant 0 : i32
    return %c0_i32, %arg1 : i32, i32
  }
  func.func @transform_2(%arg0: i32, %arg1: i32) -> (i32, i32) {
    %c0_i32 = arith.constant 0 : i32
    %c0_i32_0 = arith.constant 0 : i32
    return %c0_i32, %arg1 : i32, i32
  }
  func.func @transform_3(%arg0: i32, %arg1: i32) -> (i32, i32, i32, i32) {
    %c0_i32 = arith.constant 0 : i32
    %c0_i32_0 = arith.constant 0 : i32
    %c0_i32_1 = arith.constant 0 : i32
    return %arg0, %c0_i32, %c0_i32_0, %arg1 : i32, i32, i32, i32
  }
}

</mosaic_0001>

<bundles_post_ra>
// kernel: tpu_custom_call.1
= control target key start
LH: loop header
LB: loop body
LE: loop exit
PB: predicated region body
PF: predicated region fallthrough
CT: control target
= control target key end

     0   :  { %s4512_s0 = inlined_call_operand.vmem [shape: f32[2,16,16,3], index: 0, kind: input, shape index: {}]   ;;  %s4513_s1 = inlined_call_operand.vmem [shape: bf16[27,640], index: 1, kind: input, shape index: {}]   ;;  %s4514_s2 = inlined_call_operand.vmem [shape: f32[1,640], index: 2, kind: input, shape index: {}]   ;;  %s4515_s3 = inlined_call_operand.hbm [shape: bf16[2,16,16,640], index: 3, kind: output, shape index: {}]  }
   0x1   :  { %4517 = sst [smem:[#allocation9_spill]] %s4513_s1 }
   0x2   :  { %8 = vsyncpa [#allocation6], 0 }
   0x3   :  { %10 = vsyncpa [#allocation6 + $0x1], 0  ;;  %s3258_s12 = smov 0   ;;  %s3260_s13 = smov 0  }
   0x4   :  { %s3262_s14 = smov 0   ;;  %s3264_s15 = smov 0  }
   0x5   :  { %s3266_s16 = smov 0   ;;  %s3268_s17 = smov 0  }
   0x6   :  { %s3270_s18 = smov 0   ;;  %s3272_s19 = smov 0  }
   0x7   :  { %s3274_s20 = smov 0   ;;  %s3276_s21 = smov 0  }
   0x8 LB: > { %s2787_s22 = sadd.s32 4294967295, %s3223_s21   ;;  %s2788_s23 = sadd.s32 4294967294, %s3223_s21   ;;  %s3223_s21 = sphi %s3276_s21, %s16_s21   ;;  %s3219_s20 = sphi %s3274_s20, %s4532_s20   ;;  %s3215_s19 = sphi %s3272_s19, %s4531_s19   ;;  %s3211_s18 = sphi %s3270_s18, %s4530_s18   ;;  %s3207_s17 = sphi %s3268_s17, %s4529_s17   ;;  %s3203_s16 = sphi %s3266_s16, %s4528_s16   ;;  %s3199_s15 = sphi %s3264_s15, %s4527_s15   ;;  %s3195_s14 = sphi %s3262_s14, %s4526_s14   ;;  %s3191_s13 = sphi %s3260_s13, %s4525_s13   ;;  %s3187_s12 = sphi %s3258_s12, %s4524_s12  }
   0x9   : > { %s25_s24 = sadd.s32 1, %s3215_s19  ;;  %s28_s25 = sadd.s32 1, %s3219_s20 }
   0xa   : > { %p26_p0 = scmp.ge.s32.totalorder %s25_s24, 5  ;;  %s61_s26 = sadd.s32 1, %s3203_s16 }
   0xb   : > { %p68_p1 = scmp.ne.s32.totalorder %s3203_s16, %s3199_s15  ;;  %p69_p2 = scmp.eq.s32.totalorder %s3223_s21, 0 }
   0xc   : > { %s4534_s24 = smov (%p26_p0, %s25_s24), 0  ;;  %s4536_s25 = smov (!%p26_p0, %s28_s25), %s3219_s20 }
   0xd   : > { %s58_s27 = ssub.s32 %s3215_s19, %s4534_s24  ;;  %p3321_p3 = por %p69_p2, %p68_p1 }
   0xe   : > { %p30_p4 = scmp.ge.s32.totalorder %s4536_s25, 2  ;;  %p59_p5 = scmp.eq.s32.totalorder %s58_s27, 0 }
   0xf   : > { %s115_s29 = sadd.s32 1, %s3195_s14  ;;  %p125_p6 = scmp.ne.s32.totalorder %s3195_s14, %s3191_s13 }
  0x10   : > { %s4538_s25 = smov (%p30_p4, %s4536_s25), 0  ;;  %p126_p7 = scmp.eq.s32.totalorder %s2787_s22, 9 }
  0x11   : > { %4519 = sst [smem:[#allocation8_spill]] %s4538_s25  ;;  %s110_s4 = ssub.s32 %s3219_s20, %s4538_s25 }
  0x12   : > { %s3331_s30 = scalar_select %p59_p5, %s3203_s16, %s61_s26  }
  0x13   : > { %s112_s5 = sor.u32 %s110_s4, %s58_s27  ;;  %p131_p8 = scmp.ne.s32.totalorder %s3191_s13, %s3187_s12 }
  0x14   : > { %p113_p9 = scmp.eq.s32.totalorder %s112_s5, 0  ;;  %p3337_p10 = por %p126_p7, %p125_p6 }
  0x15   : > { %p132_p11 = scmp.eq.s32.totalorder %s2788_s23, 9  ;;  %p2790_p13 = scmp.ge.s32.totalorder %s3223_s21, 10 }
  0x16   : > { %s3342_s7 = scalar_select %p113_p9, %s3195_s14, %s115_s29  }
  0x17   : > { %p3344_p12 = por %p132_p11, %p131_p8  ;;  %148 = sbr.rel (%p2790_p13) target bundleno = 42 (0x2a), region = 16 }
  0x1c   : > { %159 = sbr.rel (!%p3321_p3) target bundleno = 42 (0x2a), region = 24  ;;  %s161_s9 = sand.u32 (%p3321_p3), 1, %s3203_s16  }
  0x1d   : > { %s2792_s10 = sshll.u32 (%p3321_p3), %s3215_s19, 2  ;;  %s2791_s11 = sshll.u32 (%p3321_p3), %s161_s9, 4 }
  0x1e   : > { %s4522_s1 = sld [smem:[#allocation9_spill]] (%p3321_p3)  ;;  %s163_s27 = scalar_lea.vmem (%p3321_p3), [#allocation4], %s2791_s11 }
  0x24   : > { %s165_s23 = scalar_lea.vmem %s4522_s1, %s2792_s10 }
  0x25   : > { %v182_v0 = vld [vmem:[%s165_s23] sm:$0xf]  ;;  %v184_v1 = vld [vmem:[%s165_s23 + $0x14] sm:$0xf]  ;;  %v186_v2 = vld [vmem:[%s165_s23 + $0x28] sm:$0xf] }
  0x26   : > { %183 = vst [vmem:[%s163_s27] sm:$0xf] %v182_v0  ;;  %v188_v3 = vld [vmem:[%s165_s23 + $0x3c] sm:$0xf] }
  0x27   : > { %185 = vst [vmem:[%s163_s27 + $0x4] sm:$0xf] %v184_v1 }
  0x28   : > { %187 = vst [vmem:[%s163_s27 + $0x8] sm:$0xf] %v186_v2 }
  0x29   : > { %189 = vst [vmem:[%s163_s27 + $0xc] sm:$0xf] %v188_v3 }
  0x2a PF: > { %p2793_p0 = scmp.ge.s32.totalorder %s3223_s21, 1  ;;  %p226_p1 = scmp.lt.s32.totalorder %s3223_s21, 11 }
  0x2c   : > { %p227_p2 = pnand %p2793_p0, %p226_p1 }
  0x2d   : > { %s233_s28 = sand.u32 (!%p227_p2), 1, %s3199_s15   ;;  %s261_s29 = sand.u32 (!%p227_p2), 1, %s3191_s13  }
  0x2e   : > { %230 = sbr.rel (%p227_p2) target bundleno = 1119 (0x45f), region = 69  ;;  %s2794_s4 = sshll.u32 (!%p227_p2), %s233_s28, 4 }
  0x2f   : > { %s2795_s5 = sshll.u32 (!%p227_p2), %s261_s29, 7  ;;  %p264_p3 = scmp.lt.s32.totalorder (!%p227_p2), %s3211_s18, 1 }
  0x30   : > { %p269_p4 = scmp.lt.s32.totalorder (!%p227_p2), %s3207_s17, 4  ;;  %s3377_s25 = scalar_lea.vmem (!%p227_p2), [#allocation4], %s2794_s4 }
  0x31   : > { %s3379_s28 = scalar_lea.vmem (!%p227_p2), [#allocation5], %s2795_s5  ;;  %p2798_p5 = scmp.ne.s32.totalorder (!%p227_p2), %s3207_s17, 0 }
  0x33   : > { %s265_s9 = scalar_select %p264_p3, %s3211_s18, 1 }
  0x34   : > { %s3366_s10 = scalar_select %p269_p4, %s3207_s17, 4 }
  0x35   : > { %s2891_s11 = sshll.u32 %s265_s9, 8  ;;  %276 = sbr.rel (%p2798_p5) target bundleno = 905 (0x389), region = 77 }
  0x36   : > { %s3371_s23 = scalar_lea.vmem %s4512_s0, %s2891_s11  ;;  %s271_s15 = scalar_lea.vmem %s4514_s2, %s3366_s10 }
  0x37   : > { %s3226_s1 = smov (!%p2798_p5), 3   ;;  %s3227_s4 = smov (!%p2798_p5), 6  }
  0x38   : > { %s3228_s5 = smov (!%p2798_p5), 9   ;;  %s3229_s9 = smov (!%p2798_p5), 12  }
  0x39   : > { %s3230_s11 = smov (!%p2798_p5), 15   ;;  %s3231_s22 = smov (!%p2798_p5), 18  }
  0x3a   : > { %vm277_vm0 = vcmask 23552   ;;  %v3225_v4 = vmov 0.0   ;;  %v333_v7 = vld [vmem:[%s3371_s23] sm:$0xff]  ;;  %vm280_vm1 = vcmask 17408   ;;  %v334_v12 = vld [vmem:[%s3371_s23 + $0x8] sm:$0xff]  ;;  %v340_v15 = vld [vmem:[%s3371_s23 + $0x38] sm:$0xff] }
  0x3b   : > { %278 = vst.msk [vmem:[#allocation2] sm:$0xff] %vm277_vm0, %v3225_v4  ;;  %v337_v13 = vld [vmem:[%s3371_s23 + $0x20] sm:$0xff]  ;;  %v338_v14 = vld [vmem:[%s3371_s23 + $0x28] sm:$0xff]  ;;  %v335_v16 = vld [vmem:[%s3371_s23 + $0x10] sm:$0xff]  ;;  %vm462_vm2 = vcmask 19456   ;;  %vm687_vm3 = vcmask 44056  }
  0x3c   : > { %279 = vst.msk [vmem:[#allocation2 + $0x8] sm:$0xff] %vm277_vm0, %v3225_v4  ;;  %v341_v17 = vld [vmem:[%s3371_s23 + $0x40] sm:$0xff]  ;;  %v343_v18 = vld [vmem:[%s3371_s23 + $0x50] sm:$0xff]  ;;  %v336_v19 = vld [vmem:[%s3371_s23 + $0x18] sm:$0xff]  ;;  %vm912_vm4 = vcmask 68656   ;;  %vm1137_vm5 = vcmask 93256  }
  0x3d   : > { %282 = vst.msk [vmem:[#allocation2 + $0x18] sm:$0xff] %vm277_vm0, %v3225_v4  ;;  %v344_v20 = vld [vmem:[%s3371_s23 + $0x58] sm:$0xff]  ;;  %v346_v21 = vld [vmem:[%s3371_s23 + $0x68] sm:$0xff]  ;;  %v339_v23 = vld [vmem:[%s3371_s23 + $0x30] sm:$0xff]  ;;  %vm1362_vm6 = vcmask 117856   ;;  %vm1587_vm7 = vcmask 142456  }
  0x3e   : > { %283 = vst.msk [vmem:[#allocation2 + $0x20] sm:$0xff] %vm277_vm0, %v3225_v4  ;;  %v347_v26 = vld [vmem:[%s3371_s23 + $0x70] sm:$0xff]  ;;  %v349_v28 = vld [vmem:[%s3371_s23 + $0x80] sm:$0xff]  ;;  %v342_v29 = vld [vmem:[%s3371_s23 + $0x48] sm:$0xff]  ;;  %s3232_s26 = smov 21   ;;  %vm1813_vm8 = vcmask 167056  }
  0x3f   : > { %285 = vst.msk [vmem:[#allocation2 + $0x30] sm:$0xff] %vm277_vm0, %v3225_v4  ;;  %v350_v32 = vld [vmem:[%s3371_s23 + $0x88] sm:$0xff]  ;;  %v352_v35 = vld [vmem:[%s3371_s23 + $0x98] sm:$0xff]  ;;  %v345_v39 = vld [vmem:[%s3371_s23 + $0x60] sm:$0xff]  ;;  %vm2038_vm9 = vcmask 191656   ;;  %vm2263_vm10 = vcmask 216256  }
  0x40   : > { %286 = vst.msk [vmem:[#allocation2 + $0x38] sm:$0xff] %vm277_vm0, %v3225_v4  ;;  %v353_v40 = vld [vmem:[%s3371_s23 + $0xa0] sm:$0xff]  ;;  %v355_v41 = vld [vmem:[%s3371_s23 + $0xb0] sm:$0xff]  ;;  %v348_v48 = vld [vmem:[%s3371_s23 + $0x78] sm:$0xff] }
  0x41   : > { %288 = vst.msk [vmem:[#allocation2 + $0x48] sm:$0xff] %vm277_vm0, %v3225_v4  ;;  %v356_v49 = vld [vmem:[%s3371_s23 + $0xb8] sm:$0xff]  ;;  %v358_v50 = vld [vmem:[%s3371_s23 + $0xc8] sm:$0xff]  ;;  %v351_v57 = vld [vmem:[%s3371_s23 + $0x90] sm:$0xff] }
  0x42   : > { %289 = vst.msk [vmem:[#allocation2 + $0x50] sm:$0xff] %vm277_vm0, %v3225_v4  ;;  %v359_v58 = vld [vmem:[%s3371_s23 + $0xd0] sm:$0xff]  ;;  %v361_v59 = vld [vmem:[%s3371_s23 + $0xe0] sm:$0xff]  ;;  %v354_v2 = vld [vmem:[%s3371_s23 + $0xa8] sm:$0xff] }
  0x43   : > { %v495_v5 = vld [vmem:[#allocation2 + $0x1] sm:$0xff]  ;;  %291 = vst.msk [vmem:[#allocation2 + $0x60] sm:$0xff] %vm277_vm0, %v3225_v4 }
  0x44   : > { %v527_v6 = vpack.c.bf16 %v495_v5, %v495_v5  ;;  %292 = vst.msk [vmem:[#allocation2 + $0x68] sm:$0xff] %vm277_vm0, %v3225_v4  ;;  %v362_v3 = vld [vmem:[%s3371_s23 + $0xe8] sm:$0xff] }
  0x45   : > { %294 = vst.msk [vmem:[#allocation2 + $0x78] sm:$0xff] %vm277_vm0, %v3225_v4 }
  0x46   : > { %591 = vrot.lane.b32.xlu0 %v527_v6, %s3226_s1  ;;  %295 = vst.msk [vmem:[#allocation2 + $0x80] sm:$0xff] %vm277_vm0, %v3225_v4 }
  0x47   : > { %297 = vst.msk [vmem:[#allocation2 + $0x90] sm:$0xff] %vm277_vm0, %v3225_v4 }
  0x48   : > { %298 = vst.msk [vmem:[#allocation2 + $0x98] sm:$0xff] %vm277_vm0, %v3225_v4 }
  0x49   : > { %300 = vst.msk [vmem:[#allocation2 + $0xa8] sm:$0xff] %vm277_vm0, %v3225_v4 }
  0x4a   : > { %301 = vst.msk [vmem:[#allocation2 + $0xb0] sm:$0xff] %vm277_vm0, %v3225_v4 }
  0x4b   : > { %303 = vst.msk [vmem:[#allocation2 + $0xc0] sm:$0xff] %vm277_vm0, %v3225_v4 }
  0x4c   : > { %304 = vst.msk [vmem:[#allocation2 + $0xc8] sm:$0xff] %vm277_vm0, %v3225_v4 }
  0x4d   : > { %306 = vst.msk [vmem:[#allocation2 + $0xd8] sm:$0xff] %vm277_vm0, %v3225_v4 }
  0x4e   : > { %307 = vst.msk [vmem:[#allocation2 + $0xe0] sm:$0xff] %vm277_vm0, %v3225_v4 }
  0x4f   : > { %309 = vst.msk [vmem:[#allocation2 + $0xf0] sm:$0xff] %vm277_vm0, %v3225_v4 }
  0x50   : > { %310 = vst.msk [vmem:[#allocation2 + $0xf8] sm:$0xff] %vm277_vm0, %v3225_v4 }
  0x51   : > { %312 = vst.msk [vmem:[#allocation2 + $0x108] sm:$0xff] %vm277_vm0, %v3225_v4 }
  0x52   : > { %313 = vst.msk [vmem:[#allocation2 + $0x110] sm:$0xff] %vm277_vm0, %v3225_v4 }
  0x53   : > { %315 = vst.msk [vmem:[#allocation2 + $0x120] sm:$0xff] %vm277_vm0, %v3225_v4 }
  0x54   : > { %316 = vst.msk [vmem:[#allocation2 + $0x128] sm:$0xff] %vm277_vm0, %v3225_v4 }
  0x55   : > { %318 = vst.msk [vmem:[#allocation2 + $0x138] sm:$0xff] %vm277_vm0, %v3225_v4 }
  0x56   : > { %319 = vst.msk [vmem:[#allocation2 + $0x140] sm:$0xff] %vm277_vm0, %v3225_v4 }
  0x57   : > { %321 = vst.msk [vmem:[#allocation2 + $0x150] sm:$0xff] %vm277_vm0, %v3225_v4 }
  0x58   : > { %322 = vst.msk [vmem:[#allocation2 + $0x158] sm:$0xff] %vm277_vm0, %v3225_v4 }
  0x59   : > { %324 = vst.msk [vmem:[#allocation2 + $0x168] sm:$0xff] %vm277_vm0, %v3225_v4 }
  0x5a   : > { %325 = vst.msk [vmem:[#allocation2 + $0x170] sm:$0xff] %vm277_vm0, %v3225_v4 }
  0x5b   : > { %327 = vst.msk [vmem:[#allocation2 + $0x180] sm:$0xff] %vm277_vm0, %v3225_v4 }
  0x5c   : > { %328 = vst.msk [vmem:[#allocation2 + $0x188] sm:$0xff] %vm277_vm0, %v3225_v4 }
  0x5d   : > { %330 = vst.msk [vmem:[#allocation2 + $0x198] sm:$0xff] %vm277_vm0, %v3225_v4 }
  0x5e   : > { %331 = vst.msk [vmem:[#allocation2 + $0x1a0] sm:$0xff] %vm277_vm0, %v3225_v4 }
  0x5f   : > { %366 = vst.msk [vmem:[#allocation2 + $0x19] sm:$0xff] %vm277_vm0, %v333_v7 }
  0x60   : > { %281 = vst.msk [vmem:[#allocation2 + $0x10] sm:$0x3] %vm280_vm1, %v3225_v4 }
  0x61   : > { %284 = vst.msk [vmem:[#allocation2 + $0x28] sm:$0x3] %vm280_vm1, %v3225_v4 }
  0x62   : > { %287 = vst.msk [vmem:[#allocation2 + $0x40] sm:$0x3] %vm280_vm1, %v3225_v4 }
  0x63   : > { %290 = vst.msk [vmem:[#allocation2 + $0x58] sm:$0x3] %vm280_vm1, %v3225_v4 }
  0x64   : > { %293 = vst.msk [vmem:[#allocation2 + $0x70] sm:$0x3] %vm280_vm1, %v3225_v4 }
  0x65   : > { %296 = vst.msk [vmem:[#allocation2 + $0x88] sm:$0x3] %vm280_vm1, %v3225_v4 }
  0x66   : > { %v497_v8 = vld [vmem:[#allocation2 + $0x19] sm:$0xff]  ;;  %299 = vst.msk [vmem:[#allocation2 + $0xa0] sm:$0x3] %vm280_vm1, %v3225_v4 }
  0x67   : > { %v529_v9 = vpack.c.bf16 %v497_v8, %v497_v8  ;;  %v496_v10 = vld [vmem:[#allocation2 + $0x9] sm:$0xff]  ;;  %302 = vst.msk [vmem:[#allocation2 + $0xb8] sm:$0x3] %vm280_vm1, %v3225_v4 }
  0x68   : > { %v528_v11 = vpack.c.bf16 %v496_v10, %v496_v10  ;;  %305 = vst.msk [vmem:[#allocation2 + $0xd0] sm:$0x3] %vm280_vm1, %v3225_v4  ;;  %v357_v10 = vld [vmem:[%s3371_s23 + $0xc0] sm:$0xff] }
  0x69   : > { %595 = vrot.lane.b32.xlu1 %v529_v9, %s3226_s1  ;;  %308 = vst.msk [vmem:[#allocation2 + $0xe8] sm:$0x3] %vm280_vm1, %v3225_v4 }
  0x6a   : > { %593 = vrot.lane.b32.xlu0 %v528_v11, %s3226_s1  ;;  %311 = vst.msk [vmem:[#allocation2 + $0x100] sm:$0x3] %vm280_vm1, %v3225_v4 }
  0x6b   : > { %314 = vst.msk [vmem:[#allocation2 + $0x118] sm:$0x3] %vm280_vm1, %v3225_v4 }
  0x6c   : > { %317 = vst.msk [vmem:[#allocation2 + $0x130] sm:$0x3] %vm280_vm1, %v3225_v4 }
  0x6d   : > { %320 = vst.msk [vmem:[#allocation2 + $0x148] sm:$0x3] %vm280_vm1, %v3225_v4 }
  0x6e   : > { %323 = vst.msk [vmem:[#allocation2 + $0x160] sm:$0x3] %vm280_vm1, %v3225_v4 }
  0x6f   : > { %326 = vst.msk [vmem:[#allocation2 + $0x178] sm:$0x3] %vm280_vm1, %v3225_v4 }
  0x70   : > { %329 = vst.msk [vmem:[#allocation2 + $0x190] sm:$0x3] %vm280_vm1, %v3225_v4 }
  0x71   : > { %332 = vst.msk [vmem:[#allocation2 + $0x1a8] sm:$0x3] %vm280_vm1, %v3225_v4 }
  0x72   : > { %367 = vst.msk [vmem:[#allocation2 + $0x21] sm:$0xff] %vm277_vm0, %v334_v12 }
  0x73   : > { %370 = vst.msk [vmem:[#allocation2 + $0x49] sm:$0xff] %vm277_vm0, %v337_v13 }
  0x74   : > { %371 = vst.msk [vmem:[#allocation2 + $0x51] sm:$0xff] %vm277_vm0, %v338_v14 }
  0x75   : > { %373 = vst.msk [vmem:[#allocation2 + $0x69] sm:$0xff] %vm277_vm0, %v340_v15 }
  0x76   : > { %368 = vst.msk [vmem:[#allocation2 + $0x31] sm:$0xff] %vm277_vm0, %v335_v16 }
  0x77   : > { %374 = vst.msk [vmem:[#allocation2 + $0x79] sm:$0xff] %vm277_vm0, %v341_v17  ;;  %v360_v17 = vld [vmem:[%s3371_s23 + $0xd8] sm:$0xff] }
  0x78   : > { %376 = vst.msk [vmem:[#allocation2 + $0x91] sm:$0xff] %vm277_vm0, %v343_v18 }
  0x79   : > { %v498_v22 = vld [vmem:[#allocation2 + $0x21] sm:$0xff]  ;;  %369 = vst.msk [vmem:[#allocation2 + $0x39] sm:$0xff] %vm277_vm0, %v336_v19 }
  0x7a   : > { %v530_v24 = vpack.c.bf16 %v498_v22, %v498_v22  ;;  %v501_v25 = vld [vmem:[#allocation2 + $0x49] sm:$0xff]  ;;  %377 = vst.msk [vmem:[#allocation2 + $0x99] sm:$0xff] %vm277_vm0, %v344_v20 }
  0x7b   : > { %v533_v27 = vpack.c.bf16 %v501_v25, %v501_v25  ;;  %379 = vst.msk [vmem:[#allocation2 + $0xb1] sm:$0xff] %vm277_vm0, %v346_v21  ;;  %v502_v30 = vld [vmem:[#allocation2 + $0x51] sm:$0xff] }
  0x7c   : > { %597 = vrot.lane.b32.xlu1 %v530_v24, %s3226_s1  ;;  %372 = vst.msk [vmem:[#allocation2 + $0x61] sm:$0xff] %vm277_vm0, %v339_v23  ;;  %v504_v33 = vld [vmem:[#allocation2 + $0x69] sm:$0xff]  ;;  %v534_v36 = vpack.c.bf16 %v502_v30, %v502_v30 }
  0x7d   : > { %603 = vrot.lane.b32.xlu0 %v533_v27, %s3226_s1  ;;  %v499_v31 = vld [vmem:[#allocation2 + $0x31] sm:$0xff]  ;;  %380 = vst.msk [vmem:[#allocation2 + $0xc1] sm:$0xff] %vm277_vm0, %v347_v26  ;;  %v536_v37 = vpack.c.bf16 %v504_v33, %v504_v33 }
  0x7e   : > { %v531_v34 = vpack.c.bf16 %v499_v31, %v499_v31  ;;  %382 = vst.msk [vmem:[#allocation2 + $0xd9] sm:$0xff] %vm277_vm0, %v349_v28  ;;  %v505_v43 = vld [vmem:[#allocation2 + $0x79] sm:$0xff] }
  0x7f   : > { %375 = vst.msk [vmem:[#allocation2 + $0x81] sm:$0xff] %vm277_vm0, %v342_v29  ;;  %v507_v44 = vld [vmem:[#allocation2 + $0x91] sm:$0xff]  ;;  %v537_v45 = vpack.c.bf16 %v505_v43, %v505_v43  ;;  %v398_v31 = vld [vmem:[#allocation2] sm:$0xff] }
  0x80   : > { %599 = vrot.lane.b32.xlu2 %v531_v34, %s3226_s1  ;;  %383 = vst.msk [vmem:[#allocation2 + $0xe1] sm:$0xff] %vm277_vm0, %v350_v32  ;;  %v500_v38 = vld [vmem:[#allocation2 + $0x39] sm:$0xff]  ;;  %v539_v46 = vpack.c.bf16 %v507_v44, %v507_v44  ;;  %v430_v34 = vpack.c.bf16 %v398_v31, %v398_v31 }
  0x81   : > { %385 = vst.msk [vmem:[#allocation2 + $0xf9] sm:$0xff] %vm277_vm0, %v352_v35  ;;  %v532_v42 = vpack.c.bf16 %v500_v38, %v500_v38  ;;  %v508_v52 = vld [vmem:[#allocation2 + $0x99] sm:$0xff]  ;;  %v721_v35 = vld [vmem:[#allocation2 + $0xa] sm:$0xff] }
  0x82   : > { %378 = vst.msk [vmem:[#allocation2 + $0xa9] sm:$0xff] %vm277_vm0, %v345_v39  ;;  %v510_v53 = vld [vmem:[#allocation2 + $0xb1] sm:$0xff]  ;;  %v540_v54 = vpack.c.bf16 %v508_v52, %v508_v52  ;;  %v722_v43 = vld [vmem:[#allocation2 + $0x1a] sm:$0xff] }
  0x83   : > { %386 = vst.msk [vmem:[#allocation2 + $0x109] sm:$0xff] %vm277_vm0, %v353_v40  ;;  %v503_v47 = vld [vmem:[#allocation2 + $0x61] sm:$0xff]  ;;  %v542_v55 = vpack.c.bf16 %v510_v53, %v510_v53  ;;  %v402_v40 = vld [vmem:[#allocation2 + $0x30] sm:$0xff]  ;;  %v403_v52 = vld [vmem:[#allocation2 + $0x38] sm:$0xff] }
  0x84   : > { %605 = vrot.lane.b32.xlu1 %v534_v36, %s3226_s1  ;;  %388 = vst.msk [vmem:[#allocation2 + $0x121] sm:$0xff] %vm277_vm0, %v355_v41  ;;  %v535_v51 = vpack.c.bf16 %v503_v47, %v503_v47  ;;  %v511_v61 = vld [vmem:[#allocation2 + $0xc1] sm:$0xff]  ;;  %v400_v41 = vld [vmem:[#allocation2 + $0x18] sm:$0xff]  ;;  %v3584_v44 = vpack.c.bf16 %v402_v40, %v402_v40 }
  0x85   : > { %609 = vrot.lane.b32.xlu0 %v536_v37, %s3226_s1  ;;  %381 = vst.msk [vmem:[#allocation2 + $0xc9] sm:$0xff] %vm277_vm0, %v348_v48  ;;  %v513_v62 = vld [vmem:[#allocation2 + $0xd9] sm:$0xff]  ;;  %v543_v63 = vpack.c.bf16 %v511_v61, %v511_v61  ;;  %v753_v37 = vpack.c.bf16 %v721_v35, %v721_v35  ;;  %v754_v48 = vpack.c.bf16 %v722_v43, %v722_v43 }
  0x86   : > { %389 = vst.msk [vmem:[#allocation2 + $0x129] sm:$0xff] %vm277_vm0, %v356_v49  ;;  %v506_v56 = vld [vmem:[#allocation2 + $0x81] sm:$0xff]  ;;  %v545_v0 = vpack.c.bf16 %v513_v62, %v513_v62  ;;  %v724_v47 = vld [vmem:[#allocation2 + $0x32] sm:$0xff] }
  0x87   : > { %391 = vst.msk [vmem:[#allocation2 + $0x141] sm:$0xff] %vm277_vm0, %v358_v50  ;;  %v538_v60 = vpack.c.bf16 %v506_v56, %v506_v56  ;;  %v514_v5 = vld [vmem:[#allocation2 + $0xe1] sm:$0xff]  ;;  %v756_v49 = vpack.c.bf16 %v724_v47, %v724_v47  ;;  %v3596_v56 = vpack.c.bf16 %v403_v52, %v403_v52  ;;  %v416_v47 = vld [vmem:[#allocation2 + $0xd8] sm:$0xff] }
  0x88   : > { %601 = vrot.lane.b32.xlu2 %v532_v42, %s3226_s1  ;;  %384 = vst.msk [vmem:[#allocation2 + $0xf1] sm:$0xff] %vm277_vm0, %v351_v57  ;;  %v516_v6 = vld [vmem:[#allocation2 + $0xf9] sm:$0xff]  ;;  %v546_v7 = vpack.c.bf16 %v514_v5, %v514_v5  ;;  %v399_v42 = vld [vmem:[#allocation2 + $0x8] sm:$0xff] }
  0x89   : > { %392 = vst.msk [vmem:[#allocation2 + $0x151] sm:$0xff] %vm277_vm0, %v359_v58  ;;  %v509_v1 = vld [vmem:[#allocation2 + $0xa9] sm:$0xff]  ;;  %v548_v8 = vpack.c.bf16 %v516_v6, %v516_v6  ;;  %v401_v53 = vld [vmem:[#allocation2 + $0x20] sm:$0xff] }
  0x8a   : > { %394 = vst.msk [vmem:[#allocation2 + $0x169] sm:$0xff] %vm277_vm0, %v361_v59  ;;  %v541_v4 = vpack.c.bf16 %v509_v1, %v509_v1  ;;  %v517_v12 = vld [vmem:[#allocation2 + $0x109] sm:$0xff]  ;;  %v3598_v57 = vpack.c.bf16 %v401_v53, %v401_v53  ;;  %v727_v59 = vld [vmem:[#allocation2 + $0x52] sm:$0xff]  ;;  %v3674_v53 = vpack.c.bf16 %v416_v47, %v416_v47 }
  0x8b   : > { %387 = vst.msk [vmem:[#allocation2 + $0x111] sm:$0xff] %vm277_vm0, %v354_v2  ;;  %v519_v13 = vld [vmem:[#allocation2 + $0x121] sm:$0xff]  ;;  %v549_v14 = vpack.c.bf16 %v517_v12, %v517_v12  ;;  %v759_v61 = vpack.c.bf16 %v727_v59, %v727_v59  ;;  %v405_v1 = vld [vmem:[#allocation2 + $0x50] sm:$0xff] }
  0x8c   : > { %611 = vrot.lane.b32.xlu1 %v537_v45, %s3226_s1  ;;  %395 = vst.msk [vmem:[#allocation2 + $0x171] sm:$0xff] %vm277_vm0, %v362_v3  ;;  %v512_v9 = vld [vmem:[#allocation2 + $0xc9] sm:$0xff]  ;;  %v551_v15 = vpack.c.bf16 %v519_v13, %v519_v13  ;;  %v3586_v45 = vpack.c.bf16 %v400_v41, %v400_v41  ;;  %v3613_v5 = vpack.c.bf16 %v405_v1, %v405_v1 }
  0x8d   : > { %615 = vrot.lane.b32.xlu0 %v539_v46, %s3226_s1  ;;  %390 = vst.msk [vmem:[#allocation2 + $0x139] sm:$0xff] %vm277_vm0, %v357_v10  ;;  %v544_v11 = vpack.c.bf16 %v512_v9, %v512_v9  ;;  %v520_v19 = vld [vmem:[#allocation2 + $0x129] sm:$0xff]  ;;  %v431_v46 = vpack.c.bf16 %v399_v42, %v399_v42  ;;  %v414_v42 = vld [vmem:[#allocation2 + $0xc0] sm:$0xff] }
  0x8e   : > { %393 = vst.msk [vmem:[#allocation2 + $0x159] sm:$0xff] %vm277_vm0, %v360_v17  ;;  %v522_v20 = vld [vmem:[#allocation2 + $0x141] sm:$0xff]  ;;  %v552_v21 = vpack.c.bf16 %v520_v19, %v520_v19  ;;  %v726_v10 = vld [vmem:[#allocation2 + $0x4a] sm:$0xff] }
  0x8f   : > { %v515_v16 = vld [vmem:[#allocation2 + $0xf1] sm:$0xff]  ;;  %v554_v22 = vpack.c.bf16 %v522_v20, %v522_v20  ;;  %463 = vst.msk [vmem:[#allocation3] sm:$0xf] %vm462_vm2, %v430_v34  ;;  %v720_v50 = vld [vmem:[#allocation2 + $0x2] sm:$0xff] }
  0x90   : > { %607 = vrot.lane.b32.xlu2 %v535_v51, %s3226_s1  ;;  %v547_v18 = vpack.c.bf16 %v515_v16, %v515_v16  ;;  %v523_v25 = vld [vmem:[#allocation2 + $0x151] sm:$0xff]  ;;  %467 = vst.msk [vmem:[#allocation3 + $0x10] sm:$0xf] %vm462_vm2, %v3584_v44  ;;  %v752_v51 = vpack.c.bf16 %v720_v50, %v720_v50  ;;  %v723_v62 = vld [vmem:[#allocation2 + $0x22] sm:$0xff]  ;;  %v3668_v50 = vpack.c.bf16 %v414_v42, %v414_v42 }
  0x91   : > { %v525_v26 = vld [vmem:[#allocation2 + $0x169] sm:$0xff]  ;;  %v555_v27 = vpack.c.bf16 %v523_v25, %v523_v25  ;;  %465 = vst.msk [vmem:[#allocation3 + $0x8] sm:$0xf] %vm462_vm2, %v3586_v45  ;;  %v408_v16 = vld [vmem:[#allocation2 + $0x78] sm:$0xff] }
  0x92   : > { %v518_v23 = vld [vmem:[#allocation2 + $0x111] sm:$0xff]  ;;  %v557_v28 = vpack.c.bf16 %v525_v26, %v525_v26  ;;  %464 = vst.msk [vmem:[#allocation3 + $0x4] sm:$0xf] %vm462_vm2, %v431_v46  ;;  %v407_v2 = vld [vmem:[#allocation2 + $0x68] sm:$0xff]  ;;  %v3631_v20 = vpack.c.bf16 %v408_v16, %v408_v16 }
  0x93   : > { %v550_v24 = vpack.c.bf16 %v518_v23, %v518_v23  ;;  %v526_v32 = vld [vmem:[#allocation2 + $0x171] sm:$0xff]  ;;  %468 = vst.msk [vmem:[#allocation3 + $0x14] sm:$0xf] %vm462_vm2, %v3596_v56  ;;  %v728_v3 = vld [vmem:[#allocation2 + $0x62] sm:$0xff]  ;;  %v3615_v6 = vpack.c.bf16 %v407_v2, %v407_v2 }
  0x94   : > { %617 = vrot.lane.b32.xlu1 %v540_v54, %s3226_s1  ;;  %v521_v29 = vld [vmem:[#allocation2 + $0x139] sm:$0xff]  ;;  %v558_v36 = vpack.c.bf16 %v526_v32, %v526_v32  ;;  %v404_v54 = vld [vmem:[#allocation2 + $0x48] sm:$0xff]  ;;  %466 = vst.msk [vmem:[#allocation3 + $0xc] sm:$0xf] %vm462_vm2, %v3598_v57  ;;  %v410_v17 = vld [vmem:[#allocation2 + $0x90] sm:$0xff] }
  0x95   : > { %621 = vrot.lane.b32.xlu0 %v542_v55, %s3226_s1  ;;  %v553_v30 = vpack.c.bf16 %v521_v29, %v521_v29  ;;  %v524_v38 = vld [vmem:[#allocation2 + $0x159] sm:$0xff]  ;;  %v3600_v58 = vpack.c.bf16 %v404_v54, %v404_v54  ;;  %470 = vst.msk [vmem:[#allocation3 + $0x1c] sm:$0xf] %vm462_vm2, %v3613_v5  ;;  %v729_v25 = vld [vmem:[#allocation2 + $0x6a] sm:$0xff]  ;;  %v736_v35 = vld [vmem:[#allocation2 + $0xc2] sm:$0xff] }
  0x96   : > { %v556_v39 = vpack.c.bf16 %v524_v38, %v524_v38  ;;  %v725_v55 = vld [vmem:[#allocation2 + $0x3a] sm:$0xff]  ;;  %472 = vst.msk [vmem:[#allocation3 + $0x24] sm:$0xf] %vm462_vm2, %v3615_v6  ;;  %v734_v31 = vld [vmem:[#allocation2 + $0xaa] sm:$0xff]  ;;  %v732_v38 = vld [vmem:[#allocation2 + $0x92] sm:$0xff] }
  0x97   : > { %469 = vst.msk [vmem:[#allocation3 + $0x18] sm:$0xf] %vm462_vm2, %v3600_v58  ;;  %v411_v29 = vld [vmem:[#allocation2 + $0x98] sm:$0xff]  ;;  %v3663_v40 = vpack.c.bf16 %v732_v38, %v732_v38  ;;  %v415_v41 = vld [vmem:[#allocation2 + $0xc8] sm:$0xff]  ;;  %v425_v42 = vld [vmem:[#allocation2 + $0x140] sm:$0xff] }
  0x98   : > { %613 = vrot.lane.b32.xlu2 %v538_v60, %s3226_s1  ;;  %v757_v60 = vpack.c.bf16 %v725_v55, %v725_v55  ;;  %473 = vst.msk [vmem:[#allocation3 + $0x28] sm:$0xf] %vm462_vm2, %v3631_v20  ;;  %v737_v43 = vld [vmem:[#allocation2 + $0xca] sm:$0xff]  ;;  %v3666_v46 = vpack.c.bf16 %v415_v41, %v415_v41  ;;  %v735_v55 = vld [vmem:[#allocation2 + $0xb2] sm:$0xff] }
  0x99   : > { %v769_v52 = vpack.c.bf16 %v737_v43, %v737_v43  ;;  %479 = vst.msk [vmem:[#allocation3 + $0x40] sm:$0xf] %vm462_vm2, %v3668_v50  ;;  %v419_v1 = vld [vmem:[#allocation2 + $0xf8] sm:$0xff]  ;;  %v420_v16 = vld [vmem:[#allocation2 + $0x108] sm:$0xff] }
  0x9a   : > { %480 = vst.msk [vmem:[#allocation3 + $0x44] sm:$0xf] %vm462_vm2, %v3666_v46  ;;  %v423_v38 = vld [vmem:[#allocation2 + $0x128] sm:$0xff]  ;;  %v748_v47 = vld [vmem:[#allocation2 + $0x152] sm:$0xff] }
  0x9b   : > { %481 = vst.msk [vmem:[#allocation3 + $0x48] sm:$0xf] %vm462_vm2, %v3674_v53 }
  0x9c   : > { %623 = vrot.lane.b32.xlu1 %v543_v63, %s3226_s1  ;;  %v755_v63 = vpack.c.bf16 %v723_v62, %v723_v62  ;;  %v417_v62 = vld [vmem:[#allocation2 + $0xe0] sm:$0xff] }
  0x9d   : > { %627 = vrot.lane.b32.xlu0 %v545_v0, %s3226_s1  ;;  %v406_v0 = vld [vmem:[#allocation2 + $0x60] sm:$0xff] }
  0xa0   : > { %619 = vrot.lane.b32.xlu2 %v541_v4, %s3226_s1  ;;  %v3611_v4 = vpack.c.bf16 %v406_v0, %v406_v0 }
  0xa2   : > { %471 = vst.msk [vmem:[#allocation3 + $0x20] sm:$0xf] %vm462_vm2, %v3611_v4 }
  0xa4   : > { %629 = vrot.lane.b32.xlu1 %v546_v7, %s3226_s1  ;;  %v730_v7 = vld [vmem:[#allocation2 + $0x7a] sm:$0xff] }
  0xa5   : > { %633 = vrot.lane.b32.xlu0 %v548_v8, %s3226_s1  ;;  %v760_v8 = vpack.c.bf16 %v728_v3, %v728_v3  ;;  %v762_v9 = vpack.c.bf16 %v730_v7, %v730_v7  ;;  %v742_v3 = vld [vmem:[#allocation2 + $0x10a] sm:$0xff]  ;;  %v3689_v7 = vpack.c.bf16 %v417_v62, %v417_v62  ;;  %v427_v62 = vld [vmem:[#allocation2 + $0x158] sm:$0xff] }
  0xa7   : > { %482 = vst.msk [vmem:[#allocation3 + $0x4c] sm:$0xf] %vm462_vm2, %v3689_v7 }
  0xa8   : > { %625 = vrot.lane.b32.xlu2 %v544_v11, %s3226_s1 }
  0xac   : > { %635 = vrot.lane.b32.xlu1 %v549_v14, %s3226_s1  ;;  %v758_v14 = vpack.c.bf16 %v726_v10, %v726_v10  ;;  %v3695_v10 = vpack.c.bf16 %v419_v1, %v419_v1  ;;  %v749_v1 = vld [vmem:[#allocation2 + $0x15a] sm:$0xff] }
  0xad   : > { %639 = vrot.lane.b32.xlu0 %v551_v15, %s3226_s1  ;;  %v409_v15 = vld [vmem:[#allocation2 + $0x80] sm:$0xff] }
  0xae   : > { %v3629_v19 = vpack.c.bf16 %v409_v15, %v409_v15  ;;  %484 = vst.msk [vmem:[#allocation3 + $0x54] sm:$0xf] %vm462_vm2, %v3695_v10  ;;  %v421_v15 = vld [vmem:[#allocation2 + $0x110] sm:$0xff] }
  0xb0   : > { %631 = vrot.lane.b32.xlu2 %v547_v18, %s3226_s1  ;;  %v731_v18 = vld [vmem:[#allocation2 + $0x82] sm:$0xff]  ;;  %474 = vst.msk [vmem:[#allocation3 + $0x2c] sm:$0xf] %vm462_vm2, %v3629_v19 }
  0xb1   : > { %v763_v23 = vpack.c.bf16 %v731_v18, %v731_v18  ;;  %v3708_v18 = vpack.c.bf16 %v421_v15, %v421_v15 }
  0xb3   : > { %486 = vst.msk [vmem:[#allocation3 + $0x5c] sm:$0xf] %vm462_vm2, %v3708_v18 }
  0xb4   : > { %641 = vrot.lane.b32.xlu1 %v552_v21, %s3226_s1  ;;  %v3633_v21 = vpack.c.bf16 %v410_v17, %v410_v17  ;;  %v743_v17 = vld [vmem:[#allocation2 + $0x112] sm:$0xff] }
  0xb5   : > { %645 = vrot.lane.b32.xlu0 %v554_v22, %s3226_s1  ;;  %v733_v22 = vld [vmem:[#allocation2 + $0x9a] sm:$0xff] }
  0xb6   : > { %475 = vst.msk [vmem:[#allocation3 + $0x30] sm:$0xf] %vm462_vm2, %v3633_v21 }
  0xb8   : > { %637 = vrot.lane.b32.xlu2 %v550_v24, %s3226_s1  ;;  %v592_v33 = vpop.permute.xlu0 %591  ;;  %v765_v24 = vpack.c.bf16 %v733_v22, %v733_v22  ;;  %v422_v22 = vld [vmem:[#allocation2 + $0x120] sm:$0xff] }
  0xb9   : > { %688 = vst.msk [vmem:[#allocation3] sm:$0xf] %vm687_vm3, %v592_v33  ;;  %v3649_v33 = vpack.c.bf16 %v411_v29, %v411_v29  ;;  %v3716_v29 = vpack.c.bf16 %v422_v22, %v422_v22 }
  0xbb   : > { %476 = vst.msk [vmem:[#allocation3 + $0x34] sm:$0xf] %vm462_vm2, %v3649_v33 }
  0xbc   : > { %647 = vrot.lane.b32.xlu1 %v555_v27, %s3226_s1  ;;  %v3644_v27 = vpack.c.bf16 %v729_v25, %v729_v25  ;;  %v3710_v25 = vpack.c.bf16 %v420_v16, %v420_v16  ;;  %487 = vst.msk [vmem:[#allocation3 + $0x60] sm:$0xf] %vm462_vm2, %v3716_v29 }
  0xbd   : > { %651 = vrot.lane.b32.xlu0 %v557_v28, %s3226_s1  ;;  %v412_v28 = vld [vmem:[#allocation2 + $0xa8] sm:$0xff] }
  0xbe   : > { %v3647_v32 = vpack.c.bf16 %v412_v28, %v412_v28  ;;  %v775_v28 = vpack.c.bf16 %v743_v17, %v743_v17  ;;  %485 = vst.msk [vmem:[#allocation3 + $0x58] sm:$0xf] %vm462_vm2, %v3710_v25  ;;  %v747_v17 = vld [vmem:[#allocation2 + $0x142] sm:$0xff] }
  0xc0   : > { %643 = vrot.lane.b32.xlu2 %v553_v30, %s3226_s1  ;;  %v413_v30 = vld [vmem:[#allocation2 + $0xb0] sm:$0xff]  ;;  %477 = vst.msk [vmem:[#allocation3 + $0x38] sm:$0xf] %vm462_vm2, %v3647_v32 }
  0xc1   : > { %v3651_v34 = vpack.c.bf16 %v413_v30, %v413_v30 }
  0xc3   : > { %478 = vst.msk [vmem:[#allocation3 + $0x3c] sm:$0xf] %vm462_vm2, %v3651_v34 }
  0xc4   : > { %653 = vrot.lane.b32.xlu1 %v558_v36, %s3226_s1  ;;  %v766_v36 = vpack.c.bf16 %v734_v31, %v734_v31  ;;  %v741_v31 = vld [vmem:[#allocation2 + $0xfa] sm:$0xff] }
  0xc5   : > { %818 = vrot.lane.b32.xlu0 %v753_v37, %s3227_s4  ;;  %v768_v37 = vpack.c.bf16 %v736_v35, %v736_v35 }
  0xc8   : > { %649 = vrot.lane.b32.xlu2 %v556_v39, %s3226_s1 }
  0xcc   : > { %820 = vrot.lane.b32.xlu1 %v754_v48, %s3227_s4 }
  0xcd   : > { %824 = vrot.lane.b32.xlu0 %v756_v49, %s3227_s4  ;;  %v739_v49 = vld [vmem:[#allocation2 + $0xe2] sm:$0xff] }
  0xce   : > { %v771_v54 = vpack.c.bf16 %v739_v49, %v739_v49 }
  0xd0   : > { %816 = vrot.lane.b32.xlu2 %v752_v51, %s3227_s4 }
  0xd4   : > { %826 = vrot.lane.b32.xlu1 %v757_v60, %s3227_s4  ;;  %v3682_v60 = vpack.c.bf16 %v735_v55, %v735_v55  ;;  %v744_v55 = vld [vmem:[#allocation2 + $0x122] sm:$0xff] }
  0xd5   : > { %830 = vrot.lane.b32.xlu0 %v759_v61, %s3227_s4  ;;  %v418_v61 = vld [vmem:[#allocation2 + $0xf0] sm:$0xff] }
  0xd6   : > { %v3687_v0 = vpack.c.bf16 %v418_v61, %v418_v61  ;;  %v3745_v61 = vpack.c.bf16 %v744_v55, %v744_v55 }
  0xd8   : > { %822 = vrot.lane.b32.xlu2 %v755_v63, %s3227_s4  ;;  %v740_v63 = vld [vmem:[#allocation2 + $0xf2] sm:$0xff]  ;;  %483 = vst.msk [vmem:[#allocation3 + $0x50] sm:$0xf] %vm462_vm2, %v3687_v0 }
  0xda   : > { %v600_v11 = vpop.permute.xlu2 %599 }
  0xdb   : > { %692 = vst.msk [vmem:[#allocation3 + $0x10] sm:$0xf] %vm687_vm3, %v600_v11  ;;  %v596_v12 = vpop.permute.xlu1 %595  ;;  %v774_v11 = vpack.c.bf16 %v742_v3, %v742_v3  ;;  %v428_v3 = vld [vmem:[#allocation2 + $0x168] sm:$0xff] }
  0xdc   : > { %832 = vrot.lane.b32.xlu1 %v760_v8, %s3227_s4  ;;  %690 = vst.msk [vmem:[#allocation3 + $0x8] sm:$0xf] %vm687_vm3, %v596_v12  ;;  %v594_v13 = vpop.permute.xlu0 %593  ;;  %v738_v12 = vld [vmem:[#allocation2 + $0xda] sm:$0xff]  ;;  %v3758_v15 = vpack.c.bf16 %v428_v3, %v428_v3 }
  0xdd   : > { %836 = vrot.lane.b32.xlu0 %v762_v9, %s3227_s4  ;;  %689 = vst.msk [vmem:[#allocation3 + $0x4] sm:$0xf] %vm687_vm3, %v594_v13  ;;  %v772_v9 = vpack.c.bf16 %v740_v63, %v740_v63  ;;  %v426_v63 = vld [vmem:[#allocation2 + $0x150] sm:$0xff] }
  0xde   : > { %493 = vst.msk [vmem:[#allocation3 + $0x78] sm:$0xf] %vm462_vm2, %v3758_v15 }
  0xe0   : > { %828 = vrot.lane.b32.xlu2 %v758_v14, %s3227_s4  ;;  %v3703_v14 = vpack.c.bf16 %v738_v12, %v738_v12 }
  0xe2   : > { %v602_v26 = vpop.permute.xlu2 %601 }
  0xe3   : > { %693 = vst.msk [vmem:[#allocation3 + $0x14] sm:$0xf] %vm687_vm3, %v602_v26 }
  0xe4   : > { %838 = vrot.lane.b32.xlu1 %v763_v23, %s3227_s4 }
  0xe5   : > { %842 = vrot.lane.b32.xlu0 %v765_v24, %s3227_s4  ;;  %v745_v24 = vld [vmem:[#allocation2 + $0x12a] sm:$0xff] }
  0xe6   : > { %v777_v30 = vpack.c.bf16 %v745_v24, %v745_v24  ;;  %v429_v24 = vld [vmem:[#allocation2 + $0x170] sm:$0xff] }
  0xe8   : > { %834 = vrot.lane.b32.xlu2 %v3644_v27, %s3227_s4 }
  0xea   : > { %v608_v39 = vpop.permute.xlu2 %607 }
  0xeb   : > { %696 = vst.msk [vmem:[#allocation3 + $0x20] sm:$0xf] %vm687_vm3, %v608_v39  ;;  %v746_v39 = vld [vmem:[#allocation2 + $0x13a] sm:$0xff] }
  0xec   : > { %844 = vrot.lane.b32.xlu1 %v766_v36, %s3227_s4  ;;  %v3724_v36 = vpack.c.bf16 %v741_v31, %v741_v31  ;;  %v750_v31 = vld [vmem:[#allocation2 + $0x16a] sm:$0xff] }
  0xed   : > { %848 = vrot.lane.b32.xlu0 %v768_v37, %s3227_s4  ;;  %v424_v37 = vld [vmem:[#allocation2 + $0x138] sm:$0xff] }
  0xee   : > { %v598_v48 = vpop.permute.xlu1 %597  ;;  %v3729_v41 = vpack.c.bf16 %v424_v37, %v424_v37  ;;  %v3782_v37 = vpack.c.bf16 %v750_v31, %v750_v31  ;;  %v1177_v31 = vld [vmem:[#allocation2 + $0x69] sm:$0xff] }
  0xef   : > { %691 = vst.msk [vmem:[#allocation3 + $0xc] sm:$0xf] %vm687_vm3, %v598_v48  ;;  %v604_v51 = vpop.permute.xlu0 %603  ;;  %v3731_v48 = vpack.c.bf16 %v423_v38, %v423_v38 }
  0xf0   : > { %694 = vst.msk [vmem:[#allocation3 + $0x18] sm:$0xf] %vm687_vm3, %v604_v51  ;;  %840 = vrot.lane.b32.xlu2 %v3663_v40, %s3227_s4  ;;  %v778_v51 = vpack.c.bf16 %v746_v39, %v746_v39 }
  0xf1   : > { %489 = vst.msk [vmem:[#allocation3 + $0x68] sm:$0xf] %vm462_vm2, %v3729_v41 }
  0xf2   : > { %v614_v59 = vpop.permute.xlu2 %613  ;;  %488 = vst.msk [vmem:[#allocation3 + $0x64] sm:$0xf] %vm462_vm2, %v3731_v48 }
  0xf3   : > { %699 = vst.msk [vmem:[#allocation3 + $0x2c] sm:$0xf] %vm687_vm3, %v614_v59 }
  0xf4   : > { %850 = vrot.lane.b32.xlu1 %v769_v52, %s3227_s4  ;;  %v3737_v52 = vpack.c.bf16 %v425_v42, %v425_v42 }
  0xf5   : > { %854 = vrot.lane.b32.xlu0 %v771_v54, %s3227_s4  ;;  %v780_v54 = vpack.c.bf16 %v748_v47, %v748_v47 }
  0xf6   : > { %v606_v2 = vpop.permute.xlu1 %605  ;;  %490 = vst.msk [vmem:[#allocation3 + $0x6c] sm:$0xf] %vm462_vm2, %v3737_v52 }
  0xf7   : > { %695 = vst.msk [vmem:[#allocation3 + $0x1c] sm:$0xf] %vm687_vm3, %v606_v2  ;;  %v610_v8 = vpop.permute.xlu0 %609  ;;  %v3750_v2 = vpack.c.bf16 %v427_v62, %v427_v62 }
  0xf8   : > { %697 = vst.msk [vmem:[#allocation3 + $0x24] sm:$0xf] %vm687_vm3, %v610_v8  ;;  %846 = vrot.lane.b32.xlu2 %v3682_v60, %s3227_s4 }
  0xf9   : > { %492 = vst.msk [vmem:[#allocation3 + $0x74] sm:$0xf] %vm462_vm2, %v3750_v2 }
  0xfa   : > { %v620_v13 = vpop.permute.xlu2 %619 }
  0xfb   : > { %702 = vst.msk [vmem:[#allocation3 + $0x38] sm:$0xf] %vm687_vm3, %v620_v13  ;;  %v781_v13 = vpack.c.bf16 %v749_v1, %v749_v1 }
  0xfc   : > { %856 = vrot.lane.b32.xlu1 %v772_v9, %s3227_s4  ;;  %v751_v9 = vld [vmem:[#allocation2 + $0x172] sm:$0xff] }
  0xfd   : > { %860 = vrot.lane.b32.xlu0 %v774_v11, %s3227_s4  ;;  %v3752_v11 = vpack.c.bf16 %v426_v63, %v426_v63  ;;  %v783_v16 = vpack.c.bf16 %v751_v9, %v751_v9  ;;  %v1171_v63 = vld [vmem:[#allocation2 + $0x21] sm:$0xff] }
  0xfe   : > { %v612_v23 = vpop.permute.xlu1 %611 }
  0xff   : > { %698 = vst.msk [vmem:[#allocation3 + $0x28] sm:$0xf] %vm687_vm3, %v612_v23  ;;  %v616_v26 = vpop.permute.xlu0 %615  ;;  %v3766_v23 = vpack.c.bf16 %v747_v17, %v747_v17  ;;  %v1176_v17 = vld [vmem:[#allocation2 + $0x61] sm:$0xff] }
 0x100   : > { %700 = vst.msk [vmem:[#allocation3 + $0x30] sm:$0xf] %vm687_vm3, %v616_v26  ;;  %852 = vrot.lane.b32.xlu2 %v3703_v14, %s3227_s4  ;;  %v3771_v26 = vpack.c.bf16 %v429_v24, %v429_v24  ;;  %v3894_v24 = vpack.c.bf16 %v1176_v17, %v1176_v17  ;;  %v1194_v17 = vld [vmem:[#allocation2 + $0x139] sm:$0xff] }
 0x101   : > { %491 = vst.msk [vmem:[#allocation3 + $0x70] sm:$0xf] %vm462_vm2, %v3752_v11 }
 0x102   : > { %v626_v35 = vpop.permute.xlu2 %625  ;;  %494 = vst.msk [vmem:[#allocation3 + $0x7c] sm:$0xf] %vm462_vm2, %v3771_v26 }
 0x103   : > { %705 = vst.msk [vmem:[#allocation3 + $0x44] sm:$0xf] %vm687_vm3, %v626_v35 }
 0x104   : > { %862 = vrot.lane.b32.xlu1 %v775_v28, %s3227_s4 }
 0x105   : > { %866 = vrot.lane.b32.xlu0 %v777_v30, %s3227_s4 }
 0x106   : > { %v618_v43 = vpop.permute.xlu1 %617 }
 0x107   : > { %701 = vst.msk [vmem:[#allocation3 + $0x34] sm:$0xf] %vm687_vm3, %v618_v43  ;;  %v622_v49 = vpop.permute.xlu0 %621 }
 0x108   : > { %703 = vst.msk [vmem:[#allocation3 + $0x3c] sm:$0xf] %vm687_vm3, %v622_v49  ;;  %858 = vrot.lane.b32.xlu2 %v3724_v36, %s3227_s4 }
 0x10a   : > { %v632_v59 = vpop.permute.xlu2 %631 }
 0x10b   : > { %708 = vst.msk [vmem:[#allocation3 + $0x50] sm:$0xf] %vm687_vm3, %v632_v59 }
 0x10c   : > { %868 = vrot.lane.b32.xlu1 %v778_v51, %s3227_s4 }
 0x10d   : > { %872 = vrot.lane.b32.xlu0 %v780_v54, %s3227_s4  ;;  %v1170_v54 = vld [vmem:[#allocation2 + $0x19] sm:$0xff] }
 0x10e   : > { %v624_v8 = vpop.permute.xlu1 %623 }
 0x10f   : > { %704 = vst.msk [vmem:[#allocation3 + $0x40] sm:$0xf] %vm687_vm3, %v624_v8  ;;  %v628_v12 = vpop.permute.xlu0 %627  ;;  %v1203_v8 = vpack.c.bf16 %v1171_v63, %v1171_v63  ;;  %v1191_v63 = vld [vmem:[#allocation2 + $0x111] sm:$0xff] }
 0x110   : > { %706 = vst.msk [vmem:[#allocation3 + $0x48] sm:$0xf] %vm687_vm3, %v628_v12  ;;  %864 = vrot.lane.b32.xlu2 %v3745_v61, %s3227_s4 }
 0x112   : > { %v638_v22 = vpop.permute.xlu2 %637 }
 0x113   : > { %711 = vst.msk [vmem:[#allocation3 + $0x5c] sm:$0xf] %vm687_vm3, %v638_v22 }
 0x114   : > { %874 = vrot.lane.b32.xlu1 %v781_v13, %s3227_s4  ;;  %v1174_v13 = vld [vmem:[#allocation2 + $0x49] sm:$0xff] }
 0x115   : > { %878 = vrot.lane.b32.xlu0 %v783_v16, %s3227_s4 }
 0x116   : > { %v630_v28 = vpop.permute.xlu1 %629 }
 0x117   : > { %707 = vst.msk [vmem:[#allocation3 + $0x4c] sm:$0xf] %vm687_vm3, %v630_v28  ;;  %v634_v30 = vpop.permute.xlu0 %633 }
 0x118   : > { %709 = vst.msk [vmem:[#allocation3 + $0x54] sm:$0xf] %vm687_vm3, %v634_v30  ;;  %870 = vrot.lane.b32.xlu2 %v3766_v23, %s3227_s4 }
 0x11a   : > { %v644_v35 = vpop.permute.xlu2 %643 }
 0x11b   : > { %714 = vst.msk [vmem:[#allocation3 + $0x68] sm:$0xf] %vm687_vm3, %v644_v35 }
 0x11c   : > { %1041 = vrot.lane.b32.xlu1 %v3586_v45, %s3228_s5 }
 0x11d   : > { %1045 = vrot.lane.b32.xlu0 %v3584_v44, %s3228_s5 }
 0x11e   : > { %v636_v38 = vpop.permute.xlu1 %635 }
 0x11f   : > { %710 = vst.msk [vmem:[#allocation3 + $0x58] sm:$0xf] %vm687_vm3, %v636_v38  ;;  %v640_v39 = vpop.permute.xlu0 %639  ;;  %v1179_v38 = vld [vmem:[#allocation2 + $0x81] sm:$0xff] }
 0x120   : > { %712 = vst.msk [vmem:[#allocation3 + $0x60] sm:$0xf] %vm687_vm3, %v640_v39  ;;  %876 = vrot.lane.b32.xlu2 %v3782_v37, %s3227_s4 }
 0x122   : > { %v650_v42 = vpop.permute.xlu2 %649 }
 0x123   : > { %717 = vst.msk [vmem:[#allocation3 + $0x74] sm:$0xf] %vm687_vm3, %v650_v42  ;;  %v1209_v42 = vpack.c.bf16 %v1177_v31, %v1177_v31 }
 0x124   : > { %1047 = vrot.lane.b32.xlu1 %v3596_v56, %s3228_s5 }
 0x125   : > { %1051 = vrot.lane.b32.xlu0 %v3613_v5, %s3228_s5 }
 0x126   : > { %v642_v45 = vpop.permute.xlu1 %641 }
 0x127   : > { %713 = vst.msk [vmem:[#allocation3 + $0x64] sm:$0xf] %vm687_vm3, %v642_v45  ;;  %v646_v44 = vpop.permute.xlu0 %645  ;;  %v3906_v45 = vpack.c.bf16 %v1179_v38, %v1179_v38  ;;  %v1195_v38 = vld [vmem:[#allocation2 + $0x141] sm:$0xff] }
 0x128   : > { %715 = vst.msk [vmem:[#allocation3 + $0x6c] sm:$0xf] %vm687_vm3, %v646_v44  ;;  %1043 = vrot.lane.b32.xlu2 %v3598_v57, %s3228_s5  ;;  %v1175_v44 = vld [vmem:[#allocation2 + $0x51] sm:$0xff] }
 0x12a   : > { %v817_v43 = vpop.permute.xlu2 %816 }
 0x12b   : > { %913 = vst.msk [vmem:[#allocation3] sm:$0xf] %vm912_vm4, %v817_v43 }
 0x12c   : > { %1053 = vrot.lane.b32.xlu1 %v3611_v4, %s3228_s5 }
 0x12d   : > { %1057 = vrot.lane.b32.xlu0 %v3631_v20, %s3228_s5 }
 0x12e   : > { %v648_v56 = vpop.permute.xlu1 %647 }
 0x12f   : > { %716 = vst.msk [vmem:[#allocation3 + $0x70] sm:$0xf] %vm687_vm3, %v648_v56  ;;  %v652_v5 = vpop.permute.xlu0 %651  ;;  %v3910_v56 = vpack.c.bf16 %v1175_v44, %v1175_v44 }
 0x130   : > { %718 = vst.msk [vmem:[#allocation3 + $0x78] sm:$0xf] %vm687_vm3, %v652_v5  ;;  %1049 = vrot.lane.b32.xlu2 %v3600_v58, %s3228_s5  ;;  %v1180_v5 = vld [vmem:[#allocation2 + $0x91] sm:$0xff] }
 0x132   : > { %v823_v57 = vpop.permute.xlu2 %822 }
 0x133   : > { %916 = vst.msk [vmem:[#allocation3 + $0xc] sm:$0xf] %vm912_vm4, %v823_v57 }
 0x134   : > { %1059 = vrot.lane.b32.xlu1 %v3629_v19, %s3228_s5 }
 0x135   : > { %1063 = vrot.lane.b32.xlu0 %v3649_v33, %s3228_s5 }
 0x136   : > { %v654_v4 = vpop.permute.xlu1 %653 }
 0x137   : > { %719 = vst.msk [vmem:[#allocation3 + $0x7c] sm:$0xf] %vm687_vm3, %v654_v4  ;;  %v819_v20 = vpop.permute.xlu0 %818  ;;  %v1182_v4 = vld [vmem:[#allocation2 + $0xa9] sm:$0xff] }
 0x138   : > { %914 = vst.msk [vmem:[#allocation3 + $0x4] sm:$0xf] %vm912_vm4, %v819_v20  ;;  %1055 = vrot.lane.b32.xlu2 %v3615_v6, %s3228_s5  ;;  %v363_v6 = vld [vmem:[%s3371_s23 + $0xf0] sm:$0xff] }
 0x139   : > { %396 = vst.msk [vmem:[#allocation2 + $0x181] sm:$0xff] %vm277_vm0, %v363_v6 }
 0x13a   : > { %v829_v58 = vpop.permute.xlu2 %828 }
 0x13b   : > { %919 = vst.msk [vmem:[#allocation3 + $0x18] sm:$0xf] %vm912_vm4, %v829_v58  ;;  %v1212_v58 = vpack.c.bf16 %v1180_v5, %v1180_v5 }
 0x13c   : > { %1065 = vrot.lane.b32.xlu1 %v3647_v32, %s3228_s5 }
 0x13d   : > { %1069 = vrot.lane.b32.xlu0 %v3668_v50, %s3228_s5 }
 0x13e   : > { %v821_v19 = vpop.permute.xlu1 %820 }
 0x13f   : > { %915 = vst.msk [vmem:[#allocation3 + $0x8] sm:$0xf] %vm912_vm4, %v821_v19  ;;  %v825_v33 = vpop.permute.xlu0 %824  ;;  %v3918_v19 = vpack.c.bf16 %v1182_v4, %v1182_v4 }
 0x140   : > { %917 = vst.msk [vmem:[#allocation3 + $0x10] sm:$0xf] %vm912_vm4, %v825_v33  ;;  %1061 = vrot.lane.b32.xlu2 %v3633_v21, %s3228_s5  ;;  %v1178_v33 = vld [vmem:[#allocation2 + $0x79] sm:$0xff] }
 0x141   : > { %v3922_v6 = vpack.c.bf16 %v1178_v33, %v1178_v33 }
 0x142   : > { %v835_v47 = vpop.permute.xlu2 %834 }
 0x143   : > { %922 = vst.msk [vmem:[#allocation3 + $0x24] sm:$0xf] %vm912_vm4, %v835_v47 }
 0x144   : > { %1071 = vrot.lane.b32.xlu1 %v3666_v46, %s3228_s5 }
 0x145   : > { %1075 = vrot.lane.b32.xlu0 %v3689_v7, %s3228_s5 }
 0x146   : > { %v827_v32 = vpop.permute.xlu1 %826 }
 0x147   : > { %918 = vst.msk [vmem:[#allocation3 + $0x14] sm:$0xf] %vm912_vm4, %v827_v32  ;;  %v831_v50 = vpop.permute.xlu0 %830  ;;  %v1183_v32 = vld [vmem:[#allocation2 + $0xb1] sm:$0xff] }
 0x148   : > { %920 = vst.msk [vmem:[#allocation3 + $0x1c] sm:$0xf] %vm912_vm4, %v831_v50  ;;  %1067 = vrot.lane.b32.xlu2 %v3651_v34, %s3228_s5 }
 0x14a   : > { %v841_v21 = vpop.permute.xlu2 %840 }
 0x14b   : > { %925 = vst.msk [vmem:[#allocation3 + $0x30] sm:$0xf] %vm912_vm4, %v841_v21  ;;  %v1185_v21 = vld [vmem:[#allocation2 + $0xc9] sm:$0xff] }
 0x14c   : > { %1077 = vrot.lane.b32.xlu1 %v3687_v0, %s3228_s5 }
 0x14d   : > { %1081 = vrot.lane.b32.xlu0 %v3710_v25, %s3228_s5 }
 0x14e   : > { %v833_v46 = vpop.permute.xlu1 %832 }
 0x14f   : > { %921 = vst.msk [vmem:[#allocation3 + $0x20] sm:$0xf] %vm912_vm4, %v833_v46  ;;  %v837_v7 = vpop.permute.xlu0 %836 }
 0x150   : > { %923 = vst.msk [vmem:[#allocation3 + $0x28] sm:$0xf] %vm912_vm4, %v837_v7  ;;  %1073 = vrot.lane.b32.xlu2 %v3674_v53, %s3228_s5  ;;  %v364_v53 = vld [vmem:[%s3371_s23 + $0xf8] sm:$0xff]  ;;  %v1215_v7 = vpack.c.bf16 %v1183_v32, %v1183_v32  ;;  %s3233_s23 = smov 24  }
 0x151   : > { %397 = vst.msk [vmem:[#allocation2 + $0x189] sm:$0xff] %vm277_vm0, %v364_v53  ;;  %v1186_v53 = vld [vmem:[#allocation2 + $0xd9] sm:$0xff] }
 0x152   : > { %v847_v34 = vpop.permute.xlu2 %846 }
 0x153   : > { %928 = vst.msk [vmem:[#allocation3 + $0x3c] sm:$0xf] %vm912_vm4, %v847_v34  ;;  %v3930_v34 = vpack.c.bf16 %v1185_v21, %v1185_v21 }
 0x154   : > { %1083 = vrot.lane.b32.xlu1 %v3708_v18, %s3228_s5 }
 0x155   : > { %1087 = vrot.lane.b32.xlu0 %v3731_v48, %s3228_s5 }
 0x156   : > { %v839_v0 = vpop.permute.xlu1 %838 }
 0x157   : > { %924 = vst.msk [vmem:[#allocation3 + $0x2c] sm:$0xf] %vm912_vm4, %v839_v0  ;;  %v843_v25 = vpop.permute.xlu0 %842  ;;  %v1181_v0 = vld [vmem:[#allocation2 + $0x99] sm:$0xff] }
 0x158   : > { %926 = vst.msk [vmem:[#allocation3 + $0x34] sm:$0xf] %vm912_vm4, %v843_v25  ;;  %1079 = vrot.lane.b32.xlu2 %v3695_v10, %s3228_s5  ;;  %v976_v9 = vld [vmem:[#allocation2 + $0x188] sm:$0xff] }
 0x159   : > { %v3886_v12 = vpack.c.bf16 %v976_v9, %v976_v9 }
 0x15a   : > { %v853_v49 = vpop.permute.xlu2 %852 }
 0x15b   : > { %931 = vst.msk [vmem:[#allocation3 + $0x48] sm:$0xf] %vm912_vm4, %v853_v49  ;;  %v3934_v49 = vpack.c.bf16 %v1181_v0, %v1181_v0 }
 0x15c   : > { %1089 = vrot.lane.b32.xlu1 %v3729_v41, %s3228_s5  ;;  %v975_v41 = vld [vmem:[#allocation2 + $0x180] sm:$0xff] }
 0x15d   : > { %1093 = vrot.lane.b32.xlu0 %v3752_v11, %s3228_s5  ;;  %v1007_v59 = vpack.c.bf16 %v975_v41, %v975_v41  ;;  %v1218_v41 = vpack.c.bf16 %v1186_v53, %v1186_v53 }
 0x15e   : > { %v845_v18 = vpop.permute.xlu1 %844 }
 0x15f   : > { %927 = vst.msk [vmem:[#allocation3 + $0x38] sm:$0xf] %vm912_vm4, %v845_v18  ;;  %v849_v48 = vpop.permute.xlu0 %848 }
 0x160   : > { %929 = vst.msk [vmem:[#allocation3 + $0x40] sm:$0xf] %vm912_vm4, %v849_v48  ;;  %1085 = vrot.lane.b32.xlu2 %v3716_v29, %s3228_s5  ;;  %v1202_v29 = vpack.c.bf16 %v1170_v54, %v1170_v54  ;;  %v1188_v48 = vld [vmem:[#allocation2 + $0xf1] sm:$0xff]  ;;  %v1184_v54 = vld [vmem:[#allocation2 + $0xc1] sm:$0xff] }
 0x162   : > { %v859_v10 = vpop.permute.xlu2 %858 }
 0x163   : > { %934 = vst.msk [vmem:[#allocation3 + $0x54] sm:$0xf] %vm912_vm4, %v859_v10 }
 0x164   : > { %1095 = vrot.lane.b32.xlu1 %v3750_v2, %s3228_s5  ;;  %v1173_v2 = vld [vmem:[#allocation2 + $0x39] sm:$0xff] }
 0x165   : > { %1099 = vrot.lane.b32.xlu0 %v3771_v26, %s3228_s5  ;;  %v1172_v26 = vld [vmem:[#allocation2 + $0x31] sm:$0xff] }
 0x166   : > { %v851_v51 = vpop.permute.xlu1 %850  ;;  %v3898_v30 = vpack.c.bf16 %v1172_v26, %v1172_v26  ;;  %v3966_v26 = vpack.c.bf16 %v1194_v17, %v1194_v17 }
 0x167   : > { %930 = vst.msk [vmem:[#allocation3 + $0x44] sm:$0xf] %vm912_vm4, %v851_v51  ;;  %v855_v55 = vpop.permute.xlu0 %854  ;;  %v3942_v51 = vpack.c.bf16 %v1188_v48, %v1188_v48 }
 0x168   : > { %932 = vst.msk [vmem:[#allocation3 + $0x4c] sm:$0xf] %vm912_vm4, %v855_v55  ;;  %1091 = vrot.lane.b32.xlu2 %v3737_v52, %s3228_s5  ;;  %v3882_v52 = vpack.c.bf16 %v1173_v2, %v1173_v2 }
 0x16a   : > { %v865_v62 = vpop.permute.xlu2 %864 }
 0x16b   : > { %937 = vst.msk [vmem:[#allocation3 + $0x60] sm:$0xf] %vm912_vm4, %v865_v62 }
 0x16c   : > { %1101 = vrot.lane.b32.xlu1 %v1007_v59, %s3228_s5  ;;  %v3946_v59 = vpack.c.bf16 %v1184_v54, %v1184_v54  ;;  %v1199_v54 = vld [vmem:[#allocation2 + $0x171] sm:$0xff] }
 0x16d   : > { %1266 = vrot.lane.b32.xlu0 %v1202_v29, %s3229_s9  ;;  %v1189_v29 = vld [vmem:[#allocation2 + $0xf9] sm:$0xff] }
 0x16e   : > { %v857_v1 = vpop.permute.xlu1 %856  ;;  %v1221_v2 = vpack.c.bf16 %v1189_v29, %v1189_v29  ;;  %v4004_v29 = vpack.c.bf16 %v1199_v54, %v1199_v54 }
 0x16f   : > { %933 = vst.msk [vmem:[#allocation3 + $0x50] sm:$0xf] %vm912_vm4, %v857_v1  ;;  %v861_v3 = vpop.permute.xlu0 %860 }
 0x170   : > { %935 = vst.msk [vmem:[#allocation3 + $0x58] sm:$0xf] %vm912_vm4, %v861_v3  ;;  %1097 = vrot.lane.b32.xlu2 %v3758_v15, %s3228_s5  ;;  %v1206_v15 = vpack.c.bf16 %v1174_v13, %v1174_v13  ;;  %v3954_v3 = vpack.c.bf16 %v1191_v63, %v1191_v63  ;;  %v1192_v13 = vld [vmem:[#allocation2 + $0x121] sm:$0xff] }
 0x172   : > { %v871_v11 = vpop.permute.xlu2 %870 }
 0x173   : > { %940 = vst.msk [vmem:[#allocation3 + $0x6c] sm:$0xf] %vm912_vm4, %v871_v11 }
 0x174   : > { %1268 = vrot.lane.b32.xlu1 %v1203_v8, %s3229_s9  ;;  %v1187_v8 = vld [vmem:[#allocation2 + $0xe1] sm:$0xff] }
 0x175   : > { %1272 = vrot.lane.b32.xlu0 %v3882_v52, %s3229_s9  ;;  %v3958_v11 = vpack.c.bf16 %v1187_v8, %v1187_v8 }
 0x176   : > { %v863_v16 = vpop.permute.xlu1 %862 }
 0x177   : > { %936 = vst.msk [vmem:[#allocation3 + $0x5c] sm:$0xf] %vm912_vm4, %v863_v16  ;;  %v867_v22 = vpop.permute.xlu0 %866 }
 0x178   : > { %938 = vst.msk [vmem:[#allocation3 + $0x64] sm:$0xf] %vm912_vm4, %v867_v22  ;;  %1103 = vrot.lane.b32.xlu2 %v3886_v12, %s3228_s5 }
 0x17a   : > { %v877_v28 = vpop.permute.xlu2 %876 }
 0x17b   : > { %943 = vst.msk [vmem:[#allocation3 + $0x78] sm:$0xf] %vm912_vm4, %v877_v28  ;;  %v1190_v28 = vld [vmem:[#allocation2 + $0x109] sm:$0xff] }
 0x17c   : > { %1274 = vrot.lane.b32.xlu1 %v1206_v15, %s3229_s9  ;;  %v1224_v15 = vpack.c.bf16 %v1192_v13, %v1192_v13  ;;  %v1395_v13 = vld [vmem:[#allocation2 + $0x1a] sm:$0xff] }
 0x17d   : > { %1278 = vrot.lane.b32.xlu0 %v3894_v24, %s3229_s9  ;;  %v1427_v17 = vpack.c.bf16 %v1395_v13, %v1395_v13 }
 0x17e   : > { %v869_v35 = vpop.permute.xlu1 %868 }
 0x17f   : > { %939 = vst.msk [vmem:[#allocation3 + $0x68] sm:$0xf] %vm912_vm4, %v869_v35  ;;  %v873_v39 = vpop.permute.xlu0 %872  ;;  %v3970_v35 = vpack.c.bf16 %v1190_v28, %v1190_v28 }
 0x180   : > { %941 = vst.msk [vmem:[#allocation3 + $0x70] sm:$0xf] %vm912_vm4, %v873_v39  ;;  %1270 = vrot.lane.b32.xlu2 %v3898_v30, %s3229_s9 }
 0x182   : > { %v1044_v43 = vpop.permute.xlu2 %1043 }
 0x183   : > { %1139 = vst.msk [vmem:[#allocation3 + $0x4] sm:$0xf] %vm1137_vm5, %v1044_v43  ;;  %v1227_v43 = vpack.c.bf16 %v1195_v38, %v1195_v38  ;;  %v1398_v38 = vld [vmem:[#allocation2 + $0x3a] sm:$0xff] }
 0x184   : > { %1280 = vrot.lane.b32.xlu1 %v1209_v42, %s3229_s9  ;;  %v1197_v42 = vld [vmem:[#allocation2 + $0x159] sm:$0xff] }
 0x185   : > { %1284 = vrot.lane.b32.xlu0 %v3906_v45, %s3229_s9  ;;  %v3978_v5 = vpack.c.bf16 %v1197_v42, %v1197_v42  ;;  %v4022_v42 = vpack.c.bf16 %v1398_v38, %v1398_v38 }
 0x186   : > { %v875_v57 = vpop.permute.xlu1 %874 }
 0x187   : > { %942 = vst.msk [vmem:[#allocation3 + $0x74] sm:$0xf] %vm912_vm4, %v875_v57  ;;  %v879_v20 = vpop.permute.xlu0 %878  ;;  %v1193_v57 = vld [vmem:[#allocation2 + $0x129] sm:$0xff] }
 0x188   : > { %944 = vst.msk [vmem:[#allocation3 + $0x7c] sm:$0xf] %vm912_vm4, %v879_v20  ;;  %1276 = vrot.lane.b32.xlu2 %v3910_v56, %s3229_s9  ;;  %v3982_v20 = vpack.c.bf16 %v1193_v57, %v1193_v57 }
 0x18a   : > { %v1050_v47 = vpop.permute.xlu2 %1049 }
 0x18b   : > { %1142 = vst.msk [vmem:[#allocation3 + $0x10] sm:$0xf] %vm1137_vm5, %v1050_v47  ;;  %v1200_v47 = vld [vmem:[#allocation2 + $0x181] sm:$0xff] }
 0x18c   : > { %1286 = vrot.lane.b32.xlu1 %v1212_v58, %s3229_s9  ;;  %v1198_v58 = vld [vmem:[#allocation2 + $0x169] sm:$0xff]  ;;  %v3990_v21 = vpack.c.bf16 %v1200_v47, %v1200_v47 }
 0x18d   : > { %1290 = vrot.lane.b32.xlu0 %v3918_v19, %s3229_s9 }
 0x18e   : > { %v1042_v50 = vpop.permute.xlu1 %1041 }
 0x18f   : > { %1138 = vst.msk [vmem:[#allocation3] sm:$0xf] %vm1137_vm5, %v1042_v50  ;;  %v1046_v46 = vpop.permute.xlu0 %1045  ;;  %v1230_v50 = vpack.c.bf16 %v1198_v58, %v1198_v58  ;;  %v1401_v58 = vld [vmem:[#allocation2 + $0x62] sm:$0xff] }
 0x190   : > { %1140 = vst.msk [vmem:[#allocation3 + $0x8] sm:$0xf] %vm1137_vm5, %v1046_v46  ;;  %1282 = vrot.lane.b32.xlu2 %v3922_v6, %s3229_s9  ;;  %v1196_v46 = vld [vmem:[#allocation2 + $0x151] sm:$0xff]  ;;  %v4032_v47 = vpack.c.bf16 %v1401_v58, %v1401_v58 }
 0x191   : > { %v3994_v0 = vpack.c.bf16 %v1196_v46, %v1196_v46 }
 0x192   : > { %v1056_v25 = vpop.permute.xlu2 %1055 }
 0x193   : > { %1145 = vst.msk [vmem:[#allocation3 + $0x1c] sm:$0xf] %vm1137_vm5, %v1056_v25  ;;  %v1201_v25 = vld [vmem:[#allocation2 + $0x189] sm:$0xff] }
 0x194   : > { %1292 = vrot.lane.b32.xlu1 %v1215_v7, %s3229_s9 }
 0x195   : > { %1296 = vrot.lane.b32.xlu0 %v3930_v34, %s3229_s9 }
 0x196   : > { %v1048_v18 = vpop.permute.xlu1 %1047 }
 0x197   : > { %1141 = vst.msk [vmem:[#allocation3 + $0xc] sm:$0xf] %vm1137_vm5, %v1048_v18  ;;  %v1052_v10 = vpop.permute.xlu0 %1051  ;;  %v1396_v18 = vld [vmem:[#allocation2 + $0x22] sm:$0xff] }
 0x198   : > { %1143 = vst.msk [vmem:[#allocation3 + $0x14] sm:$0xf] %vm1137_vm5, %v1052_v10  ;;  %1288 = vrot.lane.b32.xlu2 %v3934_v49, %s3229_s9  ;;  %v1233_v10 = vpack.c.bf16 %v1201_v25, %v1201_v25 }
 0x19a   : > { %v1062_v55 = vpop.permute.xlu2 %1061 }
 0x19b   : > { %1148 = vst.msk [vmem:[#allocation3 + $0x28] sm:$0xf] %vm1137_vm5, %v1062_v55 }
 0x19c   : > { %1298 = vrot.lane.b32.xlu1 %v1218_v41, %s3229_s9  ;;  %v1428_v41 = vpack.c.bf16 %v1396_v18, %v1396_v18 }
 0x19d   : > { %1302 = vrot.lane.b32.xlu0 %v3942_v51, %s3229_s9 }
 0x19e   : > { %v1054_v62 = vpop.permute.xlu1 %1053 }
 0x19f   : > { %1144 = vst.msk [vmem:[#allocation3 + $0x18] sm:$0xf] %vm1137_vm5, %v1054_v62  ;;  %v1058_v1 = vpop.permute.xlu0 %1057  ;;  %v1397_v62 = vld [vmem:[#allocation2 + $0x32] sm:$0xff] }
 0x1a0   : > { %1146 = vst.msk [vmem:[#allocation3 + $0x20] sm:$0xf] %vm1137_vm5, %v1058_v1  ;;  %1294 = vrot.lane.b32.xlu2 %v3946_v59, %s3229_s9  ;;  %v1399_v1 = vld [vmem:[#allocation2 + $0x4a] sm:$0xff]  ;;  %v1429_v8 = vpack.c.bf16 %v1397_v62, %v1397_v62 }
 0x1a2   : > { %v1068_v9 = vpop.permute.xlu2 %1067 }
 0x1a3   : > { %1151 = vst.msk [vmem:[#allocation3 + $0x34] sm:$0xf] %vm1137_vm5, %v1068_v9  ;;  %v4011_v9 = vpack.c.bf16 %v1399_v1, %v1399_v1 }
 0x1a4   : > { %1304 = vrot.lane.b32.xlu1 %v1221_v2, %s3229_s9 }
 0x1a5   : > { %1308 = vrot.lane.b32.xlu0 %v3954_v3, %s3229_s9 }
 0x1a6   : > { %v1060_v16 = vpop.permute.xlu1 %1059 }
 0x1a7   : > { %1147 = vst.msk [vmem:[#allocation3 + $0x24] sm:$0xf] %vm1137_vm5, %v1060_v16  ;;  %v1064_v22 = vpop.permute.xlu0 %1063 }
 0x1a8   : > { %1149 = vst.msk [vmem:[#allocation3 + $0x2c] sm:$0xf] %vm1137_vm5, %v1064_v22  ;;  %1300 = vrot.lane.b32.xlu2 %v3958_v11, %s3229_s9  ;;  %v1400_v22 = vld [vmem:[#allocation2 + $0x52] sm:$0xff] }
 0x1aa   : > { %v1074_v31 = vpop.permute.xlu2 %1073 }
 0x1ab   : > { %1154 = vst.msk [vmem:[#allocation3 + $0x40] sm:$0xf] %vm1137_vm5, %v1074_v31  ;;  %v1432_v31 = vpack.c.bf16 %v1400_v22, %v1400_v22 }
 0x1ac   : > { %1310 = vrot.lane.b32.xlu1 %v1224_v15, %s3229_s9 }
 0x1ad   : > { %1314 = vrot.lane.b32.xlu0 %v3966_v26, %s3229_s9 }
 0x1ae   : > { %v1066_v39 = vpop.permute.xlu1 %1065 }
 0x1af   : > { %1150 = vst.msk [vmem:[#allocation3 + $0x30] sm:$0xf] %vm1137_vm5, %v1066_v39  ;;  %v1070_v44 = vpop.permute.xlu0 %1069 }
 0x1b0   : > { %1152 = vst.msk [vmem:[#allocation3 + $0x38] sm:$0xf] %vm1137_vm5, %v1070_v44  ;;  %1306 = vrot.lane.b32.xlu2 %v3970_v35, %s3229_s9  ;;  %v1403_v44 = vld [vmem:[#allocation2 + $0x7a] sm:$0xff] }
 0x1b2   : > { %v1080_v4 = vpop.permute.xlu2 %1079 }
 0x1b3   : > { %1157 = vst.msk [vmem:[#allocation3 + $0x4c] sm:$0xf] %vm1137_vm5, %v1080_v4  ;;  %v1435_v4 = vpack.c.bf16 %v1403_v44, %v1403_v44 }
 0x1b4   : > { %1316 = vrot.lane.b32.xlu1 %v1227_v43, %s3229_s9 }
 0x1b5   : > { %1320 = vrot.lane.b32.xlu0 %v3978_v5, %s3229_s9 }
 0x1b6   : > { %v1072_v33 = vpop.permute.xlu1 %1071 }
 0x1b7   : > { %1153 = vst.msk [vmem:[#allocation3 + $0x3c] sm:$0xf] %vm1137_vm5, %v1072_v33  ;;  %v1076_v32 = vpop.permute.xlu0 %1075 }
 0x1b8   : > { %1155 = vst.msk [vmem:[#allocation3 + $0x44] sm:$0xf] %vm1137_vm5, %v1076_v32  ;;  %1312 = vrot.lane.b32.xlu2 %v3982_v20, %s3229_s9 }
 0x1ba   : > { %v1086_v7 = vpop.permute.xlu2 %1085 }
 0x1bb   : > { %1160 = vst.msk [vmem:[#allocation3 + $0x58] sm:$0xf] %vm1137_vm5, %v1086_v7  ;;  %v1404_v7 = vld [vmem:[#allocation2 + $0x82] sm:$0xff] }
 0x1bc   : > { %1322 = vrot.lane.b32.xlu1 %v1230_v50, %s3229_s9 }
 0x1bd   : > { %1326 = vrot.lane.b32.xlu0 %v3990_v21, %s3229_s9 }
 0x1be   : > { %v1078_v53 = vpop.permute.xlu1 %1077 }
 0x1bf   : > { %1156 = vst.msk [vmem:[#allocation3 + $0x48] sm:$0xf] %vm1137_vm5, %v1078_v53  ;;  %v1082_v48 = vpop.permute.xlu0 %1081  ;;  %v4042_v53 = vpack.c.bf16 %v1404_v7, %v1404_v7 }
 0x1c0   : > { %1158 = vst.msk [vmem:[#allocation3 + $0x50] sm:$0xf] %vm1137_vm5, %v1082_v48  ;;  %1318 = vrot.lane.b32.xlu2 %v3994_v0, %s3229_s9 }
 0x1c2   : > { %v1092_v55 = vpop.permute.xlu2 %1091 }
 0x1c3   : > { %1163 = vst.msk [vmem:[#allocation3 + $0x64] sm:$0xf] %vm1137_vm5, %v1092_v55 }
 0x1c4   : > { %1328 = vrot.lane.b32.xlu1 %v1233_v10, %s3229_s9 }
 0x1c5   : > { %1493 = vrot.lane.b32.xlu0 %v1428_v41, %s3230_s11  ;;  %v1407_v41 = vld [vmem:[#allocation2 + $0xaa] sm:$0xff] }
 0x1c6   : > { %v1084_v63 = vpop.permute.xlu1 %1083  ;;  %v4052_v55 = vpack.c.bf16 %v1407_v41, %v1407_v41 }
 0x1c7   : > { %1159 = vst.msk [vmem:[#allocation3 + $0x54] sm:$0xf] %vm1137_vm5, %v1084_v63  ;;  %v1088_v2 = vpop.permute.xlu0 %1087 }
 0x1c8   : > { %1161 = vst.msk [vmem:[#allocation3 + $0x5c] sm:$0xf] %vm1137_vm5, %v1088_v2  ;;  %1324 = vrot.lane.b32.xlu2 %v4004_v29, %s3229_s9  ;;  %v1410_v2 = vld [vmem:[#allocation2 + $0xca] sm:$0xff] }
 0x1c9   : > { %v4062_v13 = vpack.c.bf16 %v1410_v2, %v1410_v2 }
 0x1ca   : > { %v1098_v16 = vpop.permute.xlu2 %1097 }
 0x1cb   : > { %1166 = vst.msk [vmem:[#allocation3 + $0x70] sm:$0xf] %vm1137_vm5, %v1098_v16 }
 0x1cc   : > { %1495 = vrot.lane.b32.xlu1 %v1429_v8, %s3230_s11 }
 0x1cd   : > { %1499 = vrot.lane.b32.xlu0 %v4011_v9, %s3230_s11 }
 0x1ce   : > { %v1090_v15 = vpop.permute.xlu1 %1089 }
 0x1cf   : > { %1162 = vst.msk [vmem:[#allocation3 + $0x60] sm:$0xf] %vm1137_vm5, %v1090_v15  ;;  %v1094_v28 = vpop.permute.xlu0 %1093  ;;  %v1413_v15 = vld [vmem:[#allocation2 + $0xf2] sm:$0xff] }
 0x1d0   : > { %1164 = vst.msk [vmem:[#allocation3 + $0x68] sm:$0xf] %vm1137_vm5, %v1094_v28  ;;  %1491 = vrot.lane.b32.xlu2 %v1427_v17, %s3230_s11 }
 0x1d2   : > { %v1104_v39 = vpop.permute.xlu2 %1103 }
 0x1d3   : > { %1169 = vst.msk [vmem:[#allocation3 + $0x7c] sm:$0xf] %vm1137_vm5, %v1104_v39 }
 0x1d4   : > { %1501 = vrot.lane.b32.xlu1 %v1432_v31, %s3230_s11  ;;  %v4072_v31 = vpack.c.bf16 %v1413_v15, %v1413_v15  ;;  %v1626_v15 = vld [vmem:[#allocation2 + $0x68] sm:$0xff] }
 0x1d5   : > { %1505 = vrot.lane.b32.xlu0 %v3644_v27, %s3230_s11  ;;  %v1406_v27 = vld [vmem:[#allocation2 + $0x9a] sm:$0xff] }
 0x1d6   : > { %v1096_v43 = vpop.permute.xlu1 %1095  ;;  %v1438_v46 = vpack.c.bf16 %v1406_v27, %v1406_v27 }
 0x1d7   : > { %1165 = vst.msk [vmem:[#allocation3 + $0x6c] sm:$0xf] %vm1137_vm5, %v1096_v43  ;;  %v1100_v57 = vpop.permute.xlu0 %1099  ;;  %v1416_v43 = vld [vmem:[#allocation2 + $0x112] sm:$0xff] }
 0x1d8   : > { %1167 = vst.msk [vmem:[#allocation3 + $0x74] sm:$0xf] %vm1137_vm5, %v1100_v57  ;;  %1497 = vrot.lane.b32.xlu2 %v4022_v42, %s3230_s11 }
 0x1da   : > { %v1271_v33 = vpop.permute.xlu2 %1270 }
 0x1db   : > { %1365 = vst.msk [vmem:[#allocation3 + $0x8] sm:$0xf] %vm1362_vm6, %v1271_v33 }
 0x1dc   : > { %1507 = vrot.lane.b32.xlu1 %v1435_v4, %s3230_s11  ;;  %v4082_v4 = vpack.c.bf16 %v1416_v43, %v1416_v43 }
 0x1dd   : > { %1511 = vrot.lane.b32.xlu0 %v3663_v40, %s3230_s11  ;;  %v1409_v40 = vld [vmem:[#allocation2 + $0xc2] sm:$0xff] }
 0x1de   : > { %v1102_v32 = vpop.permute.xlu1 %1101  ;;  %v1441_v10 = vpack.c.bf16 %v1409_v40, %v1409_v40 }
 0x1df   : > { %1168 = vst.msk [vmem:[#allocation3 + $0x78] sm:$0xf] %vm1137_vm5, %v1102_v32  ;;  %v1267_v50 = vpop.permute.xlu0 %1266  ;;  %v1419_v32 = vld [vmem:[#allocation2 + $0x13a] sm:$0xff] }
 0x1e0   : > { %1363 = vst.msk [vmem:[#allocation3] sm:$0xf] %vm1362_vm6, %v1267_v50  ;;  %1503 = vrot.lane.b32.xlu2 %v4032_v47, %s3230_s11 }
 0x1e2   : > { %v1277_v25 = vpop.permute.xlu2 %1276 }
 0x1e3   : > { %1368 = vst.msk [vmem:[#allocation3 + $0x14] sm:$0xf] %vm1362_vm6, %v1277_v25  ;;  %v1426_v25 = vld [vmem:[#allocation2 + $0x18a] sm:$0xff] }
 0x1e4   : > { %1513 = vrot.lane.b32.xlu1 %v1438_v46, %s3230_s11  ;;  %v4092_v46 = vpack.c.bf16 %v1419_v32, %v1419_v32 }
 0x1e5   : > { %1517 = vrot.lane.b32.xlu0 %v3682_v60, %s3230_s11  ;;  %v1412_v60 = vld [vmem:[#allocation2 + $0xe2] sm:$0xff] }
 0x1e6   : > { %v1269_v18 = vpop.permute.xlu1 %1268  ;;  %v1444_v1 = vpack.c.bf16 %v1412_v60, %v1412_v60 }
 0x1e7   : > { %1364 = vst.msk [vmem:[#allocation3 + $0x4] sm:$0xf] %vm1362_vm6, %v1269_v18  ;;  %v1273_v48 = vpop.permute.xlu0 %1272 }
 0x1e8   : > { %1366 = vst.msk [vmem:[#allocation3 + $0xc] sm:$0xf] %vm1362_vm6, %v1273_v48  ;;  %1509 = vrot.lane.b32.xlu2 %v4042_v53, %s3230_s11  ;;  %v4102_v48 = vpack.c.bf16 %v1426_v25, %v1426_v25  ;;  %v1630_v25 = vld [vmem:[#allocation2 + $0x98] sm:$0xff] }
 0x1ea   : > { %v1283_v54 = vpop.permute.xlu2 %1282 }
 0x1eb   : > { %1371 = vst.msk [vmem:[#allocation3 + $0x20] sm:$0xf] %vm1362_vm6, %v1283_v54  ;;  %v1621_v54 = vld [vmem:[#allocation2 + $0x30] sm:$0xff] }
 0x1ec   : > { %1519 = vrot.lane.b32.xlu1 %v1441_v10, %s3230_s11  ;;  %v1422_v10 = vld [vmem:[#allocation2 + $0x15a] sm:$0xff] }
 0x1ed   : > { %1523 = vrot.lane.b32.xlu0 %v3703_v14, %s3230_s11  ;;  %v1415_v14 = vld [vmem:[#allocation2 + $0x10a] sm:$0xff] }
 0x1ee   : > { %v1275_v62 = vpop.permute.xlu1 %1274  ;;  %v1447_v22 = vpack.c.bf16 %v1415_v14, %v1415_v14 }
 0x1ef   : > { %1367 = vst.msk [vmem:[#allocation3 + $0x10] sm:$0xf] %vm1362_vm6, %v1275_v62  ;;  %v1279_v63 = vpop.permute.xlu0 %1278  ;;  %v1623_v62 = vld [vmem:[#allocation2 + $0x48] sm:$0xff] }
 0x1f0   : > { %1369 = vst.msk [vmem:[#allocation3 + $0x18] sm:$0xf] %vm1362_vm6, %v1279_v63  ;;  %1515 = vrot.lane.b32.xlu2 %v4052_v55, %s3230_s11  ;;  %v1655_v2 = vpack.c.bf16 %v1623_v62, %v1623_v62  ;;  %v1628_v62 = vld [vmem:[#allocation2 + $0x80] sm:$0xff] }
 0x1f2   : > { %v1289_v8 = vpop.permute.xlu2 %1288 }
 0x1f3   : > { %1374 = vst.msk [vmem:[#allocation3 + $0x2c] sm:$0xf] %vm1362_vm6, %v1289_v8  ;;  %v1425_v8 = vld [vmem:[#allocation2 + $0x182] sm:$0xff] }
 0x1f4   : > { %1525 = vrot.lane.b32.xlu1 %v1444_v1, %s3230_s11  ;;  %v1653_v1 = vpack.c.bf16 %v1621_v54, %v1621_v54  ;;  %v1662_v54 = vpack.c.bf16 %v1630_v25, %v1630_v25 }
 0x1f5   : > { %1529 = vrot.lane.b32.xlu0 %v3724_v36, %s3230_s11  ;;  %v1418_v36 = vld [vmem:[#allocation2 + $0x12a] sm:$0xff] }
 0x1f6   : > { %v1281_v16 = vpop.permute.xlu1 %1280  ;;  %v1450_v44 = vpack.c.bf16 %v1418_v36, %v1418_v36 }
 0x1f7   : > { %1370 = vst.msk [vmem:[#allocation3 + $0x1c] sm:$0xf] %vm1362_vm6, %v1281_v16  ;;  %v1285_v17 = vpop.permute.xlu0 %1284  ;;  %v4117_v16 = vpack.c.bf16 %v1425_v8, %v1425_v8 }
 0x1f8   : > { %1372 = vst.msk [vmem:[#allocation3 + $0x24] sm:$0xf] %vm1362_vm6, %v1285_v17  ;;  %1521 = vrot.lane.b32.xlu2 %v4062_v13, %s3230_s11  ;;  %v1624_v17 = vld [vmem:[#allocation2 + $0x50] sm:$0xff] }
 0x1f9   : > { %v1656_v36 = vpack.c.bf16 %v1624_v17, %v1624_v17 }
 0x1fa   : > { %v1295_v28 = vpop.permute.xlu2 %1294 }
 0x1fb   : > { %1377 = vst.msk [vmem:[#allocation3 + $0x38] sm:$0xf] %vm1362_vm6, %v1295_v28 }
 0x1fc   : > { %1531 = vrot.lane.b32.xlu1 %v1447_v22, %s3230_s11 }
 0x1fd   : > { %1535 = vrot.lane.b32.xlu0 %v3745_v61, %s3230_s11  ;;  %v1421_v61 = vld [vmem:[#allocation2 + $0x152] sm:$0xff] }
 0x1fe   : > { %v1287_v38 = vpop.permute.xlu1 %1286  ;;  %v1453_v27 = vpack.c.bf16 %v1421_v61, %v1421_v61 }
 0x1ff   : > { %1373 = vst.msk [vmem:[#allocation3 + $0x28] sm:$0xf] %vm1362_vm6, %v1287_v38  ;;  %v1291_v39 = vpop.permute.xlu0 %1290  ;;  %v1658_v38 = vpack.c.bf16 %v1626_v15, %v1626_v15 }
 0x200   : > { %1375 = vst.msk [vmem:[#allocation3 + $0x30] sm:$0xf] %vm1362_vm6, %v1291_v39  ;;  %1527 = vrot.lane.b32.xlu2 %v4072_v31, %s3230_s11  ;;  %v1622_v39 = vld [vmem:[#allocation2 + $0x38] sm:$0xff] }
 0x201   : > { %v1654_v43 = vpack.c.bf16 %v1622_v39, %v1622_v39  ;;  %v1636_v39 = vld [vmem:[#allocation2 + $0xe0] sm:$0xff] }
 0x202   : > { %v1301_v57 = vpop.permute.xlu2 %1300 }
 0x203   : > { %1380 = vst.msk [vmem:[#allocation3 + $0x44] sm:$0xf] %vm1362_vm6, %v1301_v57  ;;  %v1627_v57 = vld [vmem:[#allocation2 + $0x78] sm:$0xff] }
 0x204   : > { %1537 = vrot.lane.b32.xlu1 %v1450_v44, %s3230_s11 }
 0x205   : > { %1541 = vrot.lane.b32.xlu0 %v3766_v23, %s3230_s11  ;;  %v1424_v23 = vld [vmem:[#allocation2 + $0x172] sm:$0xff] }
 0x206   : > { %v1293_v58 = vpop.permute.xlu1 %1292  ;;  %v4098_v18 = vpack.c.bf16 %v1424_v23, %v1424_v23 }
 0x207   : > { %1376 = vst.msk [vmem:[#allocation3 + $0x34] sm:$0xf] %vm1362_vm6, %v1293_v58  ;;  %v1297_v33 = vpop.permute.xlu0 %1296  ;;  %v1629_v58 = vld [vmem:[#allocation2 + $0x90] sm:$0xff] }
 0x208   : > { %1378 = vst.msk [vmem:[#allocation3 + $0x3c] sm:$0xf] %vm1362_vm6, %v1297_v33  ;;  %1533 = vrot.lane.b32.xlu2 %v4082_v4, %s3230_s11  ;;  %v1661_v32 = vpack.c.bf16 %v1629_v58, %v1629_v58 }
 0x20a   : > { %v1307_v50 = vpop.permute.xlu2 %1306 }
 0x20b   : > { %1383 = vst.msk [vmem:[#allocation3 + $0x50] sm:$0xf] %vm1362_vm6, %v1307_v50  ;;  %v1625_v50 = vld [vmem:[#allocation2 + $0x60] sm:$0xff] }
 0x20c   : > { %1543 = vrot.lane.b32.xlu1 %v1453_v27, %s3230_s11  ;;  %v1659_v27 = vpack.c.bf16 %v1627_v57, %v1627_v57 }
 0x20d   : > { %1547 = vrot.lane.b32.xlu0 %v3782_v37, %s3230_s11  ;;  %v4107_v37 = vpack.c.bf16 %v1422_v10, %v1422_v10  ;;  %v1632_v10 = vld [vmem:[#allocation2 + $0xb0] sm:$0xff] }
 0x20e   : > { %v1299_v7 = vpop.permute.xlu1 %1298 }
 0x20f   : > { %1379 = vst.msk [vmem:[#allocation3 + $0x40] sm:$0xf] %vm1362_vm6, %v1299_v7  ;;  %v1303_v40 = vpop.permute.xlu0 %1302  ;;  %v1657_v7 = vpack.c.bf16 %v1625_v50, %v1625_v50  ;;  %v1639_v50 = vld [vmem:[#allocation2 + $0x108] sm:$0xff] }
 0x210   : > { %1381 = vst.msk [vmem:[#allocation3 + $0x48] sm:$0xf] %vm1362_vm6, %v1303_v40  ;;  %1539 = vrot.lane.b32.xlu2 %v4092_v46, %s3230_s11 }
 0x212   : > { %v1313_v41 = vpop.permute.xlu2 %1312 }
 0x213   : > { %1386 = vst.msk [vmem:[#allocation3 + $0x5c] sm:$0xf] %vm1362_vm6, %v1313_v41 }
 0x214   : > { %1549 = vrot.lane.b32.xlu1 %v4098_v18, %s3230_s11 }
 0x215   : > { %1553 = vrot.lane.b32.xlu0 %v4102_v48, %s3230_s11 }
 0x216   : > { %v1305_v60 = vpop.permute.xlu1 %1304 }
 0x217   : > { %1382 = vst.msk [vmem:[#allocation3 + $0x4c] sm:$0xf] %vm1362_vm6, %v1305_v60  ;;  %v1309_v63 = vpop.permute.xlu0 %1308  ;;  %v1664_v60 = vpack.c.bf16 %v1632_v10, %v1632_v10 }
 0x218   : > { %1384 = vst.msk [vmem:[#allocation3 + $0x54] sm:$0xf] %vm1362_vm6, %v1309_v63  ;;  %1545 = vrot.lane.b32.xlu2 %v4107_v37, %s3230_s11 }
 0x21a   : > { %v1319_v14 = vpop.permute.xlu2 %1318 }
 0x21b   : > { %1389 = vst.msk [vmem:[#allocation3 + $0x68] sm:$0xf] %vm1362_vm6, %v1319_v14  ;;  %v1635_v14 = vld [vmem:[#allocation2 + $0xd8] sm:$0xff] }
 0x21c   : > { %1717 = vrot.lane.b32.xlu1 %v1653_v1, %s3231_s22  ;;  %v1660_v1 = vpack.c.bf16 %v1628_v62, %v1628_v62  ;;  %v1667_v15 = vpack.c.bf16 %v1635_v14, %v1635_v14  ;;  %v1642_v62 = vld [vmem:[#allocation2 + $0x128] sm:$0xff] }
 0x21d   : > { %1721 = vrot.lane.b32.xlu0 %v1655_v2, %s3231_s22  ;;  %v1633_v2 = vld [vmem:[#allocation2 + $0xc0] sm:$0xff] }
 0x21e   : > { %v1311_v22 = vpop.permute.xlu1 %1310 }
 0x21f   : > { %1385 = vst.msk [vmem:[#allocation3 + $0x58] sm:$0xf] %vm1362_vm6, %v1311_v22  ;;  %v1315_v28 = vpop.permute.xlu0 %1314  ;;  %v1665_v22 = vpack.c.bf16 %v1633_v2, %v1633_v2 }
 0x220   : > { %1387 = vst.msk [vmem:[#allocation3 + $0x60] sm:$0xf] %vm1362_vm6, %v1315_v28  ;;  %1551 = vrot.lane.b32.xlu2 %v4117_v16, %s3230_s11  ;;  %v1631_v28 = vld [vmem:[#allocation2 + $0xa8] sm:$0xff] }
 0x222   : > { %v1325_v44 = vpop.permute.xlu2 %1324 }
 0x223   : > { %1392 = vst.msk [vmem:[#allocation3 + $0x74] sm:$0xf] %vm1362_vm6, %v1325_v44 }
 0x224   : > { %1723 = vrot.lane.b32.xlu1 %v1656_v36, %s3231_s22 }
 0x225   : > { %1727 = vrot.lane.b32.xlu0 %v1658_v38, %s3231_s22  ;;  %v1663_v38 = vpack.c.bf16 %v1631_v28, %v1631_v28  ;;  %v1645_v28 = vld [vmem:[#allocation2 + $0x150] sm:$0xff] }
 0x226   : > { %v1317_v61 = vpop.permute.xlu1 %1316 }
 0x227   : > { %1388 = vst.msk [vmem:[#allocation3 + $0x64] sm:$0xf] %vm1362_vm6, %v1317_v61  ;;  %v1321_v33 = vpop.permute.xlu0 %1320  ;;  %v1668_v61 = vpack.c.bf16 %v1636_v39, %v1636_v39 }
 0x228   : > { %1390 = vst.msk [vmem:[#allocation3 + $0x6c] sm:$0xf] %vm1362_vm6, %v1321_v33  ;;  %1719 = vrot.lane.b32.xlu2 %v1654_v43, %s3231_s22  ;;  %v1638_v43 = vld [vmem:[#allocation2 + $0xf8] sm:$0xff]  ;;  %v1634_v33 = vld [vmem:[#allocation2 + $0xc8] sm:$0xff] }
 0x229   : > { %v1670_v58 = vpack.c.bf16 %v1638_v43, %v1638_v43 }
 0x22a   : > { %v1492_v23 = vpop.permute.xlu2 %1491 }
 0x22b   : > { %1588 = vst.msk [vmem:[#allocation3] sm:$0xf] %vm1587_vm7, %v1492_v23 }
 0x22c   : > { %1729 = vrot.lane.b32.xlu1 %v1659_v27, %s3231_s22 }
 0x22d   : > { %1733 = vrot.lane.b32.xlu0 %v1661_v32, %s3231_s22  ;;  %v1666_v32 = vpack.c.bf16 %v1634_v33, %v1634_v33  ;;  %v1648_v33 = vld [vmem:[#allocation2 + $0x170] sm:$0xff] }
 0x22e   : > { %v1323_v40 = vpop.permute.xlu1 %1322 }
 0x22f   : > { %1391 = vst.msk [vmem:[#allocation3 + $0x70] sm:$0xf] %vm1362_vm6, %v1323_v40  ;;  %v1327_v41 = vpop.permute.xlu0 %1326  ;;  %v1671_v40 = vpack.c.bf16 %v1639_v50, %v1639_v50  ;;  %v1680_v50 = vpack.c.bf16 %v1648_v33, %v1648_v33 }
 0x230   : > { %1393 = vst.msk [vmem:[#allocation3 + $0x78] sm:$0xf] %vm1362_vm6, %v1327_v41  ;;  %1725 = vrot.lane.b32.xlu2 %v1657_v7, %s3231_s22  ;;  %v1641_v7 = vld [vmem:[#allocation2 + $0x120] sm:$0xff]  ;;  %v1637_v41 = vld [vmem:[#allocation2 + $0xf0] sm:$0xff] }
 0x231   : > { %v1673_v10 = vpack.c.bf16 %v1641_v7, %v1641_v7 }
 0x232   : > { %v1498_v63 = vpop.permute.xlu2 %1497 }
 0x233   : > { %1591 = vst.msk [vmem:[#allocation3 + $0xc] sm:$0xf] %vm1587_vm7, %v1498_v63 }
 0x234   : > { %1735 = vrot.lane.b32.xlu1 %v1662_v54, %s3231_s22 }
 0x235   : > { %1739 = vrot.lane.b32.xlu0 %v1664_v60, %s3231_s22  ;;  %v1669_v60 = vpack.c.bf16 %v1637_v41, %v1637_v41 }
 0x236   : > { %v1329_v8 = vpop.permute.xlu1 %1328 }
 0x237   : > { %1394 = vst.msk [vmem:[#allocation3 + $0x7c] sm:$0xf] %vm1362_vm6, %v1329_v8  ;;  %v1494_v17 = vpop.permute.xlu0 %1493  ;;  %v1674_v8 = vpack.c.bf16 %v1642_v62, %v1642_v62 }
 0x238   : > { %1589 = vst.msk [vmem:[#allocation3 + $0x4] sm:$0xf] %vm1587_vm7, %v1494_v17  ;;  %1731 = vrot.lane.b32.xlu2 %v1660_v1, %s3231_s22  ;;  %v1644_v1 = vld [vmem:[#allocation2 + $0x140] sm:$0xff]  ;;  %v1640_v17 = vld [vmem:[#allocation2 + $0x110] sm:$0xff] }
 0x239   : > { %v1676_v14 = vpack.c.bf16 %v1644_v1, %v1644_v1 }
 0x23a   : > { %v1504_v36 = vpop.permute.xlu2 %1503 }
 0x23b   : > { %1594 = vst.msk [vmem:[#allocation3 + $0x18] sm:$0xf] %vm1587_vm7, %v1504_v36 }
 0x23c   : > { %1741 = vrot.lane.b32.xlu1 %v1665_v22, %s3231_s22 }
 0x23d   : > { %1745 = vrot.lane.b32.xlu0 %v1667_v15, %s3231_s22  ;;  %v1672_v15 = vpack.c.bf16 %v1640_v17, %v1640_v17 }
 0x23e   : > { %v1496_v44 = vpop.permute.xlu1 %1495 }
 0x23f   : > { %1590 = vst.msk [vmem:[#allocation3 + $0x8] sm:$0xf] %vm1587_vm7, %v1496_v44  ;;  %v1500_v57 = vpop.permute.xlu0 %1499  ;;  %v1677_v44 = vpack.c.bf16 %v1645_v28, %v1645_v28 }
 0x240   : > { %1592 = vst.msk [vmem:[#allocation3 + $0x10] sm:$0xf] %vm1587_vm7, %v1500_v57  ;;  %1737 = vrot.lane.b32.xlu2 %v1663_v38, %s3231_s22  ;;  %v1647_v38 = vld [vmem:[#allocation2 + $0x168] sm:$0xff]  ;;  %v1643_v57 = vld [vmem:[#allocation2 + $0x138] sm:$0xff] }
 0x241   : > { %v1679_v43 = vpack.c.bf16 %v1647_v38, %v1647_v38 }
 0x242   : > { %v1510_v27 = vpop.permute.xlu2 %1509 }
 0x243   : > { %1597 = vst.msk [vmem:[#allocation3 + $0x24] sm:$0xf] %vm1587_vm7, %v1510_v27 }
 0x244   : > { %1747 = vrot.lane.b32.xlu1 %v1668_v61, %s3231_s22 }
 0x245   : > { %1751 = vrot.lane.b32.xlu0 %v1670_v58, %s3231_s22  ;;  %v1675_v58 = vpack.c.bf16 %v1643_v57, %v1643_v57 }
 0x246   : > { %v1502_v23 = vpop.permute.xlu1 %1501 }
 0x247   : > { %1593 = vst.msk [vmem:[#allocation3 + $0x14] sm:$0xf] %vm1587_vm7, %v1502_v23  ;;  %v1506_v25 = vpop.permute.xlu0 %1505  ;;  %v1646_v23 = vld [vmem:[#allocation2 + $0x158] sm:$0xff] }
 0x248   : > { %1595 = vst.msk [vmem:[#allocation3 + $0x1c] sm:$0xf] %vm1587_vm7, %v1506_v25  ;;  %1743 = vrot.lane.b32.xlu2 %v1666_v32, %s3231_s22  ;;  %v1678_v25 = vpack.c.bf16 %v1646_v23, %v1646_v23  ;;  %v1863_v23 = vld [vmem:[#allocation2 + $0xf9] sm:$0xff] }
 0x24a   : > { %v1516_v54 = vpop.permute.xlu2 %1515 }
 0x24b   : > { %1600 = vst.msk [vmem:[#allocation3 + $0x30] sm:$0xf] %vm1587_vm7, %v1516_v54 }
 0x24c   : > { %1753 = vrot.lane.b32.xlu1 %v1671_v40, %s3231_s22  ;;  %v1651_v40 = vld [vmem:[#allocation2 + $0x198] sm:$0xff] }
 0x24d   : > { %1757 = vrot.lane.b32.xlu0 %v1673_v10, %s3231_s22  ;;  %v1683_v54 = vpack.c.bf16 %v1651_v40, %v1651_v40  ;;  %v1866_v40 = vld [vmem:[#allocation2 + $0x121] sm:$0xff] }
 0x24e   : > { %v1508_v63 = vpop.permute.xlu1 %1507 }
 0x24f   : > { %1596 = vst.msk [vmem:[#allocation3 + $0x20] sm:$0xf] %vm1587_vm7, %v1508_v63  ;;  %v1512_v2 = vpop.permute.xlu0 %1511 }
 0x250   : > { %1598 = vst.msk [vmem:[#allocation3 + $0x28] sm:$0xf] %vm1587_vm7, %v1512_v2  ;;  %1749 = vrot.lane.b32.xlu2 %v1669_v60, %s3231_s22  ;;  %v1649_v60 = vld [vmem:[#allocation2 + $0x180] sm:$0xff] }
 0x251   : > { %v1681_v63 = vpack.c.bf16 %v1649_v60, %v1649_v60  ;;  %v1652_v2 = vld [vmem:[#allocation2 + $0x1a0] sm:$0xff] }
 0x252   : > { %v1522_v22 = vpop.permute.xlu2 %1521 }
 0x253   : > { %1603 = vst.msk [vmem:[#allocation3 + $0x3c] sm:$0xf] %vm1587_vm7, %v1522_v22  ;;  %v1848_v22 = vld [vmem:[#allocation2 + $0x49] sm:$0xff] }
 0x254   : > { %1759 = vrot.lane.b32.xlu1 %v1674_v8, %s3231_s22 }
 0x255   : > { %1763 = vrot.lane.b32.xlu0 %v1676_v14, %s3231_s22  ;;  %v1684_v14 = vpack.c.bf16 %v1652_v2, %v1652_v2 }
 0x256   : > { %v1514_v36 = vpop.permute.xlu1 %1513 }
 0x257   : > { %1599 = vst.msk [vmem:[#allocation3 + $0x2c] sm:$0xf] %vm1587_vm7, %v1514_v36  ;;  %v1518_v39 = vpop.permute.xlu0 %1517  ;;  %v1851_v36 = vld [vmem:[#allocation2 + $0x69] sm:$0xff] }
 0x258   : > { %1601 = vst.msk [vmem:[#allocation3 + $0x34] sm:$0xf] %vm1587_vm7, %v1518_v39  ;;  %1755 = vrot.lane.b32.xlu2 %v1672_v15, %s3231_s22 }
 0x25a   : > { %v1528_v61 = vpop.permute.xlu2 %1527 }
 0x25b   : > { %1606 = vst.msk [vmem:[#allocation3 + $0x48] sm:$0xf] %vm1587_vm7, %v1528_v61  ;;  %v1857_v61 = vld [vmem:[#allocation2 + $0xb1] sm:$0xff] }
 0x25c   : > { %1765 = vrot.lane.b32.xlu1 %v1677_v44, %s3231_s22  ;;  %v1854_v44 = vld [vmem:[#allocation2 + $0x91] sm:$0xff] }
 0x25d   : > { %1769 = vrot.lane.b32.xlu0 %v1679_v43, %s3231_s22 }
 0x25e   : > { %v1520_v27 = vpop.permute.xlu1 %1519 }
 0x25f   : > { %1602 = vst.msk [vmem:[#allocation3 + $0x38] sm:$0xf] %vm1587_vm7, %v1520_v27  ;;  %v1524_v32 = vpop.permute.xlu0 %1523  ;;  %v1860_v27 = vld [vmem:[#allocation2 + $0xd9] sm:$0xff] }
 0x260   : > { %1604 = vst.msk [vmem:[#allocation3 + $0x40] sm:$0xf] %vm1587_vm7, %v1524_v32  ;;  %1761 = vrot.lane.b32.xlu2 %v1675_v58, %s3231_s22 }
 0x262   : > { %v1534_v7 = vpop.permute.xlu2 %1533 }
 0x263   : > { %1609 = vst.msk [vmem:[#allocation3 + $0x54] sm:$0xf] %vm1587_vm7, %v1534_v7 }
 0x264   : > { %1771 = vrot.lane.b32.xlu1 %v1680_v50, %s3231_s22 }
 0x265   : > { %1775 = vrot.lane.b32.xlu0 %v3886_v12, %s3231_s22 }
 0x266   : > { %v1526_v10 = vpop.permute.xlu1 %1525 }
 0x267   : > { %1605 = vst.msk [vmem:[#allocation3 + $0x44] sm:$0xf] %vm1587_vm7, %v1526_v10  ;;  %v1530_v41 = vpop.permute.xlu0 %1529 }
 0x268   : > { %1607 = vst.msk [vmem:[#allocation3 + $0x4c] sm:$0xf] %vm1587_vm7, %v1530_v41  ;;  %1767 = vrot.lane.b32.xlu2 %v1678_v25, %s3231_s22 }
 0x26a   : > { %v1540_v62 = vpop.permute.xlu2 %1539 }
 0x26b   : > { %1612 = vst.msk [vmem:[#allocation3 + $0x60] sm:$0xf] %vm1587_vm7, %v1540_v62  ;;  %v1876_v62 = vld [vmem:[#allocation2 + $0x199] sm:$0xff] }
 0x26c   : > { %1777 = vrot.lane.b32.xlu1 %v1683_v54, %s3231_s22  ;;  %v1869_v54 = vld [vmem:[#allocation2 + $0x141] sm:$0xff] }
 0x26d   : > { %1942 = vrot.lane.b32.xlu0 %v3898_v30, %s3232_s26 }
 0x26e   : > { %v1532_v12 = vpop.permute.xlu1 %1531 }
 0x26f   : > { %1608 = vst.msk [vmem:[#allocation3 + $0x50] sm:$0xf] %vm1587_vm7, %v1532_v12  ;;  %v1536_v1 = vpop.permute.xlu0 %1535  ;;  %v1908_v12 = vpack.c.bf16 %v1876_v62, %v1876_v62 }
 0x270   : > { %1610 = vst.msk [vmem:[#allocation3 + $0x58] sm:$0xf] %vm1587_vm7, %v1536_v1  ;;  %1773 = vrot.lane.b32.xlu2 %v1681_v63, %s3231_s22  ;;  %v1872_v1 = vld [vmem:[#allocation2 + $0x169] sm:$0xff] }
 0x272   : > { %v1546_v8 = vpop.permute.xlu2 %1545 }
 0x273   : > { %1615 = vst.msk [vmem:[#allocation3 + $0x6c] sm:$0xf] %vm1587_vm7, %v1546_v8 }
 0x274   : > { %1944 = vrot.lane.b32.xlu1 %v3882_v52, %s3232_s26  ;;  %v1880_v52 = vpack.c.bf16 %v1848_v22, %v1848_v22 }
 0x275   : > { %1948 = vrot.lane.b32.xlu0 %v3910_v56, %s3232_s26 }
 0x276   : > { %v1538_v30 = vpop.permute.xlu1 %1537 }
 0x277   : > { %1611 = vst.msk [vmem:[#allocation3 + $0x5c] sm:$0xf] %vm1587_vm7, %v1538_v30  ;;  %v1542_v17 = vpop.permute.xlu0 %1541 }
 0x278   : > { %1613 = vst.msk [vmem:[#allocation3 + $0x64] sm:$0xf] %vm1587_vm7, %v1542_v17  ;;  %1779 = vrot.lane.b32.xlu2 %v1684_v14, %s3231_s22  ;;  %v1875_v17 = vld [vmem:[#allocation2 + $0x189] sm:$0xff] }
 0x27a   : > { %v1552_v15 = vpop.permute.xlu2 %1551 }
 0x27b   : > { %1618 = vst.msk [vmem:[#allocation3 + $0x78] sm:$0xf] %vm1587_vm7, %v1552_v15 }
 0x27c   : > { %1950 = vrot.lane.b32.xlu1 %v3894_v24, %s3232_s26  ;;  %v1883_v24 = vpack.c.bf16 %v1851_v36, %v1851_v36 }
 0x27d   : > { %1954 = vrot.lane.b32.xlu0 %v3922_v6, %s3232_s26 }
 0x27e   : > { %v1544_v56 = vpop.permute.xlu1 %1543 }
 0x27f   : > { %1614 = vst.msk [vmem:[#allocation3 + $0x68] sm:$0xf] %vm1587_vm7, %v1544_v56  ;;  %v1548_v28 = vpop.permute.xlu0 %1547  ;;  %v2071_v56 = vld [vmem:[#allocation2 + $0x32] sm:$0xff] }
 0x280   : > { %1616 = vst.msk [vmem:[#allocation3 + $0x70] sm:$0xf] %vm1587_vm7, %v1548_v28  ;;  %1946 = vrot.lane.b32.xlu2 %v1880_v52, %s3232_s26  ;;  %v2103_v36 = vpack.c.bf16 %v2071_v56, %v2071_v56 }
 0x282   : > { %v1720_v38 = vpop.permute.xlu2 %1719 }
 0x283   : > { %1815 = vst.msk [vmem:[#allocation3 + $0x4] sm:$0xf] %vm1813_vm8, %v1720_v38 }
 0x284   : > { %1956 = vrot.lane.b32.xlu1 %v3906_v45, %s3232_s26  ;;  %v1886_v45 = vpack.c.bf16 %v1854_v44, %v1854_v44 }
 0x285   : > { %1960 = vrot.lane.b32.xlu0 %v3934_v49, %s3232_s26 }
 0x286   : > { %v1550_v6 = vpop.permute.xlu1 %1549 }
 0x287   : > { %1617 = vst.msk [vmem:[#allocation3 + $0x74] sm:$0xf] %vm1587_vm7, %v1550_v6  ;;  %v1554_v39 = vpop.permute.xlu0 %1553 }
 0x288   : > { %1619 = vst.msk [vmem:[#allocation3 + $0x7c] sm:$0xf] %vm1587_vm7, %v1554_v39  ;;  %1952 = vrot.lane.b32.xlu2 %v1883_v24, %s3232_s26  ;;  %v2074_v39 = vld [vmem:[#allocation2 + $0x52] sm:$0xff] }
 0x28a   : > { %v1726_v43 = vpop.permute.xlu2 %1725 }
 0x28b   : > { %1818 = vst.msk [vmem:[#allocation3 + $0x10] sm:$0xf] %vm1813_vm8, %v1726_v43 }
 0x28c   : > { %1962 = vrot.lane.b32.xlu1 %v3918_v19, %s3232_s26  ;;  %v1889_v19 = vpack.c.bf16 %v1857_v61, %v1857_v61 }
 0x28d   : > { %1966 = vrot.lane.b32.xlu0 %v3946_v59, %s3232_s26 }
 0x28e   : > { %v1718_v49 = vpop.permute.xlu1 %1717 }
 0x28f   : > { %1814 = vst.msk [vmem:[#allocation3] sm:$0xf] %vm1813_vm8, %v1718_v49  ;;  %v1722_v57 = vpop.permute.xlu0 %1721 }
 0x290   : > { %1816 = vst.msk [vmem:[#allocation3 + $0x8] sm:$0xf] %vm1813_vm8, %v1722_v57  ;;  %1958 = vrot.lane.b32.xlu2 %v1886_v45, %s3232_s26  ;;  %v2077_v57 = vld [vmem:[#allocation2 + $0x7a] sm:$0xff] }
 0x292   : > { %v1732_v58 = vpop.permute.xlu2 %1731 }
 0x293   : > { %1821 = vst.msk [vmem:[#allocation3 + $0x1c] sm:$0xf] %vm1813_vm8, %v1732_v58  ;;  %v2109_v58 = vpack.c.bf16 %v2077_v57, %v2077_v57 }
 0x294   : > { %1968 = vrot.lane.b32.xlu1 %v3930_v34, %s3232_s26  ;;  %v1892_v34 = vpack.c.bf16 %v1860_v27, %v1860_v27  ;;  %v2080_v27 = vld [vmem:[#allocation2 + $0x9a] sm:$0xff] }
 0x295   : > { %1972 = vrot.lane.b32.xlu0 %v3958_v11, %s3232_s26 }
 0x296   : > { %v1724_v59 = vpop.permute.xlu1 %1723 }
 0x297   : > { %1817 = vst.msk [vmem:[#allocation3 + $0xc] sm:$0xf] %vm1813_vm8, %v1724_v59  ;;  %v1728_v33 = vpop.permute.xlu0 %1727 }
 0x298   : > { %1819 = vst.msk [vmem:[#allocation3 + $0x14] sm:$0xf] %vm1813_vm8, %v1728_v33  ;;  %1964 = vrot.lane.b32.xlu2 %v1889_v19, %s3232_s26 }
 0x29a   : > { %v1738_v32 = vpop.permute.xlu2 %1737 }
 0x29b   : > { %1824 = vst.msk [vmem:[#allocation3 + $0x28] sm:$0xf] %vm1813_vm8, %v1738_v32 }
 0x29c   : > { %1974 = vrot.lane.b32.xlu1 %v3942_v51, %s3232_s26  ;;  %v1895_v51 = vpack.c.bf16 %v1863_v23, %v1863_v23 }
 0x29d   : > { %1978 = vrot.lane.b32.xlu0 %v3970_v35, %s3232_s26 }
 0x29e   : > { %v1730_v11 = vpop.permute.xlu1 %1729 }
 0x29f   : > { %1820 = vst.msk [vmem:[#allocation3 + $0x18] sm:$0xf] %vm1813_vm8, %v1730_v11  ;;  %v1734_v50 = vpop.permute.xlu0 %1733 }
 0x2a0   : > { %1822 = vst.msk [vmem:[#allocation3 + $0x20] sm:$0xf] %vm1813_vm8, %v1734_v50  ;;  %1970 = vrot.lane.b32.xlu2 %v1892_v34, %s3232_s26  ;;  %v2112_v34 = vpack.c.bf16 %v2080_v27, %v2080_v27 }
 0x2a2   : > { %v1744_v7 = vpop.permute.xlu2 %1743 }
 0x2a3   : > { %1827 = vst.msk [vmem:[#allocation3 + $0x34] sm:$0xf] %vm1813_vm8, %v1744_v7  ;;  %v2083_v7 = vld [vmem:[#allocation2 + $0xc2] sm:$0xff] }
 0x2a4   : > { %1980 = vrot.lane.b32.xlu1 %v3954_v3, %s3232_s26  ;;  %v1898_v3 = vpack.c.bf16 %v1866_v40, %v1866_v40 }
 0x2a5   : > { %1984 = vrot.lane.b32.xlu0 %v3982_v20, %s3232_s26 }
 0x2a6   : > { %v1736_v35 = vpop.permute.xlu1 %1735 }
 0x2a7   : > { %1823 = vst.msk [vmem:[#allocation3 + $0x24] sm:$0xf] %vm1813_vm8, %v1736_v35  ;;  %v1740_v25 = vpop.permute.xlu0 %1739  ;;  %v2115_v35 = vpack.c.bf16 %v2083_v7, %v2083_v7 }
 0x2a8   : > { %1825 = vst.msk [vmem:[#allocation3 + $0x2c] sm:$0xf] %vm1813_vm8, %v1740_v25  ;;  %1976 = vrot.lane.b32.xlu2 %v1895_v51, %s3232_s26 }
 0x2aa   : > { %v1750_v10 = vpop.permute.xlu2 %1749 }
 0x2ab   : > { %1830 = vst.msk [vmem:[#allocation3 + $0x40] sm:$0xf] %vm1813_vm8, %v1750_v10 }
 0x2ac   : > { %1986 = vrot.lane.b32.xlu1 %v3966_v26, %s3232_s26  ;;  %v1901_v26 = vpack.c.bf16 %v1869_v54, %v1869_v54 }
 0x2ad   : > { %1990 = vrot.lane.b32.xlu0 %v3994_v0, %s3232_s26 }
 0x2ae   : > { %v1742_v20 = vpop.permute.xlu1 %1741 }
 0x2af   : > { %1826 = vst.msk [vmem:[#allocation3 + $0x30] sm:$0xf] %vm1813_vm8, %v1742_v20  ;;  %v1746_v41 = vpop.permute.xlu0 %1745 }
 0x2b0   : > { %1828 = vst.msk [vmem:[#allocation3 + $0x38] sm:$0xf] %vm1813_vm8, %v1746_v41  ;;  %1982 = vrot.lane.b32.xlu2 %v1898_v3, %s3232_s26  ;;  %v2086_v3 = vld [vmem:[#allocation2 + $0xe2] sm:$0xff] }
 0x2b1   : > { %v2118_v41 = vpack.c.bf16 %v2086_v3, %v2086_v3 }
 0x2b2   : > { %v1756_v60 = vpop.permute.xlu2 %1755 }
 0x2b3   : > { %1833 = vst.msk [vmem:[#allocation3 + $0x4c] sm:$0xf] %vm1813_vm8, %v1756_v60 }
 0x2b4   : > { %1992 = vrot.lane.b32.xlu1 %v3978_v5, %s3232_s26  ;;  %v1904_v5 = vpack.c.bf16 %v1872_v1, %v1872_v1 }
 0x2b5   : > { %1996 = vrot.lane.b32.xlu0 %v4004_v29, %s3232_s26  ;;  %v1877_v29 = vld [vmem:[#allocation2 + $0x1a1] sm:$0xff] }
 0x2b6   : > { %v1748_v0 = vpop.permute.xlu1 %1747  ;;  %v1909_v30 = vpack.c.bf16 %v1877_v29, %v1877_v29 }
 0x2b7   : > { %1829 = vst.msk [vmem:[#allocation3 + $0x3c] sm:$0xf] %vm1813_vm8, %v1748_v0  ;;  %v1752_v63 = vpop.permute.xlu0 %1751  ;;  %v2089_v0 = vld [vmem:[#allocation2 + $0x10a] sm:$0xff] }
 0x2b8   : > { %1831 = vst.msk [vmem:[#allocation3 + $0x44] sm:$0xf] %vm1813_vm8, %v1752_v63  ;;  %1988 = vrot.lane.b32.xlu2 %v1901_v26, %s3232_s26  ;;  %v2121_v63 = vpack.c.bf16 %v2089_v0, %v2089_v0 }
 0x2ba   : > { %v1762_v2 = vpop.permute.xlu2 %1761 }
 0x2bb   : > { %1836 = vst.msk [vmem:[#allocation3 + $0x58] sm:$0xf] %vm1813_vm8, %v1762_v2 }
 0x2bc   : > { %1998 = vrot.lane.b32.xlu1 %v3990_v21, %s3232_s26  ;;  %v1907_v21 = vpack.c.bf16 %v1875_v17, %v1875_v17 }
 0x2bd   : > { %2002 = vrot.lane.b32.xlu0 %v1908_v12, %s3232_s26 }
 0x2be   : > { %v1754_v8 = vpop.permute.xlu1 %1753 }
 0x2bf   : > { %1832 = vst.msk [vmem:[#allocation3 + $0x48] sm:$0xf] %vm1813_vm8, %v1754_v8  ;;  %v1758_v14 = vpop.permute.xlu0 %1757 }
 0x2c0   : > { %1834 = vst.msk [vmem:[#allocation3 + $0x50] sm:$0xf] %vm1813_vm8, %v1758_v14  ;;  %1994 = vrot.lane.b32.xlu2 %v1904_v5, %s3232_s26  ;;  %v2092_v5 = vld [vmem:[#allocation2 + $0x12a] sm:$0xff] }
 0x2c1   : > { %v2124_v8 = vpack.c.bf16 %v2092_v5, %v2092_v5 }
 0x2c2   : > { %v1768_v22 = vpop.permute.xlu2 %1767 }
 0x2c3   : > { %1839 = vst.msk [vmem:[#allocation3 + $0x64] sm:$0xf] %vm1813_vm8, %v1768_v22  ;;  %v2095_v22 = vld [vmem:[#allocation2 + $0x152] sm:$0xff] }
 0x2c4   : > { %2004 = vrot.lane.b32.xlu1 %v1909_v30, %s3232_s26 }
 0x2c5   : > { %2169 = vrot.lane.b32.xlu0 %v4022_v42, %s3233_s23  ;;  %v2076_v42 = vld [vmem:[#allocation2 + $0x6a] sm:$0xff] }
 0x2c6   : > { %v1760_v15 = vpop.permute.xlu1 %1759  ;;  %v2108_v6 = vpack.c.bf16 %v2076_v42, %v2076_v42 }
 0x2c7   : > { %1835 = vst.msk [vmem:[#allocation3 + $0x54] sm:$0xf] %vm1813_vm8, %v1760_v15  ;;  %v1764_v52 = vpop.permute.xlu0 %1763  ;;  %v2127_v15 = vpack.c.bf16 %v2095_v22, %v2095_v22 }
 0x2c8   : > { %1837 = vst.msk [vmem:[#allocation3 + $0x5c] sm:$0xf] %vm1813_vm8, %v1764_v52  ;;  %2000 = vrot.lane.b32.xlu2 %v1907_v21, %s3232_s26  ;;  %v2102_v52 = vld [vmem:[#allocation2 + $0x1a2] sm:$0xff] }
 0x2ca   : > { %v1774_v28 = vpop.permute.xlu2 %1773 }
 0x2cb   : > { %1842 = vst.msk [vmem:[#allocation3 + $0x70] sm:$0xf] %vm1813_vm8, %v1774_v28  ;;  %v2134_v28 = vpack.c.bf16 %v2102_v52, %v2102_v52 }
 0x2cc   : > { %2171 = vrot.lane.b32.xlu1 %v4011_v9, %s3233_s23  ;;  %v2106_v9 = vpack.c.bf16 %v2074_v39, %v2074_v39 }
 0x2cd   : > { %2175 = vrot.lane.b32.xlu0 %v4032_v47, %s3233_s23  ;;  %v2079_v47 = vld [vmem:[#allocation2 + $0x92] sm:$0xff] }
 0x2ce   : > { %v1766_v38 = vpop.permute.xlu1 %1765  ;;  %v2111_v49 = vpack.c.bf16 %v2079_v47, %v2079_v47 }
 0x2cf   : > { %1838 = vst.msk [vmem:[#allocation3 + $0x60] sm:$0xf] %vm1813_vm8, %v1766_v38  ;;  %v1770_v24 = vpop.permute.xlu0 %1769  ;;  %v2101_v38 = vld [vmem:[#allocation2 + $0x19a] sm:$0xff] }
 0x2d0   : > { %1840 = vst.msk [vmem:[#allocation3 + $0x68] sm:$0xf] %vm1813_vm8, %v1770_v24  ;;  %2167 = vrot.lane.b32.xlu2 %v2103_v36, %s3233_s23 }
 0x2d2   : > { %v1780_v44 = vpop.permute.xlu2 %1779 }
 0x2d3   : > { %1845 = vst.msk [vmem:[#allocation3 + $0x7c] sm:$0xf] %vm1813_vm8, %v1780_v44 }
 0x2d4   : > { %2177 = vrot.lane.b32.xlu1 %v2108_v6, %s3233_s23  ;;  %v2133_v6 = vpack.c.bf16 %v2101_v38, %v2101_v38 }
 0x2d5   : > { %2181 = vrot.lane.b32.xlu0 %v4042_v53, %s3233_s23  ;;  %v2082_v53 = vld [vmem:[#allocation2 + $0xb2] sm:$0xff] }
 0x2d6   : > { %v1772_v43 = vpop.permute.xlu1 %1771  ;;  %v2114_v33 = vpack.c.bf16 %v2082_v53, %v2082_v53 }
 0x2d7   : > { %1841 = vst.msk [vmem:[#allocation3 + $0x6c] sm:$0xf] %vm1813_vm8, %v1772_v43  ;;  %v1776_v45 = vpop.permute.xlu0 %1775 }
 0x2d8   : > { %1843 = vst.msk [vmem:[#allocation3 + $0x74] sm:$0xf] %vm1813_vm8, %v1776_v45  ;;  %2173 = vrot.lane.b32.xlu2 %v2106_v9, %s3233_s23 }
 0x2da   : > { %v1947_v61 = vpop.permute.xlu2 %1946 }
 0x2db   : > { %2041 = vst.msk [vmem:[#allocation3 + $0x8] sm:$0xf] %vm2038_vm9, %v1947_v61 }
 0x2dc   : > { %2183 = vrot.lane.b32.xlu1 %v2111_v49, %s3233_s23 }
 0x2dd   : > { %2187 = vrot.lane.b32.xlu0 %v4052_v55, %s3233_s23  ;;  %v2085_v55 = vld [vmem:[#allocation2 + $0xda] sm:$0xff] }
 0x2de   : > { %v1778_v19 = vpop.permute.xlu1 %1777  ;;  %v2117_v23 = vpack.c.bf16 %v2085_v55, %v2085_v55 }
 0x2df   : > { %1844 = vst.msk [vmem:[#allocation3 + $0x78] sm:$0xf] %vm1813_vm8, %v1778_v19  ;;  %v1943_v59 = vpop.permute.xlu0 %1942 }
 0x2e0   : > { %2039 = vst.msk [vmem:[#allocation3] sm:$0xf] %vm2038_vm9, %v1943_v59  ;;  %2179 = vrot.lane.b32.xlu2 %v2109_v58, %s3233_s23 }
 0x2e2   : > { %v1953_v32 = vpop.permute.xlu2 %1952 }
 0x2e3   : > { %2044 = vst.msk [vmem:[#allocation3 + $0x14] sm:$0xf] %vm2038_vm9, %v1953_v32 }
 0x2e4   : > { %2189 = vrot.lane.b32.xlu1 %v2114_v33, %s3233_s23 }
 0x2e5   : > { %2193 = vrot.lane.b32.xlu0 %v4062_v13, %s3233_s23  ;;  %v2088_v13 = vld [vmem:[#allocation2 + $0xfa] sm:$0xff] }
 0x2e6   : > { %v1945_v11 = vpop.permute.xlu1 %1944  ;;  %v2120_v10 = vpack.c.bf16 %v2088_v13, %v2088_v13 }
 0x2e7   : > { %2040 = vst.msk [vmem:[#allocation3 + $0x4] sm:$0xf] %vm2038_vm9, %v1945_v11  ;;  %v1949_v50 = vpop.permute.xlu0 %1948 }
 0x2e8   : > { %2042 = vst.msk [vmem:[#allocation3 + $0xc] sm:$0xf] %vm2038_vm9, %v1949_v50  ;;  %2185 = vrot.lane.b32.xlu2 %v2112_v34, %s3233_s23 }
 0x2ea   : > { %v1959_v51 = vpop.permute.xlu2 %1958 }
 0x2eb   : > { %2047 = vst.msk [vmem:[#allocation3 + $0x20] sm:$0xf] %vm2038_vm9, %v1959_v51 }
 0x2ec   : > { %2195 = vrot.lane.b32.xlu1 %v2117_v23, %s3233_s23 }
 0x2ed   : > { %2199 = vrot.lane.b32.xlu0 %v4072_v31, %s3233_s23  ;;  %v2091_v31 = vld [vmem:[#allocation2 + $0x122] sm:$0xff] }
 0x2ee   : > { %v1951_v25 = vpop.permute.xlu1 %1950  ;;  %v2123_v26 = vpack.c.bf16 %v2091_v31, %v2091_v31 }
 0x2ef   : > { %2043 = vst.msk [vmem:[#allocation3 + $0x10] sm:$0xf] %vm2038_vm9, %v1951_v25  ;;  %v1955_v40 = vpop.permute.xlu0 %1954 }
 0x2f0   : > { %2045 = vst.msk [vmem:[#allocation3 + $0x18] sm:$0xf] %vm2038_vm9, %v1955_v40  ;;  %2191 = vrot.lane.b32.xlu2 %v2115_v35, %s3233_s23 }
 0x2f2   : > { %v1965_v20 = vpop.permute.xlu2 %1964 }
 0x2f3   : > { %2050 = vst.msk [vmem:[#allocation3 + $0x2c] sm:$0xf] %vm2038_vm9, %v1965_v20 }
 0x2f4   : > { %2201 = vrot.lane.b32.xlu1 %v2120_v10, %s3233_s23 }
 0x2f5   : > { %2205 = vrot.lane.b32.xlu0 %v4082_v4, %s3233_s23  ;;  %v2094_v4 = vld [vmem:[#allocation2 + $0x142] sm:$0xff] }
 0x2f6   : > { %v1957_v54 = vpop.permute.xlu1 %1956  ;;  %v2126_v2 = vpack.c.bf16 %v2094_v4, %v2094_v4 }
 0x2f7   : > { %2046 = vst.msk [vmem:[#allocation3 + $0x1c] sm:$0xf] %vm2038_vm9, %v1957_v54  ;;  %v1961_v60 = vpop.permute.xlu0 %1960 }
 0x2f8   : > { %2048 = vst.msk [vmem:[#allocation3 + $0x24] sm:$0xf] %vm2038_vm9, %v1961_v60  ;;  %2197 = vrot.lane.b32.xlu2 %v2118_v41, %s3233_s23 }
 0x2fa   : > { %v1971_v62 = vpop.permute.xlu2 %1970 }
 0x2fb   : > { %2053 = vst.msk [vmem:[#allocation3 + $0x38] sm:$0xf] %vm2038_vm9, %v1971_v62 }
 0x2fc   : > { %2207 = vrot.lane.b32.xlu1 %v2123_v26, %s3233_s23 }
 0x2fd   : > { %2211 = vrot.lane.b32.xlu0 %v4092_v46, %s3233_s23  ;;  %v2097_v46 = vld [vmem:[#allocation2 + $0x16a] sm:$0xff] }
 0x2fe   : > { %v1963_v12 = vpop.permute.xlu1 %1962  ;;  %v2129_v17 = vpack.c.bf16 %v2097_v46, %v2097_v46 }
 0x2ff   : > { %2049 = vst.msk [vmem:[#allocation3 + $0x28] sm:$0xf] %vm2038_vm9, %v1963_v12  ;;  %v1967_v1 = vpop.permute.xlu0 %1966 }
 0x300   : > { %2051 = vst.msk [vmem:[#allocation3 + $0x30] sm:$0xf] %vm2038_vm9, %v1967_v1  ;;  %2203 = vrot.lane.b32.xlu2 %v2121_v63, %s3233_s23 }
 0x302   : > { %v1977_v29 = vpop.permute.xlu2 %1976 }
 0x303   : > { %2056 = vst.msk [vmem:[#allocation3 + $0x44] sm:$0xf] %vm2038_vm9, %v1977_v29 }
 0x304   : > { %2213 = vrot.lane.b32.xlu1 %v2126_v2, %s3233_s23 }
 0x305   : > { %2217 = vrot.lane.b32.xlu0 %v4107_v37, %s3233_s23 }
 0x306   : > { %v1969_v14 = vpop.permute.xlu1 %1968 }
 0x307   : > { %2052 = vst.msk [vmem:[#allocation3 + $0x34] sm:$0xf] %vm2038_vm9, %v1969_v14  ;;  %v1973_v30 = vpop.permute.xlu0 %1972 }
 0x308   : > { %2054 = vst.msk [vmem:[#allocation3 + $0x3c] sm:$0xf] %vm2038_vm9, %v1973_v30  ;;  %2209 = vrot.lane.b32.xlu2 %v2124_v8, %s3233_s23 }
 0x30a   : > { %v1983_v21 = vpop.permute.xlu2 %1982 }
 0x30b   : > { %2059 = vst.msk [vmem:[#allocation3 + $0x50] sm:$0xf] %vm2038_vm9, %v1983_v21 }
 0x30c   : > { %2219 = vrot.lane.b32.xlu1 %v2129_v17, %s3233_s23 }
 0x30d   : > { %2223 = vrot.lane.b32.xlu0 %v4117_v16, %s3233_s23 }
 0x30e   : > { %v1975_v37 = vpop.permute.xlu1 %1974 }
 0x30f   : > { %2055 = vst.msk [vmem:[#allocation3 + $0x40] sm:$0xf] %vm2038_vm9, %v1975_v37  ;;  %v1979_v56 = vpop.permute.xlu0 %1978 }
 0x310   : > { %2057 = vst.msk [vmem:[#allocation3 + $0x48] sm:$0xf] %vm2038_vm9, %v1979_v56  ;;  %2215 = vrot.lane.b32.xlu2 %v2127_v15, %s3233_s23 }
 0x312   : > { %v1989_v36 = vpop.permute.xlu2 %1988 }
 0x313   : > { %2062 = vst.msk [vmem:[#allocation3 + $0x5c] sm:$0xf] %vm2038_vm9, %v1989_v36 }
 0x314   : > { %2225 = vrot.lane.b32.xlu1 %v4102_v48, %s3233_s23 }
 0x315   : > { %2229 = vrot.lane.b32.xlu0 %v2134_v28, %s3233_s23 }
 0x316   : > { %v1981_v42 = vpop.permute.xlu1 %1980 }
 0x317   : > { %2058 = vst.msk [vmem:[#allocation3 + $0x4c] sm:$0xf] %vm2038_vm9, %v1981_v42  ;;  %v1985_v16 = vpop.permute.xlu0 %1984 }
 0x318   : > { %2060 = vst.msk [vmem:[#allocation3 + $0x54] sm:$0xf] %vm2038_vm9, %v1985_v16  ;;  %2221 = vrot.lane.b32.xlu2 %v4098_v18, %s3233_s23 }
 0x31a   : > { %v1995_v24 = vpop.permute.xlu2 %1994 }
 0x31b   : > { %2065 = vst.msk [vmem:[#allocation3 + $0x68] sm:$0xf] %vm2038_vm9, %v1995_v24 }
 0x31e   : > { %v1987_v39 = vpop.permute.xlu1 %1986 }
 0x31f   : > { %2061 = vst.msk [vmem:[#allocation3 + $0x58] sm:$0xf] %vm2038_vm9, %v1987_v39  ;;  %v1991_v48 = vpop.permute.xlu0 %1990 }
 0x320   : > { %2063 = vst.msk [vmem:[#allocation3 + $0x60] sm:$0xf] %vm2038_vm9, %v1991_v48  ;;  %2227 = vrot.lane.b32.xlu2 %v2133_v6, %s3233_s23 }
 0x322   : > { %v2001_v44 = vpop.permute.xlu2 %2000 }
 0x323   : > { %2068 = vst.msk [vmem:[#allocation3 + $0x74] sm:$0xf] %vm2038_vm9, %v2001_v44 }
 0x326   : > { %v1993_v9 = vpop.permute.xlu1 %1992 }
 0x327   : > { %2064 = vst.msk [vmem:[#allocation3 + $0x64] sm:$0xf] %vm2038_vm9, %v1993_v9  ;;  %v1997_v18 = vpop.permute.xlu0 %1996 }
 0x328   : > { %2066 = vst.msk [vmem:[#allocation3 + $0x6c] sm:$0xf] %vm2038_vm9, %v1997_v18 }
 0x32a   : > { %v2168_v47 = vpop.permute.xlu2 %2167 }
 0x32b   : > { %2264 = vst.msk [vmem:[#allocation3] sm:$0xf] %vm2263_vm10, %v2168_v47 }
 0x32e   : > { %v1999_v43 = vpop.permute.xlu1 %1998 }
 0x32f   : > { %2067 = vst.msk [vmem:[#allocation3 + $0x70] sm:$0xf] %vm2038_vm9, %v1999_v43  ;;  %v2003_v45 = vpop.permute.xlu0 %2002 }
 0x330   : > { %2069 = vst.msk [vmem:[#allocation3 + $0x78] sm:$0xf] %vm2038_vm9, %v2003_v45 }
 0x332   : > { %v2174_v49 = vpop.permute.xlu2 %2173 }
 0x333   : > { %2267 = vst.msk [vmem:[#allocation3 + $0xc] sm:$0xf] %vm2263_vm10, %v2174_v49 }
 0x336   : > { %v2005_v57 = vpop.permute.xlu1 %2004 }
 0x337   : > { %2070 = vst.msk [vmem:[#allocation3 + $0x7c] sm:$0xf] %vm2038_vm9, %v2005_v57  ;;  %v2170_v61 = vpop.permute.xlu0 %2169 }
 0x338   : > { %2265 = vst.msk [vmem:[#allocation3 + $0x4] sm:$0xf] %vm2263_vm10, %v2170_v61 }
 0x33a   : > { %v2180_v58 = vpop.permute.xlu2 %2179 }
 0x33b   : > { %2270 = vst.msk [vmem:[#allocation3 + $0x18] sm:$0xf] %vm2263_vm10, %v2180_v58 }
 0x33e   : > { %v2172_v53 = vpop.permute.xlu1 %2171 }
 0x33f   : > { %2266 = vst.msk [vmem:[#allocation3 + $0x8] sm:$0xf] %vm2263_vm10, %v2172_v53  ;;  %v2176_v19 = vpop.permute.xlu0 %2175 }
 0x340   : > { %2268 = vst.msk [vmem:[#allocation3 + $0x10] sm:$0xf] %vm2263_vm10, %v2176_v19 }
 0x342   : > { %v2186_v59 = vpop.permute.xlu2 %2185 }
 0x343   : > { %2273 = vst.msk [vmem:[#allocation3 + $0x24] sm:$0xf] %vm2263_vm10, %v2186_v59 }
 0x346   : > { %v2178_v33 = vpop.permute.xlu1 %2177 }
 0x347   : > { %2269 = vst.msk [vmem:[#allocation3 + $0x14] sm:$0xf] %vm2263_vm10, %v2178_v33  ;;  %v2182_v27 = vpop.permute.xlu0 %2181 }
 0x348   : > { %2271 = vst.msk [vmem:[#allocation3 + $0x1c] sm:$0xf] %vm2263_vm10, %v2182_v27 }
 0x34a   : > { %v2192_v32 = vpop.permute.xlu2 %2191 }
 0x34b   : > { %2276 = vst.msk [vmem:[#allocation3 + $0x30] sm:$0xf] %vm2263_vm10, %v2192_v32 }
 0x34e   : > { %v2184_v34 = vpop.permute.xlu1 %2183 }
 0x34f   : > { %2272 = vst.msk [vmem:[#allocation3 + $0x20] sm:$0xf] %vm2263_vm10, %v2184_v34  ;;  %v2188_v55 = vpop.permute.xlu0 %2187 }
 0x350   : > { %2274 = vst.msk [vmem:[#allocation3 + $0x28] sm:$0xf] %vm2263_vm10, %v2188_v55 }
 0x352   : > { %v2198_v11 = vpop.permute.xlu2 %2197 }
 0x353   : > { %2279 = vst.msk [vmem:[#allocation3 + $0x3c] sm:$0xf] %vm2263_vm10, %v2198_v11 }
 0x356   : > { %v2190_v50 = vpop.permute.xlu1 %2189 }
 0x357   : > { %2275 = vst.msk [vmem:[#allocation3 + $0x2c] sm:$0xf] %vm2263_vm10, %v2190_v50  ;;  %v2194_v23 = vpop.permute.xlu0 %2193 }
 0x358   : > { %2277 = vst.msk [vmem:[#allocation3 + $0x34] sm:$0xf] %vm2263_vm10, %v2194_v23 }
 0x35a   : > { %v2204_v7 = vpop.permute.xlu2 %2203 }
 0x35b   : > { %2282 = vst.msk [vmem:[#allocation3 + $0x48] sm:$0xf] %vm2263_vm10, %v2204_v7 }
 0x35e   : > { %v2196_v51 = vpop.permute.xlu1 %2195 }
 0x35f   : > { %2278 = vst.msk [vmem:[#allocation3 + $0x38] sm:$0xf] %vm2263_vm10, %v2196_v51  ;;  %v2200_v35 = vpop.permute.xlu0 %2199 }
 0x360   : > { %2280 = vst.msk [vmem:[#allocation3 + $0x40] sm:$0xf] %vm2263_vm10, %v2200_v35 }
 0x362   : > { %v2210_v13 = vpop.permute.xlu2 %2209 }
 0x363   : > { %2285 = vst.msk [vmem:[#allocation3 + $0x54] sm:$0xf] %vm2263_vm10, %v2210_v13 }
 0x366   : > { %v2202_v25 = vpop.permute.xlu1 %2201 }
 0x367   : > { %2281 = vst.msk [vmem:[#allocation3 + $0x44] sm:$0xf] %vm2263_vm10, %v2202_v25  ;;  %v2206_v40 = vpop.permute.xlu0 %2205 }
 0x368   : > { %2283 = vst.msk [vmem:[#allocation3 + $0x4c] sm:$0xf] %vm2263_vm10, %v2206_v40 }
 0x36a   : > { %v2216_v10 = vpop.permute.xlu2 %2215 }
 0x36b   : > { %2288 = vst.msk [vmem:[#allocation3 + $0x60] sm:$0xf] %vm2263_vm10, %v2216_v10 }
 0x36e   : > { %v2208_v3 = vpop.permute.xlu1 %2207 }
 0x36f   : > { %2284 = vst.msk [vmem:[#allocation3 + $0x50] sm:$0xf] %vm2263_vm10, %v2208_v3  ;;  %v2212_v20 = vpop.permute.xlu0 %2211 }
 0x370   : > { %2286 = vst.msk [vmem:[#allocation3 + $0x58] sm:$0xf] %vm2263_vm10, %v2212_v20 }
 0x372   : > { %v2222_v41 = vpop.permute.xlu2 %2221 }
 0x373   : > { %2291 = vst.msk [vmem:[#allocation3 + $0x6c] sm:$0xf] %vm2263_vm10, %v2222_v41 }
 0x376   : > { %v2214_v31 = vpop.permute.xlu1 %2213 }
 0x377   : > { %2287 = vst.msk [vmem:[#allocation3 + $0x5c] sm:$0xf] %vm2263_vm10, %v2214_v31  ;;  %v2218_v54 = vpop.permute.xlu0 %2217 }
 0x378   : > { %2289 = vst.msk [vmem:[#allocation3 + $0x64] sm:$0xf] %vm2263_vm10, %v2218_v54 }
 0x37a   : > { %v2228_v60 = vpop.permute.xlu2 %2227 }
 0x37b   : > { %2294 = vst.msk [vmem:[#allocation3 + $0x78] sm:$0xf] %vm2263_vm10, %v2228_v60 }
 0x37e   : > { %v2220_v26 = vpop.permute.xlu1 %2219 }
 0x37f   : > { %2290 = vst.msk [vmem:[#allocation3 + $0x68] sm:$0xf] %vm2263_vm10, %v2220_v26  ;;  %v2224_v0 = vpop.permute.xlu0 %2223 }
 0x380   : > { %2292 = vst.msk [vmem:[#allocation3 + $0x70] sm:$0xf] %vm2263_vm10, %v2224_v0 }
 0x386   : > { %v2226_v62 = vpop.permute.xlu1 %2225 }
 0x387   : > { %2293 = vst.msk [vmem:[#allocation3 + $0x74] sm:$0xf] %vm2263_vm10, %v2226_v62  ;;  %v2230_v63 = vpop.permute.xlu0 %2229 }
 0x388   : > { %2295 = vst.msk [vmem:[#allocation3 + $0x7c] sm:$0xf] %vm2263_vm10, %v2230_v63 }
 0x389 PF: > { %v2869_v4 = vld [vmem:[%s3377_s25 + $0x8] sm:$0xf]  ;;  %v2909_v12 = vld [vmem:[%s3377_s25 + $0x8] sm:$0x30]  ;;  %vm2476_vm11 = vcmask 1044480   ;;  %vm2477_vm12 = vcmask 1045504  }
 0x38a   : > { %v2870_v1 = vor.u32 %v2909_v12, %v2869_v4  ;;  %v3234_v2 = vmov 65535   ;;  %v2908_v46 = vld [vmem:[%s3377_s25] sm:$0xff]  ;;  %vm2427_vm13 = vcmask 220160   ;;  %v2893_v21 = vld [vmem:[#allocation3 + $0x8] sm:$0xff]  ;;  %v2895_v16 = vld [vmem:[#allocation3 + $0x18] sm:$0xff]  ;;  %s3011_s10 = smul.u32 160, %s3211_s18 }
 0x38b   : > { %v2478_v5 = vsel %vm2476_vm11, 4294967295, %v3234_v2  ;;  %v2892_v14 = vld [vmem:[#allocation3] sm:$0xff]  ;;  %v2897_v15 = vld [vmem:[#allocation3 + $0x28] sm:$0xff]  ;;  %v2894_v56 = vld [vmem:[#allocation3 + $0x10] sm:$0xff]  ;;  %s2682_s5 = sshll.u32 %s3379_s28, 4  ;;  %s2669_s11 = scalar_lea.sflag [#allocation6], %s261_s29  ;;  %s2683_s5 = int_to_ptr.vmem [resolvable:$true] %s2682_s5 }
 0x38c   : > { %v2479_v29 = vsel %vm2477_vm12, %v2478_v5, 0  ;;  %v2896_v30 = vld [vmem:[#allocation3 + $0x20] sm:$0xff]  ;;  %v2901_v37 = vld [vmem:[#allocation3 + $0x48] sm:$0xff]  ;;  %v2898_v28 = vld [vmem:[#allocation3 + $0x30] sm:$0xff]  ;;  %s3133_s27 = scalar_lea.hbm %s4515_s3, 1280 }
 0x38d   : > { %v2481_v8 = vand.u32 %v2870_v1, %v2479_v29  ;;  %v2900_v17 = vld [vmem:[#allocation3 + $0x40] sm:$0xff]  ;;  %v2905_v52 = vld [vmem:[#allocation3 + $0x68] sm:$0xff]  ;;  %v2902_v36 = vld [vmem:[#allocation3 + $0x50] sm:$0xff] }
 0x38e   : > { %v2904_v22 = vld [vmem:[#allocation3 + $0x60] sm:$0xff]  ;;  %v2906_v42 = vld [vmem:[#allocation3 + $0x70] sm:$0xff]  ;;  %v2899_v38 = vld [vmem:[#allocation3 + $0x38] sm:$0xff] }
 0x38f   : > { %2489 = vmatpush.bf16.msra.mxu0 %v2481_v8  ;;  %3005 = vmatpush.bf16.msra.mxu1 %v2481_v8  ;;  %v2903_v24 = vld [vmem:[#allocation3 + $0x58] sm:$0xff]  ;;  %v4410_v44 = vld [vmem:[%s271_s15] ss:$0 sm:$0xff]  ;;  %s2679_s15 = sadd.s32 %s3207_s17, %s3011_s10 }
 0x390   : > { %3006 = vmatpush.bf16.msra.mxu2 %v2481_v8  ;;  %3007 = vmatpush.bf16.msra.mxu3 %v2481_v8  ;;  %v2907_v6 = vld [vmem:[#allocation3 + $0x78] sm:$0xff]  ;;  %s2888_s18 = sshll.u32 %s2679_s15, 2 }
 0x391   : > { %s2681_s17 = scalar_lea.hbm %s4515_s3, %s2888_s18 }
 0x392   : > { %s2684_s9 = sshll.u32 %s2681_s17, 4  ;;  %s2685_s9 = int_to_ptr.hbm [resolvable:$true] %s2684_s9 }
 0x393   : > { %2490 = vmatpush.bf16.msra.mxu0 %v2908_v46  ;;  %3008 = vmatpush.bf16.msra.mxu1 %v2908_v46  ;;  %s3127_s22 = sshra.s32 %s2685_s9, 4  ;;  %s3128_s22 = int_to_ptr.hbm [resolvable:$true] %s3127_s22 }
 0x394   : > { %3009 = vmatpush.bf16.msra.mxu2 %v2908_v46  ;;  %3010 = vmatpush.bf16.msra.mxu3 %v2908_v46  ;;  %s3129_s26 = scalar_lea.hbm %s3128_s22, 128  ;;  %p3134_p9 = scmp.lt.s32.totalorder %s3128_s22, %s4515_s3 }
 0x395   : > { %p3130_p6 = scmp.ne.s32.totalorder %s3128_s22, %s3129_s26  ;;  %p3135_p11 = scmp.lt.s32.totalorder %s3133_s27, %s3129_s26 }
 0x396   : > { %2871 = vmatmul.msk.bf16.vlgmr.msra.gmra.mxu0 %vm2427_vm13, %v2892_v14  ;;  %2875 = vmatmul.msk.bf16.vlgmr.msra.gmra.mxu1 %vm2427_vm13, %v2896_v30 }
 0x397   : > { %2879 = vmatmul.msk.bf16.vlgmr.msra.gmra.mxu2 %vm2427_vm13, %v2900_v17  ;;  %2883 = vmatmul.msk.bf16.vlgmr.msra.gmra.mxu3 %vm2427_vm13, %v2904_v22  ;;  %p3131_p7 = pnand %p3130_p6, %p3337_p10  ;;  %p3136_p13 = por %p3135_p11, %p3134_p9 }
 0x399   : > { %p3132_p8 = pneg %p3131_p7 }
 0x39b   : > { %p3137_p0 = pnand %p3136_p13, %p3132_p8 }
 0x3a6   : > { %2872 = vmatmul.msk.bf16.gmra.mxu0 %vm2427_vm13, %v2893_v21  ;;  %2876 = vmatmul.msk.bf16.gmra.mxu1 %vm2427_vm13, %v2897_v15 }
 0x3a7   : > { %2880 = vmatmul.msk.bf16.gmra.mxu2 %vm2427_vm13, %v2901_v37  ;;  %2884 = vmatmul.msk.bf16.gmra.mxu3 %vm2427_vm13, %v2905_v52 }
 0x3b6   : > { %2873 = vmatmul.msk.bf16.gmra.mxu0 %vm2427_vm13, %v2894_v56  ;;  %2877 = vmatmul.msk.bf16.gmra.mxu1 %vm2427_vm13, %v2898_v28 }
 0x3b7   : > { %2881 = vmatmul.msk.bf16.gmra.mxu2 %vm2427_vm13, %v2902_v36  ;;  %2885 = vmatmul.msk.bf16.gmra.mxu3 %vm2427_vm13, %v2906_v42 }
 0x3c6   : > { %2874 = vmatmul.msk.bf16.gmra.mxu0 %vm2427_vm13, %v2895_v16  ;;  %2878 = vmatmul.msk.bf16.gmra.mxu1 %vm2427_vm13, %v2899_v38 }
 0x3c7   : > { %2882 = vmatmul.msk.bf16.gmra.mxu2 %vm2427_vm13, %v2903_v24  ;;  %2886 = vmatmul.msk.bf16.gmra.mxu3 %vm2427_vm13, %v2907_v6 }
 0x413   : > { %v2492_v39 = vpop.f32.mrf.mxu0  ;;  %v2512_v48 = vpop.f32.mrf.mxu1 }
 0x414   : > { %v2493_v9 = vadd.f32 %v4410_v44, %v2492_v39  ;;  %v2513_v18 = vadd.f32 %v4410_v44, %v2512_v48 }
 0x416   : > { %v2572_v58 = vmax.f32 %v2493_v9, 0.0  ;;  %v2580_v53 = vmax.f32 %v2513_v18, 0.0 }
 0x41a   : > { %v2532_v47 = vpop.f32.mrf.mxu2  ;;  %v2552_v43 = vpop.f32.mrf.mxu3 }
 0x41b   : > { %v2494_v45 = vpop.f32.mrf.mxu0  ;;  %v2514_v49 = vpop.f32.mrf.mxu1  ;;  %v2533_v32 = vadd.f32 %v4410_v44, %v2532_v47  ;;  %v2553_v34 = vadd.f32 %v4410_v44, %v2552_v43 }
 0x41c   : > { %v2495_v57 = vadd.f32 %v4410_v44, %v2494_v45  ;;  %v2515_v61 = vadd.f32 %v4410_v44, %v2514_v49 }
 0x41d   : > { %v2588_v35 = vmax.f32 %v2533_v32, 0.0  ;;  %v2596_v13 = vmax.f32 %v2553_v34, 0.0 }
 0x41e   : > { %v2573_v19 = vmax.f32 %v2495_v57, 0.0  ;;  %v2581_v59 = vmax.f32 %v2515_v61, 0.0 }
 0x420   : > { %v2913_v33 = vpack.c.bf16 %v2573_v19, %v2572_v58  ;;  %v2933_v27 = vpack.c.bf16 %v2581_v59, %v2580_v53 }
 0x422   : > { %2914 = vst [vmem:[%s3379_s28] sm:$0xff] %v2913_v33   ;;  %v2534_v55 = vpop.f32.mrf.mxu2  ;;  %v2554_v11 = vpop.f32.mrf.mxu3 }
 0x423   : > { %2993 = vst [vmem:[%s3379_s28 + $0x20] sm:$0xff] %v2933_v27   ;;  %v2535_v50 = vadd.f32 %v4410_v44, %v2534_v55  ;;  %v2555_v23 = vadd.f32 %v4410_v44, %v2554_v11  ;;  %v2497_v7 = vpop.f32.mrf.mxu0  ;;  %v2517_v51 = vpop.f32.mrf.mxu1 }
 0x424   : > { %v2498_v20 = vadd.f32 %v4410_v44, %v2497_v7  ;;  %v2518_v41 = vadd.f32 %v4410_v44, %v2517_v51 }
 0x425   : > { %v2589_v25 = vmax.f32 %v2535_v50, 0.0  ;;  %v2597_v40 = vmax.f32 %v2555_v23, 0.0 }
 0x426   : > { %v2574_v63 = vmax.f32 %v2498_v20, 0.0  ;;  %v2582_v4 = vmax.f32 %v2518_v41, 0.0 }
 0x427   : > { %v2953_v10 = vpack.c.bf16 %v2589_v25, %v2588_v35  ;;  %v2973_v3 = vpack.c.bf16 %v2597_v40, %v2596_v13 }
 0x429   : > { %2997 = vst [vmem:[%s3379_s28 + $0x40] sm:$0xff] %v2953_v10  }
 0x42a   : > { %3001 = vst [vmem:[%s3379_s28 + $0x60] sm:$0xff] %v2973_v3   ;;  %v2537_v31 = vpop.f32.mrf.mxu2  ;;  %v2557_v54 = vpop.f32.mrf.mxu3 }
 0x42b   : > { %v2499_v60 = vpop.f32.mrf.mxu0  ;;  %v2519_v26 = vpop.f32.mrf.mxu1  ;;  %v2538_v29 = vadd.f32 %v4410_v44, %v2537_v31  ;;  %v2558_v8 = vadd.f32 %v4410_v44, %v2557_v54 }
 0x42c   : > { %v2500_v0 = vadd.f32 %v4410_v44, %v2499_v60  ;;  %v2520_v62 = vadd.f32 %v4410_v44, %v2519_v26 }
 0x42d   : > { %v2590_v15 = vmax.f32 %v2538_v29, 0.0  ;;  %v2598_v37 = vmax.f32 %v2558_v8, 0.0 }
 0x42e   : > { %v2575_v12 = vmax.f32 %v2500_v0, 0.0  ;;  %v2583_v1 = vmax.f32 %v2520_v62, 0.0 }
 0x430   : > { %v2918_v2 = vpack.c.bf16 %v2575_v12, %v2574_v63  ;;  %v2938_v5 = vpack.c.bf16 %v2583_v1, %v2582_v4 }
 0x432   : > { %2990 = vst [vmem:[%s3379_s28 + $0x8] sm:$0xff] %v2918_v2   ;;  %v2539_v46 = vpop.f32.mrf.mxu2  ;;  %v2559_v14 = vpop.f32.mrf.mxu3 }
 0x433   : > { %2994 = vst [vmem:[%s3379_s28 + $0x28] sm:$0xff] %v2938_v5   ;;  %v2540_v30 = vadd.f32 %v4410_v44, %v2539_v46  ;;  %v2560_v17 = vadd.f32 %v4410_v44, %v2559_v14  ;;  %v2502_v22 = vpop.f32.mrf.mxu0  ;;  %v2522_v21 = vpop.f32.mrf.mxu1 }
 0x434   : > { %v2503_v42 = vadd.f32 %v4410_v44, %v2502_v22  ;;  %v2523_v16 = vadd.f32 %v4410_v44, %v2522_v21 }
 0x435   : > { %v2591_v52 = vmax.f32 %v2540_v30, 0.0  ;;  %v2599_v56 = vmax.f32 %v2560_v17, 0.0 }
 0x436   : > { %v2576_v18 = vmax.f32 %v2503_v42, 0.0  ;;  %v2584_v47 = vmax.f32 %v2523_v16, 0.0 }
 0x437   : > { %v2958_v28 = vpack.c.bf16 %v2591_v52, %v2590_v15  ;;  %v2978_v36 = vpack.c.bf16 %v2599_v56, %v2598_v37 }
 0x439   : > { %2998 = vst [vmem:[%s3379_s28 + $0x48] sm:$0xff] %v2958_v28  }
 0x43a   : > { %3002 = vst [vmem:[%s3379_s28 + $0x68] sm:$0xff] %v2978_v36   ;;  %v2542_v38 = vpop.f32.mrf.mxu2  ;;  %v2562_v24 = vpop.f32.mrf.mxu3 }
 0x43b   : > { %v2504_v6 = vpop.f32.mrf.mxu0  ;;  %v2524_v39 = vpop.f32.mrf.mxu1  ;;  %v2543_v61 = vadd.f32 %v4410_v44, %v2542_v38  ;;  %v2563_v58 = vadd.f32 %v4410_v44, %v2562_v24 }
 0x43c   : > { %v2505_v48 = vadd.f32 %v4410_v44, %v2504_v6  ;;  %v2525_v9 = vadd.f32 %v4410_v44, %v2524_v39 }
 0x43d   : > { %v2592_v34 = vmax.f32 %v2543_v61, 0.0  ;;  %v2600_v55 = vmax.f32 %v2563_v58, 0.0 }
 0x43e   : > { %v2577_v43 = vmax.f32 %v2505_v48, 0.0  ;;  %v2585_v45 = vmax.f32 %v2525_v9, 0.0 }
 0x440   : > { %v2923_v49 = vpack.c.bf16 %v2577_v43, %v2576_v18  ;;  %v2943_v57 = vpack.c.bf16 %v2585_v45, %v2584_v47 }
 0x442   : > { %2991 = vst [vmem:[%s3379_s28 + $0x10] sm:$0xff] %v2923_v49   ;;  %v2544_v53 = vpop.f32.mrf.mxu2  ;;  %v2564_v19 = vpop.f32.mrf.mxu3 }
 0x443   : > { %2995 = vst [vmem:[%s3379_s28 + $0x30] sm:$0xff] %v2943_v57   ;;  %v2545_v59 = vadd.f32 %v4410_v44, %v2544_v53  ;;  %v2565_v33 = vadd.f32 %v4410_v44, %v2564_v19  ;;  %v2507_v27 = vpop.f32.mrf.mxu0  ;;  %v2527_v32 = vpop.f32.mrf.mxu1 }
 0x444   : > { %v2508_v51 = vadd.f32 %v4410_v44, %v2507_v27  ;;  %v2528_v35 = vadd.f32 %v4410_v44, %v2527_v32 }
 0x445   : > { %v2593_v11 = vmax.f32 %v2545_v59, 0.0  ;;  %v2601_v50 = vmax.f32 %v2565_v33, 0.0 }
 0x446   : > { %v2578_v41 = vmax.f32 %v2508_v51, 0.0  ;;  %v2586_v31 = vmax.f32 %v2528_v35, 0.0 }
 0x447   : > { %v2963_v23 = vpack.c.bf16 %v2593_v11, %v2592_v34  ;;  %v2983_v7 = vpack.c.bf16 %v2601_v50, %v2600_v55 }
 0x449   : > { %2999 = vst [vmem:[%s3379_s28 + $0x50] sm:$0xff] %v2963_v23  }
 0x44a   : > { %3003 = vst [vmem:[%s3379_s28 + $0x70] sm:$0xff] %v2983_v7   ;;  %v2547_v13 = vpop.f32.mrf.mxu2  ;;  %v2567_v25 = vpop.f32.mrf.mxu3 }
 0x44b   : > { %v2509_v40 = vpop.f32.mrf.mxu0  ;;  %v2529_v10 = vpop.f32.mrf.mxu1  ;;  %v2548_v62 = vadd.f32 %v4410_v44, %v2547_v13  ;;  %v2568_v63 = vadd.f32 %v4410_v44, %v2567_v25 }
 0x44c   : > { %v2510_v3 = vadd.f32 %v4410_v44, %v2509_v40  ;;  %v2530_v20 = vadd.f32 %v4410_v44, %v2529_v10 }
 0x44d   : > { %v2594_v5 = vmax.f32 %v2548_v62, 0.0  ;;  %v2602_v29 = vmax.f32 %v2568_v63, 0.0 }
 0x44e   : > { %v2579_v54 = vmax.f32 %v2510_v3, 0.0  ;;  %v2587_v60 = vmax.f32 %v2530_v20, 0.0 }
 0x450   : > { %v2928_v26 = vpack.c.bf16 %v2579_v54, %v2578_v41  ;;  %v2948_v0 = vpack.c.bf16 %v2587_v60, %v2586_v31 }
 0x452   : > { %2992 = vst [vmem:[%s3379_s28 + $0x18] sm:$0xff] %v2928_v26   ;;  %v2549_v4 = vpop.f32.mrf.mxu2  ;;  %v2569_v12 = vpop.f32.mrf.mxu3 }
 0x453   : > { %2996 = vst [vmem:[%s3379_s28 + $0x38] sm:$0xff] %v2948_v0   ;;  %v2550_v1 = vadd.f32 %v4410_v44, %v2549_v4  ;;  %v2570_v2 = vadd.f32 %v4410_v44, %v2569_v12 }
 0x455   : > { %v2595_v8 = vmax.f32 %v2550_v1, 0.0  ;;  %v2603_v46 = vmax.f32 %v2570_v2, 0.0 }
 0x457   : > { %v2968_v14 = vpack.c.bf16 %v2595_v8, %v2594_v5  ;;  %v2988_v30 = vpack.c.bf16 %v2603_v46, %v2602_v29 }
 0x459   : > { %3000 = vst [vmem:[%s3379_s28 + $0x58] sm:$0xff] %v2968_v14  }
 0x45a   : > { %3004 = vst [vmem:[%s3379_s28 + $0x78] sm:$0xff] %v2988_v30  }
 0x45b   : > { %3140 = shalt.err (!%p3137_p0)
}
 0x45c   : > { %s3235_s29 = smov 64   ;;  %s3236_s28 = smov 320  }
 0x45d   : > { %s3237_s18 = smov 4  }
 0x45e   : > { %3012 = dma.vmem_to_hbm [thread:$0]  (%p3337_p10), %s2683_s5, 2048, %s2685_s9, %s2669_s11, %s3235_s29, %s3236_s28, %s3237_s18  }
 0x45f PF: > { %p3018_p1 = scmp.ge.s32.totalorder %s3223_s21, 2  ;;  %s2699_s1 = sand.u32 1, %s3187_s12  }
 0x460   : > { %s2700_s4 = scalar_lea.sflag [#allocation6], %s2699_s1 }
 0x461   : > { %p3015_p2 = pnand %p3018_p1, %p3344_p12 }
 0x463   : > { %p3016_p3 = pneg %p3015_p2 }
 0x465   : > { %3182 = dma.done.wait (%p3016_p3), %s2700_s4, 2048  }
 0x466   : > { %3184 = vsyncadd (%p3016_p3), %s2700_s4, 4294965248  ;;  %s16_s21 = sadd.s32 1, %s3223_s21   ;;  %s4523_s6 = sld [smem:[#allocation8_spill]] }
 0x467   : > { %p13_p4 = scmp.ge.s32.totalorder %s16_s21, 12   ;;  %s4524_s12 = smov %s3191_s13 }
 0x468   : > { %s4525_s13 = smov %s3195_s14  ;;  %s4526_s14 = smov %s3342_s7 }
 0x469   : > { %s4527_s15 = smov %s3203_s16  ;;  %s4528_s16 = smov %s3331_s30 }
 0x46a   : > { %s4529_s17 = smov %s3215_s19  ;;  %s4530_s18 = smov %s3219_s20 }
 0x46b   : > { %s4531_s19 = smov %s4534_s24  ;;  %15 = sbr.rel (!%p13_p4) target bundleno = 8 (0x8), region = 125 }
 0x46c   : > { %s4532_s20 = smov %s4523_s6 }
 0x470   :  { %2706 = vsyncpa [#allocation6], 1 }
 0x471   :  { %2708 = vsyncpa [#allocation6 + $0x1], 1 }

</bundles_post_ra>
